<compile_context>
chip_gen: v7x
topology: tpu7x:2x2x1
jax: 0.10.0
libtpu: 0.0.40
codegen_flags: <defaults>
</compile_context>

<pallas_src>
import functools

import jax
import jax.numpy as jnp
from jax.experimental import pallas as pl
from jax.experimental.pallas import tpu as pltpu


ROW_TILE = 512        # rows per grid step for streaming (mem-bound) kernels
FFN_ROW_TILE = 256    # smaller cap: FFN holds a (tm, d_ffn) f32 intermediate
VMEM_LIMIT = 48 * 1024 * 1024


# ----------------------------------------------------------------------------
# small helpers
# ----------------------------------------------------------------------------

def _round_up(x, m):
    return (x + m - 1) // m * m


def _row_tiling(M, tile=ROW_TILE):
    # largest tile <= `tile`, padded to a sublane multiple; prefer >= 2 grid
    # steps so both v7x TensorCores can be used on the "parallel" axis.
    tm = min(tile, _round_up(max((M + 1) // 2, 1), 8))
    Mp = _round_up(max(M, 1), tm)
    return tm, Mp


def _pad_rows(x, Mp):
    M = x.shape[0]
    if Mp == M:
        return x
    return jnp.pad(x, [(0, Mp - M)] + [(0, 0)] * (x.ndim - 1))


def _cparams(n_parallel=1):
    return pltpu.CompilerParams(
        dimension_semantics=("parallel",) * n_parallel,
        vmem_limit_bytes=VMEM_LIMIT)


# ----------------------------------------------------------------------------
# Pallas kernels
# ----------------------------------------------------------------------------

def _linear_kernel(x_ref, w_ref, b_ref, o_ref):
    acc = jnp.dot(x_ref[...].astype(jnp.bfloat16), w_ref[...],
                  preferred_element_type=jnp.float32) + b_ref[...]
    o_ref[...] = acc.astype(o_ref.dtype)


def _linear_mask_kernel(x_ref, m_ref, w_ref, b_ref, o_ref):
    acc = jnp.dot(x_ref[...].astype(jnp.bfloat16), w_ref[...],
                  preferred_element_type=jnp.float32) + b_ref[...]
    o_ref[...] = (acc * m_ref[...]).astype(o_ref.dtype)


def _linear_add_ln_kernel(x_ref, res_ref, w_ref, b_ref, g_ref, be_ref, o_ref):
    y = jnp.dot(x_ref[...].astype(jnp.bfloat16), w_ref[...],
                preferred_element_type=jnp.float32) + b_ref[...]
    z = res_ref[...].astype(jnp.float32) + y
    mu = jnp.mean(z, axis=-1, keepdims=True)
    var = jnp.mean((z - mu) ** 2, axis=-1, keepdims=True)
    o_ref[...] = ((z - mu) * jax.lax.rsqrt(var + 1e-5) * g_ref[...]
                  + be_ref[...]).astype(o_ref.dtype)


def _ffn_ln_kernel(x_ref, w1_ref, b1_ref, w2_ref, b2_ref, g_ref, be_ref, o_ref):
    xb = x_ref[...].astype(jnp.bfloat16)
    h = jnp.dot(xb, w1_ref[...], preferred_element_type=jnp.float32) + b1_ref[...]
    h = jnp.maximum(h, 0.0)
    y = jnp.dot(h.astype(jnp.bfloat16), w2_ref[...],
                preferred_element_type=jnp.float32) + b2_ref[...]
    z = xb.astype(jnp.float32) + y
    mu = jnp.mean(z, axis=-1, keepdims=True)
    var = jnp.mean((z - mu) ** 2, axis=-1, keepdims=True)
    o_ref[...] = ((z - mu) * jax.lax.rsqrt(var + 1e-5) * g_ref[...]
                  + be_ref[...]).astype(o_ref.dtype)


def _deform_proj_kernel(x_ref, pos_ref, w_ref, b_ref, off_ref, aw_ref, *,
                        n_off, n_heads, lp):
    # query = x + pos; ONE fused matmul for sampling offsets + attention logits.
    q = (x_ref[...] + pos_ref[...]).astype(jnp.bfloat16)
    acc = jnp.dot(q, w_ref[...], preferred_element_type=jnp.float32) + b_ref[...]
    off_ref[...] = acc[:, :n_off].astype(off_ref.dtype)
    logit = acc[:, n_off:]
    # grouped softmax over (levels*points) per head, with PER-GROUP max
    groups = []
    for h in range(n_heads):
        lg = logit[:, h * lp:(h + 1) * lp]
        m = jnp.max(lg, axis=-1, keepdims=True)
        e = jnp.exp(lg - m)
        inv = pl.reciprocal(jnp.sum(e, axis=-1, keepdims=True), approx=True)
        groups.append(e * inv)
    aw_ref[...] = jnp.concatenate(groups, axis=-1).astype(aw_ref.dtype)


def _qkv_proj_kernel(x_ref, pos_ref, wqk_ref, bqk_ref, wv_ref, bv_ref,
                     qk_ref, v_ref):
    xp = (x_ref[...] + pos_ref[...]).astype(jnp.bfloat16)
    qk_ref[...] = (jnp.dot(xp, wqk_ref[...], preferred_element_type=jnp.float32)
                   + bqk_ref[...]).astype(qk_ref.dtype)
    v_ref[...] = (jnp.dot(x_ref[...].astype(jnp.bfloat16), wv_ref[...],
                          preferred_element_type=jnp.float32)
                  + bv_ref[...]).astype(v_ref.dtype)


def _mha_core_kernel(q_ref, k_ref, v_ref, o_ref):
    # one grid step = one batch element, heads batched via einsum (no unroll)
    scale = float(q_ref.shape[-1]) ** -0.5
    s = jnp.einsum('hqd,hkd->hqk', q_ref[...], k_ref[...],
                   preferred_element_type=jnp.float32) * scale
    m = jnp.max(s, axis=-1, keepdims=True)
    e = jnp.exp(s - m)
    p = e * pl.reciprocal(jnp.sum(e, axis=-1, keepdims=True), approx=True)
    o_ref[...] = jnp.einsum('hqk,hkd->hqd', p.astype(jnp.bfloat16), v_ref[...],
                            preferred_element_type=jnp.float32).astype(o_ref.dtype)


# ----------------------------------------------------------------------------
# wrappers (row tiling + bf16 activations; weights cast to bf16, biases f32)
# ----------------------------------------------------------------------------

def pallas_linear(x, p, out_dtype=jnp.float32):
    lead, K = x.shape[:-1], x.shape[-1]
    N = p['w'].shape[1]
    x2 = x.reshape(-1, K).astype(jnp.bfloat16)
    M = x2.shape[0]
    tm, Mp = _row_tiling(M)
    y = pl.pallas_call(
        _linear_kernel,
        out_shape=jax.ShapeDtypeStruct((Mp, N), out_dtype),
        grid=(Mp // tm,),
        in_specs=[pl.BlockSpec((tm, K), lambda i: (i, 0)),
                  pl.BlockSpec((K, N), lambda i: (0, 0)),
                  pl.BlockSpec((1, N), lambda i: (0, 0))],
        out_specs=pl.BlockSpec((tm, N), lambda i: (i, 0)),
        compiler_params=_cparams(),
    )(_pad_rows(x2, Mp), p['w'].astype(jnp.bfloat16),
      p['b'].reshape(1, N).astype(jnp.float32))
    return y[:M].reshape(*lead, N)


def pallas_masked_value_proj(x, keep, p):
    # x: (B, S, d) bf16; keep: (B, S) with 1.0 = valid token, 0.0 = padded
    B, S, K = x.shape
    N = p['w'].shape[1]
    M = B * S
    tm, Mp = _row_tiling(M)
    y = pl.pallas_call(
        _linear_mask_kernel,
        out_shape=jax.ShapeDtypeStruct((Mp, N), jnp.bfloat16),
        grid=(Mp // tm,),
        in_specs=[pl.BlockSpec((tm, K), lambda i: (i, 0)),
                  pl.BlockSpec((tm, 1), lambda i: (i, 0)),
                  pl.BlockSpec((K, N), lambda i: (0, 0)),
                  pl.BlockSpec((1, N), lambda i: (0, 0))],
        out_specs=pl.BlockSpec((tm, N), lambda i: (i, 0)),
        compiler_params=_cparams(),
    )(_pad_rows(x.reshape(M, K).astype(jnp.bfloat16), Mp),
      _pad_rows(keep.reshape(M, 1).astype(jnp.float32), Mp),
      p['w'].astype(jnp.bfloat16),
      p['b'].reshape(1, N).astype(jnp.float32))
    return y[:M].reshape(B, S, N)


def pallas_linear_add_ln(x, res, p_lin, p_norm):
    lead, K = x.shape[:-1], x.shape[-1]
    N = p_lin['w'].shape[1]
    x2 = x.reshape(-1, K).astype(jnp.bfloat16)
    r2 = res.reshape(-1, N).astype(jnp.bfloat16)
    M = x2.shape[0]
    tm, Mp = _row_tiling(M)
    y = pl.pallas_call(
        _linear_add_ln_kernel,
        out_shape=jax.ShapeDtypeStruct((Mp, N), jnp.bfloat16),
        grid=(Mp // tm,),
        in_specs=[pl.BlockSpec((tm, K), lambda i: (i, 0)),
                  pl.BlockSpec((tm, N), lambda i: (i, 0)),
                  pl.BlockSpec((K, N), lambda i: (0, 0)),
                  pl.BlockSpec((1, N), lambda i: (0, 0)),
                  pl.BlockSpec((1, N), lambda i: (0, 0)),
                  pl.BlockSpec((1, N), lambda i: (0, 0))],
        out_specs=pl.BlockSpec((tm, N), lambda i: (i, 0)),
        compiler_params=_cparams(),
    )(_pad_rows(x2, Mp), _pad_rows(r2, Mp),
      p_lin['w'].astype(jnp.bfloat16),
      p_lin['b'].reshape(1, N).astype(jnp.float32),
      p_norm['g'].reshape(1, N).astype(jnp.float32),
      p_norm['b'].reshape(1, N).astype(jnp.float32))
    return y[:M].reshape(*lead, N)


def pallas_ffn_ln(x, p1, p2, p_norm):
    lead, D = x.shape[:-1], x.shape[-1]
    F = p1['w'].shape[1]
    x2 = x.reshape(-1, D).astype(jnp.bfloat16)
    M = x2.shape[0]
    tm, Mp = _row_tiling(M, FFN_ROW_TILE)
    y = pl.pallas_call(
        _ffn_ln_kernel,
        out_shape=jax.ShapeDtypeStruct((Mp, D), jnp.bfloat16),
        grid=(Mp // tm,),
        in_specs=[pl.BlockSpec((tm, D), lambda i: (i, 0)),
                  pl.BlockSpec((D, F), lambda i: (0, 0)),
                  pl.BlockSpec((1, F), lambda i: (0, 0)),
                  pl.BlockSpec((F, D), lambda i: (0, 0)),
                  pl.BlockSpec((1, D), lambda i: (0, 0)),
                  pl.BlockSpec((1, D), lambda i: (0, 0)),
                  pl.BlockSpec((1, D), lambda i: (0, 0))],
        out_specs=pl.BlockSpec((tm, D), lambda i: (i, 0)),
        compiler_params=_cparams(),
    )(_pad_rows(x2, Mp),
      p1['w'].astype(jnp.bfloat16), p1['b'].reshape(1, F).astype(jnp.float32),
      p2['w'].astype(jnp.bfloat16), p2['b'].reshape(1, D).astype(jnp.float32),
      p_norm['g'].reshape(1, D).astype(jnp.float32),
      p_norm['b'].reshape(1, D).astype(jnp.float32))
    return y[:M].reshape(*lead, D)


def pallas_deform_proj(query, query_pos, p_off, p_aw, n_heads, n_levels, n_points):
    N, Lq, D = query.shape
    LP = n_levels * n_points
    HLP = n_heads * LP
    NOFF = HLP * 2
    NTOT = NOFF + HLP
    M = N * Lq
    tm, Mp = _row_tiling(M)
    wcat = jnp.concatenate([p_off['w'], p_aw['w']], axis=1).astype(jnp.bfloat16)
    bcat = jnp.concatenate([p_off['b'], p_aw['b']], axis=0).reshape(1, NTOT)
    kern = functools.partial(_deform_proj_kernel, n_off=NOFF,
                             n_heads=n_heads, lp=LP)
    off, aw = pl.pallas_call(
        kern,
        out_shape=(jax.ShapeDtypeStruct((Mp, NOFF), jnp.float32),
                   jax.ShapeDtypeStruct((Mp, HLP), jnp.float32)),
        grid=(Mp // tm,),
        in_specs=[pl.BlockSpec((tm, D), lambda i: (i, 0)),
                  pl.BlockSpec((tm, D), lambda i: (i, 0)),
                  pl.BlockSpec((D, NTOT), lambda i: (0, 0)),
                  pl.BlockSpec((1, NTOT), lambda i: (0, 0))],
        out_specs=(pl.BlockSpec((tm, NOFF), lambda i: (i, 0)),
                   pl.BlockSpec((tm, HLP), lambda i: (i, 0))),
        compiler_params=_cparams(),
    )(_pad_rows(query.reshape(M, D).astype(jnp.bfloat16), Mp),
      _pad_rows(query_pos.reshape(M, D).astype(jnp.bfloat16), Mp),
      wcat, bcat.astype(jnp.float32))
    offsets = off[:M].reshape(N, Lq, n_heads, n_levels, n_points, 2)
    attw = aw[:M].reshape(N, Lq, n_heads, n_levels, n_points)
    return offsets, attw


def pallas_qkv_proj(tgt, qpos, p_attn):
    B, Lq, D = tgt.shape
    M = B * Lq
    N2 = p_attn['qk']['w'].shape[1]
    tm, Mp = _row_tiling(M)
    qk, v = pl.pallas_call(
        _qkv_proj_kernel,
        out_shape=(jax.ShapeDtypeStruct((Mp, N2), jnp.bfloat16),
                   jax.ShapeDtypeStruct((Mp, D), jnp.bfloat16)),
        grid=(Mp // tm,),
        in_specs=[pl.BlockSpec((tm, D), lambda i: (i, 0)),
                  pl.BlockSpec((tm, D), lambda i: (i, 0)),
                  pl.BlockSpec((D, N2), lambda i: (0, 0)),
                  pl.BlockSpec((1, N2), lambda i: (0, 0)),
                  pl.BlockSpec((D, D), lambda i: (0, 0)),
                  pl.BlockSpec((1, D), lambda i: (0, 0))],
        out_specs=(pl.BlockSpec((tm, N2), lambda i: (i, 0)),
                   pl.BlockSpec((tm, D), lambda i: (i, 0))),
        compiler_params=_cparams(),
    )(_pad_rows(tgt.reshape(M, D).astype(jnp.bfloat16), Mp),
      _pad_rows(qpos.reshape(M, D).astype(jnp.bfloat16), Mp),
      p_attn['qk']['w'].astype(jnp.bfloat16),
      p_attn['qk']['b'].reshape(1, N2).astype(jnp.float32),
      p_attn['v']['w'].astype(jnp.bfloat16),
      p_attn['v']['b'].reshape(1, D).astype(jnp.float32))
    return qk[:M].reshape(B, Lq, N2), v[:M].reshape(B, Lq, D)


def pallas_mha_core(q, k, v, n_heads):
    BH, Lq, Dh = q.shape
    B = BH // n_heads
    spec = pl.BlockSpec((n_heads, Lq, Dh), lambda b: (b, 0, 0))
    return pl.pallas_call(
        _mha_core_kernel,
        out_shape=jax.ShapeDtypeStruct((BH, Lq, Dh), jnp.bfloat16),
        grid=(B,),
        in_specs=[spec, spec, spec],
        out_specs=spec,
        compiler_params=_cparams(),
    )(q.astype(jnp.bfloat16), k.astype(jnp.bfloat16), v.astype(jnp.bfloat16))


# ----------------------------------------------------------------------------
# MSDeformAttn bilinear sampling: per-corner gather, O(Lq * L * P * Dh)
# (replaces the dense one-hot (Lq, S) matrix of the previous version)
# ----------------------------------------------------------------------------

def ms_deform_sample(value, sampling_locations, attention_weights, spatial_shapes):
    # value: (N, S, H, Dh) bf16, padded tokens already zeroed
    # sampling_locations: (N, Lq, H, L, P, 2) in [0,1]
    # attention_weights:  (N, Lq, H, L, P)
    # Matches grid_sample(mode=bilinear, padding_mode=zeros, align_corners=False)
    # weighted by attention weights and summed over points and levels.
    # TODO(synk): replace the XLA take_along_axis with a manual-DMA Pallas gather.
    N, Lq, Hh = sampling_locations.shape[:3]
    Dh = value.shape[-1]
    P = sampling_locations.shape[4]
    v_nh = jnp.transpose(value, (0, 2, 1, 3))                  # (N, H, S, Dh)
    out = jnp.zeros((N, Hh, Lq, Dh), jnp.float32)
    start = 0
    for lvl, (H_, W_) in enumerate(spatial_shapes):
        loc = sampling_locations[:, :, :, lvl]                 # (N, Lq, H, P, 2)
        aw = attention_weights[:, :, :, lvl]                   # (N, Lq, H, P)
        x = loc[..., 0] * W_ - 0.5
        y = loc[..., 1] * H_ - 0.5
        x0 = jnp.floor(x)
        y0 = jnp.floor(y)
        fx = x - x0
        fy = y - y0
        corners = ((0.0, 0.0, (1.0 - fx) * (1.0 - fy)),
                   (1.0, 0.0, fx * (1.0 - fy)),
                   (0.0, 1.0, (1.0 - fx) * fy),
                   (1.0, 1.0, fx * fy))
        for dx, dy, w in corners:
            xi = x0 + dx
            yi = y0 + dy
            valid = ((xi >= 0) & (xi <= W_ - 1)
                     & (yi >= 0) & (yi <= H_ - 1)).astype(jnp.float32)
            idx = (start
                   + jnp.clip(yi, 0, H_ - 1).astype(jnp.int32) * W_
                   + jnp.clip(xi, 0, W_ - 1).astype(jnp.int32))     # (N,Lq,H,P)
            wt = w * valid * aw                                     # (N,Lq,H,P)
            idx_t = jnp.transpose(idx, (0, 2, 1, 3)).reshape(N, Hh, Lq * P)
            g = jnp.take_along_axis(v_nh, idx_t[..., None], axis=2)  # (N,H,Lq*P,Dh)
            g = g.reshape(N, Hh, Lq, P, Dh).astype(jnp.float32)
            wt_t = jnp.transpose(wt, (0, 2, 1, 3))                   # (N,H,Lq,P)
            out = out + jnp.sum(g * wt_t[..., None], axis=3)
        start += H_ * W_
    out = jnp.transpose(out, (0, 2, 1, 3)).reshape(N, Lq, Hh * Dh)
    return out.astype(jnp.bfloat16)


def ms_deform_attn_block(p_attn, p_norm, query, query_pos, residual,
                         reference_points, input_flatten, keep_mask,
                         spatial_shapes, cfg):
    nhead, L, P = cfg['nhead'], cfg['n_levels'], cfg['n_points']
    N, Lq, d = query.shape
    Dh = d // nhead

    # value projection + padding-mask zeroing (fused)
    value = pallas_masked_value_proj(input_flatten, keep_mask, p_attn['value_proj'])
    value = value.reshape(N, -1, nhead, Dh)

    # fused sampling-offset / attention-weight projection + per-head softmax
    offsets, attw = pallas_deform_proj(query, query_pos,
                                       p_attn['sampling_offsets'],
                                       p_attn['attention_weights'],
                                       nhead, L, P)

    normalizer = jnp.array([[w, h] for (h, w) in spatial_shapes], dtype=jnp.float32)
    sampling_locations = (reference_points[:, :, None, :, None, :]
                          + offsets / normalizer[None, None, None, :, None, :])

    sampled = ms_deform_sample(value, sampling_locations, attw, spatial_shapes)

    # output projection + residual + LayerNorm (fused)
    return pallas_linear_add_ln(sampled, residual, p_attn['output_proj'], p_norm)


# ----------------------------------------------------------------------------
# Encoder / decoder layers (dropout = identity, eval semantics)
# ----------------------------------------------------------------------------

def encoder_layer_fwd(p, src, pos_b, reference_points, spatial_shapes, keep_mask, cfg):
    src = ms_deform_attn_block(p['self_attn'], p['norm1'], src, pos_b, src,
                               reference_points, src, keep_mask,
                               spatial_shapes, cfg)
    return pallas_ffn_ln(src, p['linear1'], p['linear2'], p['norm2'])


def decoder_layer_fwd(p, tgt, qpos_b, reference_points_input, memory,
                      spatial_shapes, keep_mask, cfg):
    B, Lq, d = tgt.shape
    nhead = cfg['nhead']
    Dh = d // nhead

    # ---- self attention: fused QK/V projection, head-batched core, out+LN ----
    qk, v = pallas_qkv_proj(tgt, qpos_b, p['self_attn'])
    q, k = qk[..., :d], qk[..., d:]

    def split_heads(x):
        return x.reshape(B, Lq, nhead, Dh).transpose(0, 2, 1, 3).reshape(B * nhead, Lq, Dh)

    oh = pallas_mha_core(split_heads(q), split_heads(k), split_heads(v), nhead)
    o = oh.reshape(B, nhead, Lq, Dh).transpose(0, 2, 1, 3).reshape(B, Lq, d)
    tgt = pallas_linear_add_ln(o, tgt, p['self_attn']['out'], p['norm2'])

    # ---- cross attention (MSDeformAttn) + norm1 ----
    tgt = ms_deform_attn_block(p['cross_attn'], p['norm1'], tgt, qpos_b, tgt,
                               reference_points_input, memory, keep_mask,
                               spatial_shapes, cfg)

    # ---- FFN + norm3 ----
    return pallas_ffn_ln(tgt, p['linear1'], p['linear2'], p['norm3'])


# ----------------------------------------------------------------------------
# DeformableTransformer forward (two_stage=False, return_intermediate=False)
# ----------------------------------------------------------------------------

def get_valid_ratio(mask):
    _, Hm, Wm = mask.shape
    valid_H = jnp.sum(~mask[:, :, 0], axis=1).astype(jnp.float32)
    valid_W = jnp.sum(~mask[:, 0, :], axis=1).astype(jnp.float32)
    return jnp.stack([valid_W / Wm, valid_H / Hm], axis=-1)


def get_reference_points(spatial_shapes, valid_ratios):
    refs = []
    for lvl, (H, W) in enumerate(spatial_shapes):
        ref_y, ref_x = jnp.meshgrid(
            jnp.linspace(0.5, H - 0.5, H, dtype=jnp.float32),
            jnp.linspace(0.5, W - 0.5, W, dtype=jnp.float32),
            indexing='ij')
        ref_y = ref_y.reshape(-1)[None] / (valid_ratios[:, None, lvl, 1] * H)
        ref_x = ref_x.reshape(-1)[None] / (valid_ratios[:, None, lvl, 0] * W)
        refs.append(jnp.stack((ref_x, ref_y), axis=-1))
    reference_points = jnp.concatenate(refs, axis=1)                # (B, S, 2)
    return reference_points[:, :, None] * valid_ratios[:, None]    # (B, S, L, 2)


def deformable_transformer_forward(params, srcs, masks, pos_embeds, query_embed, cfg):
    spatial_shapes = []
    src_flat, mask_flat, pos_flat = [], [], []
    for lvl, (src, mask, pos) in enumerate(zip(srcs, masks, pos_embeds)):
        B, C, H, W = src.shape
        spatial_shapes.append((H, W))
        src_flat.append(src.reshape(B, C, H * W).transpose(0, 2, 1))
        mask_flat.append(mask.reshape(B, H * W))
        p = pos.reshape(B, C, H * W).transpose(0, 2, 1)
        pos_flat.append(p + params['level_embed'][lvl][None, None, :])
    # single bf16 cast per tensor, hoisted out of the layer loops
    src_flatten = jnp.concatenate(src_flat, axis=1).astype(jnp.bfloat16)
    pos_b = jnp.concatenate(pos_flat, axis=1).astype(jnp.bfloat16)
    mask_flatten = jnp.concatenate(mask_flat, axis=1)
    keep_mask = 1.0 - mask_flatten.astype(jnp.float32)
    valid_ratios = jnp.stack([get_valid_ratio(m) for m in masks], axis=1)   # (B, L, 2)

    # ---------------- encoder ----------------
    enc_ref = get_reference_points(spatial_shapes, valid_ratios)
    output = src_flatten
    for lp in params['encoder_layers']:
        output = encoder_layer_fwd(lp, output, pos_b, enc_ref,
                                   spatial_shapes, keep_mask, cfg)
    memory = output
    bs = memory.shape[0]

    # ---------------- decoder prep (single-stage path) ----------------
    qe, tgt = jnp.split(query_embed, 2, axis=1)
    qe_b = jnp.broadcast_to(qe[None], (bs,) + qe.shape).astype(jnp.bfloat16)
    tgt_b = jnp.broadcast_to(tgt[None], (bs,) + tgt.shape).astype(jnp.bfloat16)
    reference_points = jax.nn.sigmoid(pallas_linear(qe_b, params['reference_points']))
    init_reference_out = reference_points

    # loop-invariant (no iterative bbox refinement) -> hoisted out of the loop
    rp_in = reference_points[:, :, None] * valid_ratios[:, None]   # (B, Lq, L, 2)

    # ---------------- decoder ----------------
    out = tgt_b
    for lp in params['decoder_layers']:
        out = decoder_layer_fwd(lp, out, qe_b, rp_in, memory,
                                spatial_shapes, keep_mask, cfg)
    hs = out.astype(jnp.float32)
    return hs, init_reference_out, reference_points, None, None


# ----------------------------------------------------------------------------
# Deterministic parameter init (synthetic; shapes follow the PyTorch __init__)
# ----------------------------------------------------------------------------

class KeyGen:
    def __init__(self, key):
        self.key = key

    def __call__(self):
        self.key, sub = jax.random.split(self.key)
        return sub


def init_params(kg, cfg):
    d = cfg['d_model']
    H = cfg['nhead']
    L = cfg['n_levels']
    P = cfg['n_points']
    ffn = cfg['dim_feedforward']

    def lin(din, dout, w_scale=0.05, b_scale=0.0):
        return {'w': jax.random.normal(kg(), (din, dout), jnp.float32) * w_scale,
                'b': jax.random.normal(kg(), (dout,), jnp.float32) * b_scale}

    def norm():
        return {'g': jnp.ones((d,), jnp.float32), 'b': jnp.zeros((d,), jnp.float32)}

    def msdeform():
        return {'sampling_offsets': lin(d, H * L * P * 2, 0.01, 0.5),
                'attention_weights': lin(d, H * L * P, 0.02, 0.0),
                'value_proj': lin(d, d),
                'output_proj': lin(d, d)}

    def enc_layer():
        return {'self_attn': msdeform(), 'norm1': norm(),
                'linear1': lin(d, ffn), 'linear2': lin(ffn, d), 'norm2': norm()}

    def dec_layer():
        return {'cross_attn': msdeform(), 'norm1': norm(),
                'self_attn': {'qk': lin(d, 2 * d), 'v': lin(d, d), 'out': lin(d, d)},
                'norm2': norm(),
                'linear1': lin(d, ffn), 'linear2': lin(ffn, d), 'norm3': norm()}

    return {'level_embed': jax.random.normal(kg(), (L, d), jnp.float32),
            'encoder_layers': [enc_layer() for _ in range(cfg['num_encoder_layers'])],
            'decoder_layers': [dec_layer() for _ in range(cfg['num_decoder_layers'])],
            'reference_points': lin(d, 2)}


# ----------------------------------------------------------------------------
# main
# ----------------------------------------------------------------------------

if __name__ == "__main__":
    cfg = dict(d_model=32, nhead=4, num_encoder_layers=2, num_decoder_layers=2,
               dim_feedforward=64, n_levels=2, n_points=2, num_queries=8)

    kg = KeyGen(jax.random.PRNGKey(0))
    params = init_params(kg, cfg)

    B = 2
    d = cfg['d_model']
    level_shapes = [(8, 8), (4, 4)]

    srcs, masks, pos_embeds = [], [], []
    for li, (H, W) in enumerate(level_shapes):
        srcs.append(jax.random.normal(kg(), (B, d, H, W), jnp.float32))
        pos_embeds.append(jax.random.normal(kg(), (B, d, H, W), jnp.float32))
        # batch 0 fully valid; batch 1 valid only on the top-left 3/4 rectangle
        vh = jnp.array([H, (3 * H) // 4])
        vw = jnp.array([W, (3 * W) // 4])
        rows = jnp.arange(H)[None, :, None] >= vh[:, None, None]
        cols = jnp.arange(W)[None, None, :] >= vw[:, None, None]
        masks.append(rows | cols)

    query_embed = jax.random.normal(kg(), (cfg['num_queries'], 2 * d), jnp.float32)

    fwd = jax.jit(functools.partial(deformable_transformer_forward, cfg=cfg))
    hs, init_ref, inter_ref, _, _ = fwd(params, srcs, masks, pos_embeds, query_embed)
    jax.block_until_ready(hs)

    assert hs.shape == (B, cfg['num_queries'], d)
    assert init_ref.shape == (B, cfg['num_queries'], 2)
    assert inter_ref.shape == (B, cfg['num_queries'], 2)
    assert bool(jnp.all(jnp.isfinite(hs)))
    print("KERNEL_OK")
</pallas_src>

<mosaic_0001>
module attributes {stable_mosaic.version = 11 : i64} {
  func.func @_deform_proj_kernel(%arg0: i32, %arg1: memref<80x32xbf16, #tpu.memory_space<vmem>>, %arg2: memref<80x32xbf16, #tpu.memory_space<vmem>>, %arg3: memref<32x48xbf16, #tpu.memory_space<vmem>>, %arg4: memref<1x48xf32, #tpu.memory_space<vmem>>, %arg5: memref<80x32xf32, #tpu.memory_space<vmem>>, %arg6: memref<80x16xf32, #tpu.memory_space<vmem>>) attributes {dimension_semantics = [#tpu.dimension_semantics<parallel>], iteration_bounds = array<i64: 2>, scalar_prefetch = 0 : i64, scratch_operands = 0 : i64, tpu.core_type = #tpu.core_type<tc>, window_params = [{transform_indices = @transform_0, window_bounds = array<i64: 80, 32>}, {transform_indices = @transform_1, window_bounds = array<i64: 80, 32>}, {pipeline_mode = #tpu.pipeline_mode<synchronous>, transform_indices = @transform_2, window_bounds = array<i64: 32, 48>}, {pipeline_mode = #tpu.pipeline_mode<synchronous>, transform_indices = @transform_3, window_bounds = array<i64: 1, 48>}, {transform_indices = @transform_4, window_bounds = array<i64: 80, 32>}, {transform_indices = @transform_5, window_bounds = array<i64: 80, 16>}]} {
    %c0 = arith.constant 0 : index
    %c0_0 = arith.constant 0 : index
    %0 = vector.load %arg1[%c0, %c0_0] : memref<80x32xbf16, #tpu.memory_space<vmem>>, vector<80x32xbf16>
    %c0_1 = arith.constant 0 : index
    %c0_2 = arith.constant 0 : index
    %1 = vector.load %arg2[%c0_1, %c0_2] : memref<80x32xbf16, #tpu.memory_space<vmem>>, vector<80x32xbf16>
    %2 = arith.addf %0, %1 : vector<80x32xbf16>
    %c0_3 = arith.constant 0 : index
    %c0_4 = arith.constant 0 : index
    %3 = vector.load %arg3[%c0_3, %c0_4] : memref<32x48xbf16, #tpu.memory_space<vmem>>, vector<32x48xbf16>
    %cst = arith.constant dense<0.000000e+00> : vector<80x48xf32>
    %4 = tpu.matmul %2, %3, %cst {dimension_numbers = #tpu.dot_dimension_numbers<[1], [0], [0], [1], [0, 0, 1, 1], [], []>} : vector<80x32xbf16>, vector<32x48xbf16>, vector<80x48xf32> -> vector<80x48xf32>
    %c0_5 = arith.constant 0 : index
    %c0_6 = arith.constant 0 : index
    %5 = vector.load %arg4[%c0_5, %c0_6] : memref<1x48xf32, #tpu.memory_space<vmem>>, vector<1x48xf32>
    %6 = vector.broadcast %5 : vector<1x48xf32> to vector<80x48xf32>
    %7 = arith.addf %4, %6 : vector<80x48xf32>
    %8 = vector.extract_strided_slice %7 {offsets = [0, 0], sizes = [80, 32], strides = [1, 1]} : vector<80x48xf32> to vector<80x32xf32>
    %c0_7 = arith.constant 0 : index
    %c0_8 = arith.constant 0 : index
    %9 = vector.load %arg5[%c0_7, %c0_8] : memref<80x32xf32, #tpu.memory_space<vmem>>, vector<80x32xf32>
    tpu.vector_store %arg5[%c0_7, %c0_8], %8 {strides = array<i32>} : memref<80x32xf32, #tpu.memory_space<vmem>>, vector<80x32xf32>,
    %10 = vector.extract_strided_slice %7 {offsets = [0, 32], sizes = [80, 16], strides = [1, 1]} : vector<80x48xf32> to vector<80x16xf32>
    %11 = vector.extract_strided_slice %10 {offsets = [0, 0], sizes = [80, 4], strides = [1, 1]} : vector<80x16xf32> to vector<80x4xf32>
    %cst_9 = arith.constant dense<0xFF800000> : vector<80xf32>
    %12 = vector.multi_reduction <maximumf>, %11, %cst_9 [1] : vector<80x4xf32> to vector<80xf32>
    %13 = vector.shape_cast %12 : vector<80xf32> to vector<80x1xf32>
    %14 = vector.broadcast %13 : vector<80x1xf32> to vector<80x4xf32>
    %15 = arith.subf %11, %14 : vector<80x4xf32>
    %16 = math.exp %15 : vector<80x4xf32>
    %cst_10 = arith.constant dense<0.000000e+00> : vector<80xf32>
    %17 = vector.multi_reduction <add>, %16, %cst_10 [1] : vector<80x4xf32> to vector<80xf32>
    %18 = vector.shape_cast %17 : vector<80xf32> to vector<80x1xf32>
    %19 = tpu.reciprocal %18 {approx = true} : vector<80x1xf32> -> vector<80x1xf32>
    %20 = vector.broadcast %19 : vector<80x1xf32> to vector<80x4xf32>
    %21 = arith.mulf %16, %20 : vector<80x4xf32>
    %22 = vector.extract_strided_slice %10 {offsets = [0, 4], sizes = [80, 4], strides = [1, 1]} : vector<80x16xf32> to vector<80x4xf32>
    %cst_11 = arith.constant dense<0xFF800000> : vector<80xf32>
    %23 = vector.multi_reduction <maximumf>, %22, %cst_11 [1] : vector<80x4xf32> to vector<80xf32>
    %24 = vector.shape_cast %23 : vector<80xf32> to vector<80x1xf32>
    %25 = vector.broadcast %24 : vector<80x1xf32> to vector<80x4xf32>
    %26 = arith.subf %22, %25 : vector<80x4xf32>
    %27 = math.exp %26 : vector<80x4xf32>
    %cst_12 = arith.constant dense<0.000000e+00> : vector<80xf32>
    %28 = vector.multi_reduction <add>, %27, %cst_12 [1] : vector<80x4xf32> to vector<80xf32>
    %29 = vector.shape_cast %28 : vector<80xf32> to vector<80x1xf32>
    %30 = tpu.reciprocal %29 {approx = true} : vector<80x1xf32> -> vector<80x1xf32>
    %31 = vector.broadcast %30 : vector<80x1xf32> to vector<80x4xf32>
    %32 = arith.mulf %27, %31 : vector<80x4xf32>
    %33 = vector.extract_strided_slice %10 {offsets = [0, 8], sizes = [80, 4], strides = [1, 1]} : vector<80x16xf32> to vector<80x4xf32>
    %cst_13 = arith.constant dense<0xFF800000> : vector<80xf32>
    %34 = vector.multi_reduction <maximumf>, %33, %cst_13 [1] : vector<80x4xf32> to vector<80xf32>
    %35 = vector.shape_cast %34 : vector<80xf32> to vector<80x1xf32>
    %36 = vector.broadcast %35 : vector<80x1xf32> to vector<80x4xf32>
    %37 = arith.subf %33, %36 : vector<80x4xf32>
    %38 = math.exp %37 : vector<80x4xf32>
    %cst_14 = arith.constant dense<0.000000e+00> : vector<80xf32>
    %39 = vector.multi_reduction <add>, %38, %cst_14 [1] : vector<80x4xf32> to vector<80xf32>
    %40 = vector.shape_cast %39 : vector<80xf32> to vector<80x1xf32>
    %41 = tpu.reciprocal %40 {approx = true} : vector<80x1xf32> -> vector<80x1xf32>
    %42 = vector.broadcast %41 : vector<80x1xf32> to vector<80x4xf32>
    %43 = arith.mulf %38, %42 : vector<80x4xf32>
    %44 = vector.extract_strided_slice %10 {offsets = [0, 12], sizes = [80, 4], strides = [1, 1]} : vector<80x16xf32> to vector<80x4xf32>
    %cst_15 = arith.constant dense<0xFF800000> : vector<80xf32>
    %45 = vector.multi_reduction <maximumf>, %44, %cst_15 [1] : vector<80x4xf32> to vector<80xf32>
    %46 = vector.shape_cast %45 : vector<80xf32> to vector<80x1xf32>
    %47 = vector.broadcast %46 : vector<80x1xf32> to vector<80x4xf32>
    %48 = arith.subf %44, %47 : vector<80x4xf32>
    %49 = math.exp %48 : vector<80x4xf32>
    %cst_16 = arith.constant dense<0.000000e+00> : vector<80xf32>
    %50 = vector.multi_reduction <add>, %49, %cst_16 [1] : vector<80x4xf32> to vector<80xf32>
    %51 = vector.shape_cast %50 : vector<80xf32> to vector<80x1xf32>
    %52 = tpu.reciprocal %51 {approx = true} : vector<80x1xf32> -> vector<80x1xf32>
    %53 = vector.broadcast %52 : vector<80x1xf32> to vector<80x4xf32>
    %54 = arith.mulf %49, %53 : vector<80x4xf32>
    %55 = tpu.concatenate %21, %32, %43, %54 in 1 : vector<80x4xf32>, vector<80x4xf32>, vector<80x4xf32>, vector<80x4xf32> -> vector<80x16xf32>
    %c0_17 = arith.constant 0 : index
    %c0_18 = arith.constant 0 : index
    %56 = vector.load %arg6[%c0_17, %c0_18] : memref<80x16xf32, #tpu.memory_space<vmem>>, vector<80x16xf32>
    tpu.vector_store %arg6[%c0_17, %c0_18], %55 {strides = array<i32>} : memref<80x16xf32, #tpu.memory_space<vmem>>, vector<80x16xf32>,
    return
  }
  func.func @transform_0(%arg0: i32) -> (i32, i32) {
    %c0_i32 = arith.constant 0 : i32
    %c0_i32_0 = arith.constant 0 : i32
    return %arg0, %c0_i32 : i32, i32
  }
  func.func @transform_1(%arg0: i32) -> (i32, i32) {
    %c0_i32 = arith.constant 0 : i32
    %c0_i32_0 = arith.constant 0 : i32
    return %arg0, %c0_i32 : i32, i32
  }
  func.func @transform_2(%arg0: i32) -> (i32, i32) {
    %c0_i32 = arith.constant 0 : i32
    %c0_i32_0 = arith.constant 0 : i32
    %c0_i32_1 = arith.constant 0 : i32
    return %c0_i32, %c0_i32_0 : i32, i32
  }
  func.func @transform_3(%arg0: i32) -> (i32, i32) {
    %c0_i32 = arith.constant 0 : i32
    %c0_i32_0 = arith.constant 0 : i32
    %c0_i32_1 = arith.constant 0 : i32
    return %c0_i32, %c0_i32_0 : i32, i32
  }
  func.func @transform_4(%arg0: i32) -> (i32, i32) {
    %c0_i32 = arith.constant 0 : i32
    %c0_i32_0 = arith.constant 0 : i32
    return %arg0, %c0_i32 : i32, i32
  }
  func.func @transform_5(%arg0: i32) -> (i32, i32) {
    %c0_i32 = arith.constant 0 : i32
    %c0_i32_0 = arith.constant 0 : i32
    return %arg0, %c0_i32 : i32, i32
  }
}

module attributes {stable_mosaic.version = 11 : i64} {
  func.func @_linear_mask_kernel(%arg0: i32, %arg1: memref<80x32xbf16, #tpu.memory_space<vmem>>, %arg2: memref<80x1xf32, #tpu.memory_space<vmem>>, %arg3: memref<32x32xbf16, #tpu.memory_space<vmem>>, %arg4: memref<1x32xf32, #tpu.memory_space<vmem>>, %arg5: memref<80x32xbf16, #tpu.memory_space<vmem>>) attributes {dimension_semantics = [#tpu.dimension_semantics<parallel>], iteration_bounds = array<i64: 2>, scalar_prefetch = 0 : i64, scratch_operands = 0 : i64, tpu.core_type = #tpu.core_type<tc>, window_params = [{transform_indices = @transform_0, window_bounds = array<i64: 80, 32>}, {transform_indices = @transform_1, window_bounds = array<i64: 80, 1>}, {pipeline_mode = #tpu.pipeline_mode<synchronous>, transform_indices = @transform_2, window_bounds = array<i64: 32, 32>}, {pipeline_mode = #tpu.pipeline_mode<synchronous>, transform_indices = @transform_3, window_bounds = array<i64: 1, 32>}, {transform_indices = @transform_4, window_bounds = array<i64: 80, 32>}]} {
    %c0 = arith.constant 0 : index
    %c0_0 = arith.constant 0 : index
    %0 = vector.load %arg1[%c0, %c0_0] : memref<80x32xbf16, #tpu.memory_space<vmem>>, vector<80x32xbf16>
    %c0_1 = arith.constant 0 : index
    %c0_2 = arith.constant 0 : index
    %1 = vector.load %arg3[%c0_1, %c0_2] : memref<32x32xbf16, #tpu.memory_space<vmem>>, vector<32x32xbf16>
    %cst = arith.constant dense<0.000000e+00> : vector<80x32xf32>
    %2 = tpu.matmul %0, %1, %cst {dimension_numbers = #tpu.dot_dimension_numbers<[1], [0], [0], [1], [0, 0, 1, 1], [], []>} : vector<80x32xbf16>, vector<32x32xbf16>, vector<80x32xf32> -> vector<80x32xf32>
    %c0_3 = arith.constant 0 : index
    %c0_4 = arith.constant 0 : index
    %3 = vector.load %arg4[%c0_3, %c0_4] : memref<1x32xf32, #tpu.memory_space<vmem>>, vector<1x32xf32>
    %4 = vector.broadcast %3 : vector<1x32xf32> to vector<80x32xf32>
    %5 = arith.addf %2, %4 : vector<80x32xf32>
    %c0_5 = arith.constant 0 : index
    %c0_6 = arith.constant 0 : index
    %6 = vector.load %arg2[%c0_5, %c0_6] : memref<80x1xf32, #tpu.memory_space<vmem>>, vector<80x1xf32>
    %7 = vector.broadcast %6 : vector<80x1xf32> to vector<80x32xf32>
    %8 = arith.mulf %5, %7 : vector<80x32xf32>
    %9 = arith.truncf %8 : vector<80x32xf32> to vector<80x32xbf16>
    %c0_7 = arith.constant 0 : index
    %c0_8 = arith.constant 0 : index
    %10 = vector.load %arg5[%c0_7, %c0_8] : memref<80x32xbf16, #tpu.memory_space<vmem>>, vector<80x32xbf16>
    tpu.vector_store %arg5[%c0_7, %c0_8], %9 {strides = array<i32>} : memref<80x32xbf16, #tpu.memory_space<vmem>>, vector<80x32xbf16>,
    return
  }
  func.func @transform_0(%arg0: i32) -> (i32, i32) {
    %c0_i32 = arith.constant 0 : i32
    %c0_i32_0 = arith.constant 0 : i32
    return %arg0, %c0_i32 : i32, i32
  }
  func.func @transform_1(%arg0: i32) -> (i32, i32) {
    %c0_i32 = arith.constant 0 : i32
    %c0_i32_0 = arith.constant 0 : i32
    return %arg0, %c0_i32 : i32, i32
  }
  func.func @transform_2(%arg0: i32) -> (i32, i32) {
    %c0_i32 = arith.constant 0 : i32
    %c0_i32_0 = arith.constant 0 : i32
    %c0_i32_1 = arith.constant 0 : i32
    return %c0_i32, %c0_i32_0 : i32, i32
  }
  func.func @transform_3(%arg0: i32) -> (i32, i32) {
    %c0_i32 = arith.constant 0 : i32
    %c0_i32_0 = arith.constant 0 : i32
    %c0_i32_1 = arith.constant 0 : i32
    return %c0_i32, %c0_i32_0 : i32, i32
  }
  func.func @transform_4(%arg0: i32) -> (i32, i32) {
    %c0_i32 = arith.constant 0 : i32
    %c0_i32_0 = arith.constant 0 : i32
    return %arg0, %c0_i32 : i32, i32
  }
}

module attributes {stable_mosaic.version = 11 : i64} {
  func.func @_linear_add_ln_kernel(%arg0: i32, %arg1: memref<80x32xbf16, #tpu.memory_space<vmem>>, %arg2: memref<80x32xbf16, #tpu.memory_space<vmem>>, %arg3: memref<32x32xbf16, #tpu.memory_space<vmem>>, %arg4: memref<1x32xf32, #tpu.memory_space<vmem>>, %arg5: memref<1x32xf32, #tpu.memory_space<vmem>>, %arg6: memref<1x32xf32, #tpu.memory_space<vmem>>, %arg7: memref<80x32xbf16, #tpu.memory_space<vmem>>) attributes {dimension_semantics = [#tpu.dimension_semantics<parallel>], iteration_bounds = array<i64: 2>, scalar_prefetch = 0 : i64, scratch_operands = 0 : i64, tpu.core_type = #tpu.core_type<tc>, window_params = [{transform_indices = @transform_0, window_bounds = array<i64: 80, 32>}, {transform_indices = @transform_1, window_bounds = array<i64: 80, 32>}, {pipeline_mode = #tpu.pipeline_mode<synchronous>, transform_indices = @transform_2, window_bounds = array<i64: 32, 32>}, {pipeline_mode = #tpu.pipeline_mode<synchronous>, transform_indices = @transform_3, window_bounds = array<i64: 1, 32>}, {pipeline_mode = #tpu.pipeline_mode<synchronous>, transform_indices = @transform_4, window_bounds = array<i64: 1, 32>}, {pipeline_mode = #tpu.pipeline_mode<synchronous>, transform_indices = @transform_5, window_bounds = array<i64: 1, 32>}, {transform_indices = @transform_6, window_bounds = array<i64: 80, 32>}]} {
    %c0 = arith.constant 0 : index
    %c0_0 = arith.constant 0 : index
    %0 = vector.load %arg1[%c0, %c0_0] : memref<80x32xbf16, #tpu.memory_space<vmem>>, vector<80x32xbf16>
    %c0_1 = arith.constant 0 : index
    %c0_2 = arith.constant 0 : index
    %1 = vector.load %arg3[%c0_1, %c0_2] : memref<32x32xbf16, #tpu.memory_space<vmem>>, vector<32x32xbf16>
    %cst = arith.constant dense<0.000000e+00> : vector<80x32xf32>
    %2 = tpu.matmul %0, %1, %cst {dimension_numbers = #tpu.dot_dimension_numbers<[1], [0], [0], [1], [0, 0, 1, 1], [], []>} : vector<80x32xbf16>, vector<32x32xbf16>, vector<80x32xf32> -> vector<80x32xf32>
    %c0_3 = arith.constant 0 : index
    %c0_4 = arith.constant 0 : index
    %3 = vector.load %arg4[%c0_3, %c0_4] : memref<1x32xf32, #tpu.memory_space<vmem>>, vector<1x32xf32>
    %4 = vector.broadcast %3 : vector<1x32xf32> to vector<80x32xf32>
    %5 = arith.addf %2, %4 : vector<80x32xf32>
    %c0_5 = arith.constant 0 : index
    %c0_6 = arith.constant 0 : index
    %6 = vector.load %arg2[%c0_5, %c0_6] : memref<80x32xbf16, #tpu.memory_space<vmem>>, vector<80x32xbf16>
    %7 = arith.extf %6 : vector<80x32xbf16> to vector<80x32xf32>
    %8 = arith.addf %7, %5 : vector<80x32xf32>
    %cst_7 = arith.constant dense<0.000000e+00> : vector<80xf32>
    %9 = vector.multi_reduction <add>, %8, %cst_7 [1] : vector<80x32xf32> to vector<80xf32>
    %10 = vector.shape_cast %9 : vector<80xf32> to vector<80x1xf32>
    %cst_8 = arith.constant 3.200000e+01 : f32
    %11 = vector.broadcast %cst_8 : f32 to vector<80x1xf32>
    %12 = arith.divf %10, %11 : vector<80x1xf32>
    %13 = vector.broadcast %12 : vector<80x1xf32> to vector<80x32xf32>
    %14 = arith.subf %8, %13 : vector<80x32xf32>
    %15 = arith.mulf %14, %14 : vector<80x32xf32>
    %cst_9 = arith.constant dense<0.000000e+00> : vector<80xf32>
    %16 = vector.multi_reduction <add>, %15, %cst_9 [1] : vector<80x32xf32> to vector<80xf32>
    %17 = vector.shape_cast %16 : vector<80xf32> to vector<80x1xf32>
    %cst_10 = arith.constant 3.200000e+01 : f32
    %18 = vector.broadcast %cst_10 : f32 to vector<80x1xf32>
    %19 = arith.divf %17, %18 : vector<80x1xf32>
    %20 = vector.broadcast %12 : vector<80x1xf32> to vector<80x32xf32>
    %21 = arith.subf %8, %20 : vector<80x32xf32>
    %cst_11 = arith.constant 9.99999974E-6 : f32
    %22 = vector.broadcast %cst_11 : f32 to vector<80x1xf32>
    %23 = arith.addf %19, %22 : vector<80x1xf32>
    %24 = math.rsqrt %23 : vector<80x1xf32>
    %25 = vector.broadcast %24 : vector<80x1xf32> to vector<80x32xf32>
    %26 = arith.mulf %21, %25 : vector<80x32xf32>
    %c0_12 = arith.constant 0 : index
    %c0_13 = arith.constant 0 : index
    %27 = vector.load %arg5[%c0_12, %c0_13] : memref<1x32xf32, #tpu.memory_space<vmem>>, vector<1x32xf32>
    %28 = vector.broadcast %27 : vector<1x32xf32> to vector<80x32xf32>
    %29 = arith.mulf %26, %28 : vector<80x32xf32>
    %c0_14 = arith.constant 0 : index
    %c0_15 = arith.constant 0 : index
    %30 = vector.load %arg6[%c0_14, %c0_15] : memref<1x32xf32, #tpu.memory_space<vmem>>, vector<1x32xf32>
    %31 = vector.broadcast %30 : vector<1x32xf32> to vector<80x32xf32>
    %32 = arith.addf %29, %31 : vector<80x32xf32>
    %33 = arith.truncf %32 : vector<80x32xf32> to vector<80x32xbf16>
    %c0_16 = arith.constant 0 : index
    %c0_17 = arith.constant 0 : index
    %34 = vector.load %arg7[%c0_16, %c0_17] : memref<80x32xbf16, #tpu.memory_space<vmem>>, vector<80x32xbf16>
    tpu.vector_store %arg7[%c0_16, %c0_17], %33 {strides = array<i32>} : memref<80x32xbf16, #tpu.memory_space<vmem>>, vector<80x32xbf16>,
    return
  }
  func.func @transform_0(%arg0: i32) -> (i32, i32) {
    %c0_i32 = arith.constant 0 : i32
    %c0_i32_0 = arith.constant 0 : i32
    return %arg0, %c0_i32 : i32, i32
  }
  func.func @transform_1(%arg0: i32) -> (i32, i32) {
    %c0_i32 = arith.constant 0 : i32
    %c0_i32_0 = arith.constant 0 : i32
    return %arg0, %c0_i32 : i32, i32
  }
  func.func @transform_2(%arg0: i32) -> (i32, i32) {
    %c0_i32 = arith.constant 0 : i32
    %c0_i32_0 = arith.constant 0 : i32
    %c0_i32_1 = arith.constant 0 : i32
    return %c0_i32, %c0_i32_0 : i32, i32
  }
  func.func @transform_3(%arg0: i32) -> (i32, i32) {
    %c0_i32 = arith.constant 0 : i32
    %c0_i32_0 = arith.constant 0 : i32
    %c0_i32_1 = arith.constant 0 : i32
    return %c0_i32, %c0_i32_0 : i32, i32
  }
  func.func @transform_4(%arg0: i32) -> (i32, i32) {
    %c0_i32 = arith.constant 0 : i32
    %c0_i32_0 = arith.constant 0 : i32
    %c0_i32_1 = arith.constant 0 : i32
    return %c0_i32, %c0_i32_0 : i32, i32
  }
  func.func @transform_5(%arg0: i32) -> (i32, i32) {
    %c0_i32 = arith.constant 0 : i32
    %c0_i32_0 = arith.constant 0 : i32
    %c0_i32_1 = arith.constant 0 : i32
    return %c0_i32, %c0_i32_0 : i32, i32
  }
  func.func @transform_6(%arg0: i32) -> (i32, i32) {
    %c0_i32 = arith.constant 0 : i32
    %c0_i32_0 = arith.constant 0 : i32
    return %arg0, %c0_i32 : i32, i32
  }
}

module attributes {stable_mosaic.version = 11 : i64} {
  func.func @_ffn_ln_kernel(%arg0: i32, %arg1: memref<80x32xbf16, #tpu.memory_space<vmem>>, %arg2: memref<32x64xbf16, #tpu.memory_space<vmem>>, %arg3: memref<1x64xf32, #tpu.memory_space<vmem>>, %arg4: memref<64x32xbf16, #tpu.memory_space<vmem>>, %arg5: memref<1x32xf32, #tpu.memory_space<vmem>>, %arg6: memref<1x32xf32, #tpu.memory_space<vmem>>, %arg7: memref<1x32xf32, #tpu.memory_space<vmem>>, %arg8: memref<80x32xbf16, #tpu.memory_space<vmem>>) attributes {dimension_semantics = [#tpu.dimension_semantics<parallel>], iteration_bounds = array<i64: 2>, scalar_prefetch = 0 : i64, scratch_operands = 0 : i64, tpu.core_type = #tpu.core_type<tc>, window_params = [{transform_indices = @transform_0, window_bounds = array<i64: 80, 32>}, {pipeline_mode = #tpu.pipeline_mode<synchronous>, transform_indices = @transform_1, window_bounds = array<i64: 32, 64>}, {pipeline_mode = #tpu.pipeline_mode<synchronous>, transform_indices = @transform_2, window_bounds = array<i64: 1, 64>}, {pipeline_mode = #tpu.pipeline_mode<synchronous>, transform_indices = @transform_3, window_bounds = array<i64: 64, 32>}, {pipeline_mode = #tpu.pipeline_mode<synchronous>, transform_indices = @transform_4, window_bounds = array<i64: 1, 32>}, {pipeline_mode = #tpu.pipeline_mode<synchronous>, transform_indices = @transform_5, window_bounds = array<i64: 1, 32>}, {pipeline_mode = #tpu.pipeline_mode<synchronous>, transform_indices = @transform_6, window_bounds = array<i64: 1, 32>}, {transform_indices = @transform_7, window_bounds = array<i64: 80, 32>}]} {
    %c0 = arith.constant 0 : index
    %c0_0 = arith.constant 0 : index
    %0 = vector.load %arg1[%c0, %c0_0] : memref<80x32xbf16, #tpu.memory_space<vmem>>, vector<80x32xbf16>
    %c0_1 = arith.constant 0 : index
    %c0_2 = arith.constant 0 : index
    %1 = vector.load %arg2[%c0_1, %c0_2] : memref<32x64xbf16, #tpu.memory_space<vmem>>, vector<32x64xbf16>
    %cst = arith.constant dense<0.000000e+00> : vector<80x64xf32>
    %2 = tpu.matmul %0, %1, %cst {dimension_numbers = #tpu.dot_dimension_numbers<[1], [0], [0], [1], [0, 0, 1, 1], [], []>} : vector<80x32xbf16>, vector<32x64xbf16>, vector<80x64xf32> -> vector<80x64xf32>
    %c0_3 = arith.constant 0 : index
    %c0_4 = arith.constant 0 : index
    %3 = vector.load %arg3[%c0_3, %c0_4] : memref<1x64xf32, #tpu.memory_space<vmem>>, vector<1x64xf32>
    %4 = vector.broadcast %3 : vector<1x64xf32> to vector<80x64xf32>
    %5 = arith.addf %2, %4 : vector<80x64xf32>
    %cst_5 = arith.constant 0.000000e+00 : f32
    %6 = vector.broadcast %cst_5 : f32 to vector<80x64xf32>
    %7 = arith.maximumf %5, %6 : vector<80x64xf32>
    %8 = arith.truncf %7 : vector<80x64xf32> to vector<80x64xbf16>
    %c0_6 = arith.constant 0 : index
    %c0_7 = arith.constant 0 : index
    %9 = vector.load %arg4[%c0_6, %c0_7] : memref<64x32xbf16, #tpu.memory_space<vmem>>, vector<64x32xbf16>
    %cst_8 = arith.constant dense<0.000000e+00> : vector<80x32xf32>
    %10 = tpu.matmul %8, %9, %cst_8 {dimension_numbers = #tpu.dot_dimension_numbers<[1], [0], [0], [1], [0, 0, 1, 1], [], []>} : vector<80x64xbf16>, vector<64x32xbf16>, vector<80x32xf32> -> vector<80x32xf32>
    %c0_9 = arith.constant 0 : index
    %c0_10 = arith.constant 0 : index
    %11 = vector.load %arg5[%c0_9, %c0_10] : memref<1x32xf32, #tpu.memory_space<vmem>>, vector<1x32xf32>
    %12 = vector.broadcast %11 : vector<1x32xf32> to vector<80x32xf32>
    %13 = arith.addf %10, %12 : vector<80x32xf32>
    %14 = arith.extf %0 : vector<80x32xbf16> to vector<80x32xf32>
    %15 = arith.addf %14, %13 : vector<80x32xf32>
    %cst_11 = arith.constant dense<0.000000e+00> : vector<80xf32>
    %16 = vector.multi_reduction <add>, %15, %cst_11 [1] : vector<80x32xf32> to vector<80xf32>
    %17 = vector.shape_cast %16 : vector<80xf32> to vector<80x1xf32>
    %cst_12 = arith.constant 3.200000e+01 : f32
    %18 = vector.broadcast %cst_12 : f32 to vector<80x1xf32>
    %19 = arith.divf %17, %18 : vector<80x1xf32>
    %20 = vector.broadcast %19 : vector<80x1xf32> to vector<80x32xf32>
    %21 = arith.subf %15, %20 : vector<80x32xf32>
    %22 = arith.mulf %21, %21 : vector<80x32xf32>
    %cst_13 = arith.constant dense<0.000000e+00> : vector<80xf32>
    %23 = vector.multi_reduction <add>, %22, %cst_13 [1] : vector<80x32xf32> to vector<80xf32>
    %24 = vector.shape_cast %23 : vector<80xf32> to vector<80x1xf32>
    %cst_14 = arith.constant 3.200000e+01 : f32
    %25 = vector.broadcast %cst_14 : f32 to vector<80x1xf32>
    %26 = arith.divf %24, %25 : vector<80x1xf32>
    %27 = vector.broadcast %19 : vector<80x1xf32> to vector<80x32xf32>
    %28 = arith.subf %15, %27 : vector<80x32xf32>
    %cst_15 = arith.constant 9.99999974E-6 : f32
    %29 = vector.broadcast %cst_15 : f32 to vector<80x1xf32>
    %30 = arith.addf %26, %29 : vector<80x1xf32>
    %31 = math.rsqrt %30 : vector<80x1xf32>
    %32 = vector.broadcast %31 : vector<80x1xf32> to vector<80x32xf32>
    %33 = arith.mulf %28, %32 : vector<80x32xf32>
    %c0_16 = arith.constant 0 : index
    %c0_17 = arith.constant 0 : index
    %34 = vector.load %arg6[%c0_16, %c0_17] : memref<1x32xf32, #tpu.memory_space<vmem>>, vector<1x32xf32>
    %35 = vector.broadcast %34 : vector<1x32xf32> to vector<80x32xf32>
    %36 = arith.mulf %33, %35 : vector<80x32xf32>
    %c0_18 = arith.constant 0 : index
    %c0_19 = arith.constant 0 : index
    %37 = vector.load %arg7[%c0_18, %c0_19] : memref<1x32xf32, #tpu.memory_space<vmem>>, vector<1x32xf32>
    %38 = vector.broadcast %37 : vector<1x32xf32> to vector<80x32xf32>
    %39 = arith.addf %36, %38 : vector<80x32xf32>
    %40 = arith.truncf %39 : vector<80x32xf32> to vector<80x32xbf16>
    %c0_20 = arith.constant 0 : index
    %c0_21 = arith.constant 0 : index
    %41 = vector.load %arg8[%c0_20, %c0_21] : memref<80x32xbf16, #tpu.memory_space<vmem>>, vector<80x32xbf16>
    tpu.vector_store %arg8[%c0_20, %c0_21], %40 {strides = array<i32>} : memref<80x32xbf16, #tpu.memory_space<vmem>>, vector<80x32xbf16>,
    return
  }
  func.func @transform_0(%arg0: i32) -> (i32, i32) {
    %c0_i32 = arith.constant 0 : i32
    %c0_i32_0 = arith.constant 0 : i32
    return %arg0, %c0_i32 : i32, i32
  }
  func.func @transform_1(%arg0: i32) -> (i32, i32) {
    %c0_i32 = arith.constant 0 : i32
    %c0_i32_0 = arith.constant 0 : i32
    %c0_i32_1 = arith.constant 0 : i32
    return %c0_i32, %c0_i32_0 : i32, i32
  }
  func.func @transform_2(%arg0: i32) -> (i32, i32) {
    %c0_i32 = arith.constant 0 : i32
    %c0_i32_0 = arith.constant 0 : i32
    %c0_i32_1 = arith.constant 0 : i32
    return %c0_i32, %c0_i32_0 : i32, i32
  }
  func.func @transform_3(%arg0: i32) -> (i32, i32) {
    %c0_i32 = arith.constant 0 : i32
    %c0_i32_0 = arith.constant 0 : i32
    %c0_i32_1 = arith.constant 0 : i32
    return %c0_i32, %c0_i32_0 : i32, i32
  }
  func.func @transform_4(%arg0: i32) -> (i32, i32) {
    %c0_i32 = arith.constant 0 : i32
    %c0_i32_0 = arith.constant 0 : i32
    %c0_i32_1 = arith.constant 0 : i32
    return %c0_i32, %c0_i32_0 : i32, i32
  }
  func.func @transform_5(%arg0: i32) -> (i32, i32) {
    %c0_i32 = arith.constant 0 : i32
    %c0_i32_0 = arith.constant 0 : i32
    %c0_i32_1 = arith.constant 0 : i32
    return %c0_i32, %c0_i32_0 : i32, i32
  }
  func.func @transform_6(%arg0: i32) -> (i32, i32) {
    %c0_i32 = arith.constant 0 : i32
    %c0_i32_0 = arith.constant 0 : i32
    %c0_i32_1 = arith.constant 0 : i32
    return %c0_i32, %c0_i32_0 : i32, i32
  }
  func.func @transform_7(%arg0: i32) -> (i32, i32) {
    %c0_i32 = arith.constant 0 : i32
    %c0_i32_0 = arith.constant 0 : i32
    return %arg0, %c0_i32 : i32, i32
  }
}

module attributes {stable_mosaic.version = 11 : i64} {
  func.func @_qkv_proj_kernel(%arg0: i32, %arg1: memref<8x32xbf16, #tpu.memory_space<vmem>>, %arg2: memref<8x32xbf16, #tpu.memory_space<vmem>>, %arg3: memref<32x64xbf16, #tpu.memory_space<vmem>>, %arg4: memref<1x64xf32, #tpu.memory_space<vmem>>, %arg5: memref<32x32xbf16, #tpu.memory_space<vmem>>, %arg6: memref<1x32xf32, #tpu.memory_space<vmem>>, %arg7: memref<8x64xbf16, #tpu.memory_space<vmem>>, %arg8: memref<8x32xbf16, #tpu.memory_space<vmem>>) attributes {dimension_semantics = [#tpu.dimension_semantics<parallel>], iteration_bounds = array<i64: 2>, scalar_prefetch = 0 : i64, scratch_operands = 0 : i64, tpu.core_type = #tpu.core_type<tc>, window_params = [{transform_indices = @transform_0, window_bounds = array<i64: 8, 32>}, {transform_indices = @transform_1, window_bounds = array<i64: 8, 32>}, {pipeline_mode = #tpu.pipeline_mode<synchronous>, transform_indices = @transform_2, window_bounds = array<i64: 32, 64>}, {pipeline_mode = #tpu.pipeline_mode<synchronous>, transform_indices = @transform_3, window_bounds = array<i64: 1, 64>}, {pipeline_mode = #tpu.pipeline_mode<synchronous>, transform_indices = @transform_4, window_bounds = array<i64: 32, 32>}, {pipeline_mode = #tpu.pipeline_mode<synchronous>, transform_indices = @transform_5, window_bounds = array<i64: 1, 32>}, {transform_indices = @transform_6, window_bounds = array<i64: 8, 64>}, {transform_indices = @transform_7, window_bounds = array<i64: 8, 32>}]} {
    %c0 = arith.constant 0 : index
    %c0_0 = arith.constant 0 : index
    %0 = vector.load %arg1[%c0, %c0_0] : memref<8x32xbf16, #tpu.memory_space<vmem>>, vector<8x32xbf16>
    %c0_1 = arith.constant 0 : index
    %c0_2 = arith.constant 0 : index
    %1 = vector.load %arg2[%c0_1, %c0_2] : memref<8x32xbf16, #tpu.memory_space<vmem>>, vector<8x32xbf16>
    %2 = arith.addf %0, %1 : vector<8x32xbf16>
    %c0_3 = arith.constant 0 : index
    %c0_4 = arith.constant 0 : index
    %3 = vector.load %arg3[%c0_3, %c0_4] : memref<32x64xbf16, #tpu.memory_space<vmem>>, vector<32x64xbf16>
    %cst = arith.constant dense<0.000000e+00> : vector<8x64xf32>
    %4 = tpu.matmul %2, %3, %cst {dimension_numbers = #tpu.dot_dimension_numbers<[1], [0], [0], [1], [0, 0, 1, 1], [], []>} : vector<8x32xbf16>, vector<32x64xbf16>, vector<8x64xf32> -> vector<8x64xf32>
    %c0_5 = arith.constant 0 : index
    %c0_6 = arith.constant 0 : index
    %5 = vector.load %arg4[%c0_5, %c0_6] : memref<1x64xf32, #tpu.memory_space<vmem>>, vector<1x64xf32>
    %6 = vector.broadcast %5 : vector<1x64xf32> to vector<8x64xf32>
    %7 = arith.addf %4, %6 : vector<8x64xf32>
    %8 = arith.truncf %7 : vector<8x64xf32> to vector<8x64xbf16>
    %c0_7 = arith.constant 0 : index
    %c0_8 = arith.constant 0 : index
    %9 = vector.load %arg7[%c0_7, %c0_8] : memref<8x64xbf16, #tpu.memory_space<vmem>>, vector<8x64xbf16>
    tpu.vector_store %arg7[%c0_7, %c0_8], %8 {strides = array<i32>} : memref<8x64xbf16, #tpu.memory_space<vmem>>, vector<8x64xbf16>,
    %c0_9 = arith.constant 0 : index
    %c0_10 = arith.constant 0 : index
    %10 = vector.load %arg1[%c0_9, %c0_10] : memref<8x32xbf16, #tpu.memory_space<vmem>>, vector<8x32xbf16>
    %c0_11 = arith.constant 0 : index
    %c0_12 = arith.constant 0 : index
    %11 = vector.load %arg5[%c0_11, %c0_12] : memref<32x32xbf16, #tpu.memory_space<vmem>>, vector<32x32xbf16>
    %cst_13 = arith.constant dense<0.000000e+00> : vector<8x32xf32>
    %12 = tpu.matmul %10, %11, %cst_13 {dimension_numbers = #tpu.dot_dimension_numbers<[1], [0], [0], [1], [0, 0, 1, 1], [], []>} : vector<8x32xbf16>, vector<32x32xbf16>, vector<8x32xf32> -> vector<8x32xf32>
    %c0_14 = arith.constant 0 : index
    %c0_15 = arith.constant 0 : index
    %13 = vector.load %arg6[%c0_14, %c0_15] : memref<1x32xf32, #tpu.memory_space<vmem>>, vector<1x32xf32>
    %14 = vector.broadcast %13 : vector<1x32xf32> to vector<8x32xf32>
    %15 = arith.addf %12, %14 : vector<8x32xf32>
    %16 = arith.truncf %15 : vector<8x32xf32> to vector<8x32xbf16>
    %c0_16 = arith.constant 0 : index
    %c0_17 = arith.constant 0 : index
    %17 = vector.load %arg8[%c0_16, %c0_17] : memref<8x32xbf16, #tpu.memory_space<vmem>>, vector<8x32xbf16>
    tpu.vector_store %arg8[%c0_16, %c0_17], %16 {strides = array<i32>} : memref<8x32xbf16, #tpu.memory_space<vmem>>, vector<8x32xbf16>,
    return
  }
  func.func @transform_0(%arg0: i32) -> (i32, i32) {
    %c0_i32 = arith.constant 0 : i32
    %c0_i32_0 = arith.constant 0 : i32
    return %arg0, %c0_i32 : i32, i32
  }
  func.func @transform_1(%arg0: i32) -> (i32, i32) {
    %c0_i32 = arith.constant 0 : i32
    %c0_i32_0 = arith.constant 0 : i32
    return %arg0, %c0_i32 : i32, i32
  }
  func.func @transform_2(%arg0: i32) -> (i32, i32) {
    %c0_i32 = arith.constant 0 : i32
    %c0_i32_0 = arith.constant 0 : i32
    %c0_i32_1 = arith.constant 0 : i32
    return %c0_i32, %c0_i32_0 : i32, i32
  }
  func.func @transform_3(%arg0: i32) -> (i32, i32) {
    %c0_i32 = arith.constant 0 : i32
    %c0_i32_0 = arith.constant 0 : i32
    %c0_i32_1 = arith.constant 0 : i32
    return %c0_i32, %c0_i32_0 : i32, i32
  }
  func.func @transform_4(%arg0: i32) -> (i32, i32) {
    %c0_i32 = arith.constant 0 : i32
    %c0_i32_0 = arith.constant 0 : i32
    %c0_i32_1 = arith.constant 0 : i32
    return %c0_i32, %c0_i32_0 : i32, i32
  }
  func.func @transform_5(%arg0: i32) -> (i32, i32) {
    %c0_i32 = arith.constant 0 : i32
    %c0_i32_0 = arith.constant 0 : i32
    %c0_i32_1 = arith.constant 0 : i32
    return %c0_i32, %c0_i32_0 : i32, i32
  }
  func.func @transform_6(%arg0: i32) -> (i32, i32) {
    %c0_i32 = arith.constant 0 : i32
    %c0_i32_0 = arith.constant 0 : i32
    return %arg0, %c0_i32 : i32, i32
  }
  func.func @transform_7(%arg0: i32) -> (i32, i32) {
    %c0_i32 = arith.constant 0 : i32
    %c0_i32_0 = arith.constant 0 : i32
    return %arg0, %c0_i32 : i32, i32
  }
}

module attributes {stable_mosaic.version = 11 : i64} {
  func.func @_mha_core_kernel(%arg0: i32, %arg1: memref<4x8x8xbf16, #tpu.memory_space<vmem>>, %arg2: memref<4x8x8xbf16, #tpu.memory_space<vmem>>, %arg3: memref<4x8x8xbf16, #tpu.memory_space<vmem>>, %arg4: memref<4x8x8xbf16, #tpu.memory_space<vmem>>) attributes {dimension_semantics = [#tpu.dimension_semantics<parallel>], iteration_bounds = array<i64: 2>, scalar_prefetch = 0 : i64, scratch_operands = 0 : i64, tpu.core_type = #tpu.core_type<tc>, window_params = [{transform_indices = @transform_0, window_bounds = array<i64: 4, 8, 8>}, {transform_indices = @transform_1, window_bounds = array<i64: 4, 8, 8>}, {transform_indices = @transform_2, window_bounds = array<i64: 4, 8, 8>}, {transform_indices = @transform_3, window_bounds = array<i64: 4, 8, 8>}]} {
    %c0 = arith.constant 0 : index
    %c0_0 = arith.constant 0 : index
    %c0_1 = arith.constant 0 : index
    %0 = vector.load %arg1[%c0, %c0_0, %c0_1] : memref<4x8x8xbf16, #tpu.memory_space<vmem>>, vector<4x8x8xbf16>
    %c0_2 = arith.constant 0 : index
    %c0_3 = arith.constant 0 : index
    %c0_4 = arith.constant 0 : index
    %1 = vector.load %arg2[%c0_2, %c0_3, %c0_4] : memref<4x8x8xbf16, #tpu.memory_space<vmem>>, vector<4x8x8xbf16>
    "tpu.trace_start"() <{level = 10 : i32, message = "hqd,hkd->hqk"}> : () -> ()
    %cst = arith.constant dense<0.000000e+00> : vector<4x8x8xf32>
    %2 = tpu.matmul %0, %1, %cst {dimension_numbers = #tpu.dot_dimension_numbers<[2], [2], [1], [1], [0, 0, 0, 1, 1, 1], [0], [0]>} : vector<4x8x8xbf16>, vector<4x8x8xbf16>, vector<4x8x8xf32> -> vector<4x8x8xf32>
    "tpu.trace_stop"() : () -> ()
    %cst_5 = arith.constant 0.353553385 : f32
    %3 = vector.broadcast %cst_5 : f32 to vector<4x8x8xf32>
    %4 = arith.mulf %2, %3 : vector<4x8x8xf32>
    %cst_6 = arith.constant dense<0xFF800000> : vector<4x8xf32>
    %5 = vector.multi_reduction <maximumf>, %4, %cst_6 [2] : vector<4x8x8xf32> to vector<4x8xf32>
    %6 = vector.shape_cast %5 : vector<4x8xf32> to vector<4x8x1xf32>
    %7 = vector.broadcast %6 : vector<4x8x1xf32> to vector<4x8x8xf32>
    %8 = arith.subf %4, %7 : vector<4x8x8xf32>
    %9 = math.exp %8 : vector<4x8x8xf32>
    %cst_7 = arith.constant dense<0.000000e+00> : vector<4x8xf32>
    %10 = vector.multi_reduction <add>, %9, %cst_7 [2] : vector<4x8x8xf32> to vector<4x8xf32>
    %11 = vector.shape_cast %10 : vector<4x8xf32> to vector<4x8x1xf32>
    %12 = tpu.reciprocal %11 {approx = true} : vector<4x8x1xf32> -> vector<4x8x1xf32>
    %13 = vector.broadcast %12 : vector<4x8x1xf32> to vector<4x8x8xf32>
    %14 = arith.mulf %9, %13 : vector<4x8x8xf32>
    %15 = arith.truncf %14 : vector<4x8x8xf32> to vector<4x8x8xbf16>
    %c0_8 = arith.constant 0 : index
    %c0_9 = arith.constant 0 : index
    %c0_10 = arith.constant 0 : index
    %16 = vector.load %arg3[%c0_8, %c0_9, %c0_10] : memref<4x8x8xbf16, #tpu.memory_space<vmem>>, vector<4x8x8xbf16>
    "tpu.trace_start"() <{level = 10 : i32, message = "hqk,hkd->hqd"}> : () -> ()
    %cst_11 = arith.constant dense<0.000000e+00> : vector<4x8x8xf32>
    %17 = tpu.matmul %15, %16, %cst_11 {dimension_numbers = #tpu.dot_dimension_numbers<[2], [1], [1], [2], [0, 0, 0, 1, 1, 2], [0], [0]>} : vector<4x8x8xbf16>, vector<4x8x8xbf16>, vector<4x8x8xf32> -> vector<4x8x8xf32>
    "tpu.trace_stop"() : () -> ()
    %18 = arith.truncf %17 : vector<4x8x8xf32> to vector<4x8x8xbf16>
    %c0_12 = arith.constant 0 : index
    %c0_13 = arith.constant 0 : index
    %c0_14 = arith.constant 0 : index
    %19 = vector.load %arg4[%c0_12, %c0_13, %c0_14] : memref<4x8x8xbf16, #tpu.memory_space<vmem>>, vector<4x8x8xbf16>
    tpu.vector_store %arg4[%c0_12, %c0_13, %c0_14], %18 {strides = array<i32>} : memref<4x8x8xbf16, #tpu.memory_space<vmem>>, vector<4x8x8xbf16>,
    return
  }
  func.func @transform_0(%arg0: i32) -> (i32, i32, i32) {
    %c0_i32 = arith.constant 0 : i32
    %c0_i32_0 = arith.constant 0 : i32
    %c0_i32_1 = arith.constant 0 : i32
    return %arg0, %c0_i32, %c0_i32_0 : i32, i32, i32
  }
  func.func @transform_1(%arg0: i32) -> (i32, i32, i32) {
    %c0_i32 = arith.constant 0 : i32
    %c0_i32_0 = arith.constant 0 : i32
    %c0_i32_1 = arith.constant 0 : i32
    return %arg0, %c0_i32, %c0_i32_0 : i32, i32, i32
  }
  func.func @transform_2(%arg0: i32) -> (i32, i32, i32) {
    %c0_i32 = arith.constant 0 : i32
    %c0_i32_0 = arith.constant 0 : i32
    %c0_i32_1 = arith.constant 0 : i32
    return %arg0, %c0_i32, %c0_i32_0 : i32, i32, i32
  }
  func.func @transform_3(%arg0: i32) -> (i32, i32, i32) {
    %c0_i32 = arith.constant 0 : i32
    %c0_i32_0 = arith.constant 0 : i32
    %c0_i32_1 = arith.constant 0 : i32
    return %arg0, %c0_i32, %c0_i32_0 : i32, i32, i32
  }
}

module attributes {stable_mosaic.version = 11 : i64} {
  func.func @_linear_add_ln_kernel(%arg0: i32, %arg1: memref<8x32xbf16, #tpu.memory_space<vmem>>, %arg2: memref<8x32xbf16, #tpu.memory_space<vmem>>, %arg3: memref<32x32xbf16, #tpu.memory_space<vmem>>, %arg4: memref<1x32xf32, #tpu.memory_space<vmem>>, %arg5: memref<1x32xf32, #tpu.memory_space<vmem>>, %arg6: memref<1x32xf32, #tpu.memory_space<vmem>>, %arg7: memref<8x32xbf16, #tpu.memory_space<vmem>>) attributes {dimension_semantics = [#tpu.dimension_semantics<parallel>], iteration_bounds = array<i64: 2>, scalar_prefetch = 0 : i64, scratch_operands = 0 : i64, tpu.core_type = #tpu.core_type<tc>, window_params = [{transform_indices = @transform_0, window_bounds = array<i64: 8, 32>}, {transform_indices = @transform_1, window_bounds = array<i64: 8, 32>}, {pipeline_mode = #tpu.pipeline_mode<synchronous>, transform_indices = @transform_2, window_bounds = array<i64: 32, 32>}, {pipeline_mode = #tpu.pipeline_mode<synchronous>, transform_indices = @transform_3, window_bounds = array<i64: 1, 32>}, {pipeline_mode = #tpu.pipeline_mode<synchronous>, transform_indices = @transform_4, window_bounds = array<i64: 1, 32>}, {pipeline_mode = #tpu.pipeline_mode<synchronous>, transform_indices = @transform_5, window_bounds = array<i64: 1, 32>}, {transform_indices = @transform_6, window_bounds = array<i64: 8, 32>}]} {
    %c0 = arith.constant 0 : index
    %c0_0 = arith.constant 0 : index
    %0 = vector.load %arg1[%c0, %c0_0] : memref<8x32xbf16, #tpu.memory_space<vmem>>, vector<8x32xbf16>
    %c0_1 = arith.constant 0 : index
    %c0_2 = arith.constant 0 : index
    %1 = vector.load %arg3[%c0_1, %c0_2] : memref<32x32xbf16, #tpu.memory_space<vmem>>, vector<32x32xbf16>
    %cst = arith.constant dense<0.000000e+00> : vector<8x32xf32>
    %2 = tpu.matmul %0, %1, %cst {dimension_numbers = #tpu.dot_dimension_numbers<[1], [0], [0], [1], [0, 0, 1, 1], [], []>} : vector<8x32xbf16>, vector<32x32xbf16>, vector<8x32xf32> -> vector<8x32xf32>
    %c0_3 = arith.constant 0 : index
    %c0_4 = arith.constant 0 : index
    %3 = vector.load %arg4[%c0_3, %c0_4] : memref<1x32xf32, #tpu.memory_space<vmem>>, vector<1x32xf32>
    %4 = vector.broadcast %3 : vector<1x32xf32> to vector<8x32xf32>
    %5 = arith.addf %2, %4 : vector<8x32xf32>
    %c0_5 = arith.constant 0 : index
    %c0_6 = arith.constant 0 : index
    %6 = vector.load %arg2[%c0_5, %c0_6] : memref<8x32xbf16, #tpu.memory_space<vmem>>, vector<8x32xbf16>
    %7 = arith.extf %6 : vector<8x32xbf16> to vector<8x32xf32>
    %8 = arith.addf %7, %5 : vector<8x32xf32>
    %cst_7 = arith.constant dense<0.000000e+00> : vector<8xf32>
    %9 = vector.multi_reduction <add>, %8, %cst_7 [1] : vector<8x32xf32> to vector<8xf32>
    %10 = vector.shape_cast %9 : vector<8xf32> to vector<8x1xf32>
    %cst_8 = arith.constant 3.200000e+01 : f32
    %11 = vector.broadcast %cst_8 : f32 to vector<8x1xf32>
    %12 = arith.divf %10, %11 : vector<8x1xf32>
    %13 = vector.broadcast %12 : vector<8x1xf32> to vector<8x32xf32>
    %14 = arith.subf %8, %13 : vector<8x32xf32>
    %15 = arith.mulf %14, %14 : vector<8x32xf32>
    %cst_9 = arith.constant dense<0.000000e+00> : vector<8xf32>
    %16 = vector.multi_reduction <add>, %15, %cst_9 [1] : vector<8x32xf32> to vector<8xf32>
    %17 = vector.shape_cast %16 : vector<8xf32> to vector<8x1xf32>
    %cst_10 = arith.constant 3.200000e+01 : f32
    %18 = vector.broadcast %cst_10 : f32 to vector<8x1xf32>
    %19 = arith.divf %17, %18 : vector<8x1xf32>
    %20 = vector.broadcast %12 : vector<8x1xf32> to vector<8x32xf32>
    %21 = arith.subf %8, %20 : vector<8x32xf32>
    %cst_11 = arith.constant 9.99999974E-6 : f32
    %22 = vector.broadcast %cst_11 : f32 to vector<8x1xf32>
    %23 = arith.addf %19, %22 : vector<8x1xf32>
    %24 = math.rsqrt %23 : vector<8x1xf32>
    %25 = vector.broadcast %24 : vector<8x1xf32> to vector<8x32xf32>
    %26 = arith.mulf %21, %25 : vector<8x32xf32>
    %c0_12 = arith.constant 0 : index
    %c0_13 = arith.constant 0 : index
    %27 = vector.load %arg5[%c0_12, %c0_13] : memref<1x32xf32, #tpu.memory_space<vmem>>, vector<1x32xf32>
    %28 = vector.broadcast %27 : vector<1x32xf32> to vector<8x32xf32>
    %29 = arith.mulf %26, %28 : vector<8x32xf32>
    %c0_14 = arith.constant 0 : index
    %c0_15 = arith.constant 0 : index
    %30 = vector.load %arg6[%c0_14, %c0_15] : memref<1x32xf32, #tpu.memory_space<vmem>>, vector<1x32xf32>
    %31 = vector.broadcast %30 : vector<1x32xf32> to vector<8x32xf32>
    %32 = arith.addf %29, %31 : vector<8x32xf32>
    %33 = arith.truncf %32 : vector<8x32xf32> to vector<8x32xbf16>
    %c0_16 = arith.constant 0 : index
    %c0_17 = arith.constant 0 : index
    %34 = vector.load %arg7[%c0_16, %c0_17] : memref<8x32xbf16, #tpu.memory_space<vmem>>, vector<8x32xbf16>
    tpu.vector_store %arg7[%c0_16, %c0_17], %33 {strides = array<i32>} : memref<8x32xbf16, #tpu.memory_space<vmem>>, vector<8x32xbf16>,
    return
  }
  func.func @transform_0(%arg0: i32) -> (i32, i32) {
    %c0_i32 = arith.constant 0 : i32
    %c0_i32_0 = arith.constant 0 : i32
    return %arg0, %c0_i32 : i32, i32
  }
  func.func @transform_1(%arg0: i32) -> (i32, i32) {
    %c0_i32 = arith.constant 0 : i32
    %c0_i32_0 = arith.constant 0 : i32
    return %arg0, %c0_i32 : i32, i32
  }
  func.func @transform_2(%arg0: i32) -> (i32, i32) {
    %c0_i32 = arith.constant 0 : i32
    %c0_i32_0 = arith.constant 0 : i32
    %c0_i32_1 = arith.constant 0 : i32
    return %c0_i32, %c0_i32_0 : i32, i32
  }
  func.func @transform_3(%arg0: i32) -> (i32, i32) {
    %c0_i32 = arith.constant 0 : i32
    %c0_i32_0 = arith.constant 0 : i32
    %c0_i32_1 = arith.constant 0 : i32
    return %c0_i32, %c0_i32_0 : i32, i32
  }
  func.func @transform_4(%arg0: i32) -> (i32, i32) {
    %c0_i32 = arith.constant 0 : i32
    %c0_i32_0 = arith.constant 0 : i32
    %c0_i32_1 = arith.constant 0 : i32
    return %c0_i32, %c0_i32_0 : i32, i32
  }
  func.func @transform_5(%arg0: i32) -> (i32, i32) {
    %c0_i32 = arith.constant 0 : i32
    %c0_i32_0 = arith.constant 0 : i32
    %c0_i32_1 = arith.constant 0 : i32
    return %c0_i32, %c0_i32_0 : i32, i32
  }
  func.func @transform_6(%arg0: i32) -> (i32, i32) {
    %c0_i32 = arith.constant 0 : i32
    %c0_i32_0 = arith.constant 0 : i32
    return %arg0, %c0_i32 : i32, i32
  }
}

module attributes {stable_mosaic.version = 11 : i64} {
  func.func @_deform_proj_kernel(%arg0: i32, %arg1: memref<8x32xbf16, #tpu.memory_space<vmem>>, %arg2: memref<8x32xbf16, #tpu.memory_space<vmem>>, %arg3: memref<32x48xbf16, #tpu.memory_space<vmem>>, %arg4: memref<1x48xf32, #tpu.memory_space<vmem>>, %arg5: memref<8x32xf32, #tpu.memory_space<vmem>>, %arg6: memref<8x16xf32, #tpu.memory_space<vmem>>) attributes {dimension_semantics = [#tpu.dimension_semantics<parallel>], iteration_bounds = array<i64: 2>, scalar_prefetch = 0 : i64, scratch_operands = 0 : i64, tpu.core_type = #tpu.core_type<tc>, window_params = [{transform_indices = @transform_0, window_bounds = array<i64: 8, 32>}, {transform_indices = @transform_1, window_bounds = array<i64: 8, 32>}, {pipeline_mode = #tpu.pipeline_mode<synchronous>, transform_indices = @transform_2, window_bounds = array<i64: 32, 48>}, {pipeline_mode = #tpu.pipeline_mode<synchronous>, transform_indices = @transform_3, window_bounds = array<i64: 1, 48>}, {transform_indices = @transform_4, window_bounds = array<i64: 8, 32>}, {transform_indices = @transform_5, window_bounds = array<i64: 8, 16>}]} {
    %c0 = arith.constant 0 : index
    %c0_0 = arith.constant 0 : index
    %0 = vector.load %arg1[%c0, %c0_0] : memref<8x32xbf16, #tpu.memory_space<vmem>>, vector<8x32xbf16>
    %c0_1 = arith.constant 0 : index
    %c0_2 = arith.constant 0 : index
    %1 = vector.load %arg2[%c0_1, %c0_2] : memref<8x32xbf16, #tpu.memory_space<vmem>>, vector<8x32xbf16>
    %2 = arith.addf %0, %1 : vector<8x32xbf16>
    %c0_3 = arith.constant 0 : index
    %c0_4 = arith.constant 0 : index
    %3 = vector.load %arg3[%c0_3, %c0_4] : memref<32x48xbf16, #tpu.memory_space<vmem>>, vector<32x48xbf16>
    %cst = arith.constant dense<0.000000e+00> : vector<8x48xf32>
    %4 = tpu.matmul %2, %3, %cst {dimension_numbers = #tpu.dot_dimension_numbers<[1], [0], [0], [1], [0, 0, 1, 1], [], []>} : vector<8x32xbf16>, vector<32x48xbf16>, vector<8x48xf32> -> vector<8x48xf32>
    %c0_5 = arith.constant 0 : index
    %c0_6 = arith.constant 0 : index
    %5 = vector.load %arg4[%c0_5, %c0_6] : memref<1x48xf32, #tpu.memory_space<vmem>>, vector<1x48xf32>
    %6 = vector.broadcast %5 : vector<1x48xf32> to vector<8x48xf32>
    %7 = arith.addf %4, %6 : vector<8x48xf32>
    %8 = vector.extract_strided_slice %7 {offsets = [0, 0], sizes = [8, 32], strides = [1, 1]} : vector<8x48xf32> to vector<8x32xf32>
    %c0_7 = arith.constant 0 : index
    %c0_8 = arith.constant 0 : index
    %9 = vector.load %arg5[%c0_7, %c0_8] : memref<8x32xf32, #tpu.memory_space<vmem>>, vector<8x32xf32>
    tpu.vector_store %arg5[%c0_7, %c0_8], %8 {strides = array<i32>} : memref<8x32xf32, #tpu.memory_space<vmem>>, vector<8x32xf32>,
    %10 = vector.extract_strided_slice %7 {offsets = [0, 32], sizes = [8, 16], strides = [1, 1]} : vector<8x48xf32> to vector<8x16xf32>
    %11 = vector.extract_strided_slice %10 {offsets = [0, 0], sizes = [8, 4], strides = [1, 1]} : vector<8x16xf32> to vector<8x4xf32>
    %cst_9 = arith.constant dense<0xFF800000> : vector<8xf32>
    %12 = vector.multi_reduction <maximumf>, %11, %cst_9 [1] : vector<8x4xf32> to vector<8xf32>
    %13 = vector.shape_cast %12 : vector<8xf32> to vector<8x1xf32>
    %14 = vector.broadcast %13 : vector<8x1xf32> to vector<8x4xf32>
    %15 = arith.subf %11, %14 : vector<8x4xf32>
    %16 = math.exp %15 : vector<8x4xf32>
    %cst_10 = arith.constant dense<0.000000e+00> : vector<8xf32>
    %17 = vector.multi_reduction <add>, %16, %cst_10 [1] : vector<8x4xf32> to vector<8xf32>
    %18 = vector.shape_cast %17 : vector<8xf32> to vector<8x1xf32>
    %19 = tpu.reciprocal %18 {approx = true} : vector<8x1xf32> -> vector<8x1xf32>
    %20 = vector.broadcast %19 : vector<8x1xf32> to vector<8x4xf32>
    %21 = arith.mulf %16, %20 : vector<8x4xf32>
    %22 = vector.extract_strided_slice %10 {offsets = [0, 4], sizes = [8, 4], strides = [1, 1]} : vector<8x16xf32> to vector<8x4xf32>
    %cst_11 = arith.constant dense<0xFF800000> : vector<8xf32>
    %23 = vector.multi_reduction <maximumf>, %22, %cst_11 [1] : vector<8x4xf32> to vector<8xf32>
    %24 = vector.shape_cast %23 : vector<8xf32> to vector<8x1xf32>
    %25 = vector.broadcast %24 : vector<8x1xf32> to vector<8x4xf32>
    %26 = arith.subf %22, %25 : vector<8x4xf32>
    %27 = math.exp %26 : vector<8x4xf32>
    %cst_12 = arith.constant dense<0.000000e+00> : vector<8xf32>
    %28 = vector.multi_reduction <add>, %27, %cst_12 [1] : vector<8x4xf32> to vector<8xf32>
    %29 = vector.shape_cast %28 : vector<8xf32> to vector<8x1xf32>
    %30 = tpu.reciprocal %29 {approx = true} : vector<8x1xf32> -> vector<8x1xf32>
    %31 = vector.broadcast %30 : vector<8x1xf32> to vector<8x4xf32>
    %32 = arith.mulf %27, %31 : vector<8x4xf32>
    %33 = vector.extract_strided_slice %10 {offsets = [0, 8], sizes = [8, 4], strides = [1, 1]} : vector<8x16xf32> to vector<8x4xf32>
    %cst_13 = arith.constant dense<0xFF800000> : vector<8xf32>
    %34 = vector.multi_reduction <maximumf>, %33, %cst_13 [1] : vector<8x4xf32> to vector<8xf32>
    %35 = vector.shape_cast %34 : vector<8xf32> to vector<8x1xf32>
    %36 = vector.broadcast %35 : vector<8x1xf32> to vector<8x4xf32>
    %37 = arith.subf %33, %36 : vector<8x4xf32>
    %38 = math.exp %37 : vector<8x4xf32>
    %cst_14 = arith.constant dense<0.000000e+00> : vector<8xf32>
    %39 = vector.multi_reduction <add>, %38, %cst_14 [1] : vector<8x4xf32> to vector<8xf32>
    %40 = vector.shape_cast %39 : vector<8xf32> to vector<8x1xf32>
    %41 = tpu.reciprocal %40 {approx = true} : vector<8x1xf32> -> vector<8x1xf32>
    %42 = vector.broadcast %41 : vector<8x1xf32> to vector<8x4xf32>
    %43 = arith.mulf %38, %42 : vector<8x4xf32>
    %44 = vector.extract_strided_slice %10 {offsets = [0, 12], sizes = [8, 4], strides = [1, 1]} : vector<8x16xf32> to vector<8x4xf32>
    %cst_15 = arith.constant dense<0xFF800000> : vector<8xf32>
    %45 = vector.multi_reduction <maximumf>, %44, %cst_15 [1] : vector<8x4xf32> to vector<8xf32>
    %46 = vector.shape_cast %45 : vector<8xf32> to vector<8x1xf32>
    %47 = vector.broadcast %46 : vector<8x1xf32> to vector<8x4xf32>
    %48 = arith.subf %44, %47 : vector<8x4xf32>
    %49 = math.exp %48 : vector<8x4xf32>
    %cst_16 = arith.constant dense<0.000000e+00> : vector<8xf32>
    %50 = vector.multi_reduction <add>, %49, %cst_16 [1] : vector<8x4xf32> to vector<8xf32>
    %51 = vector.shape_cast %50 : vector<8xf32> to vector<8x1xf32>
    %52 = tpu.reciprocal %51 {approx = true} : vector<8x1xf32> -> vector<8x1xf32>
    %53 = vector.broadcast %52 : vector<8x1xf32> to vector<8x4xf32>
    %54 = arith.mulf %49, %53 : vector<8x4xf32>
    %55 = tpu.concatenate %21, %32, %43, %54 in 1 : vector<8x4xf32>, vector<8x4xf32>, vector<8x4xf32>, vector<8x4xf32> -> vector<8x16xf32>
    %c0_17 = arith.constant 0 : index
    %c0_18 = arith.constant 0 : index
    %56 = vector.load %arg6[%c0_17, %c0_18] : memref<8x16xf32, #tpu.memory_space<vmem>>, vector<8x16xf32>
    tpu.vector_store %arg6[%c0_17, %c0_18], %55 {strides = array<i32>} : memref<8x16xf32, #tpu.memory_space<vmem>>, vector<8x16xf32>,
    return
  }
  func.func @transform_0(%arg0: i32) -> (i32, i32) {
    %c0_i32 = arith.constant 0 : i32
    %c0_i32_0 = arith.constant 0 : i32
    return %arg0, %c0_i32 : i32, i32
  }
  func.func @transform_1(%arg0: i32) -> (i32, i32) {
    %c0_i32 = arith.constant 0 : i32
    %c0_i32_0 = arith.constant 0 : i32
    return %arg0, %c0_i32 : i32, i32
  }
  func.func @transform_2(%arg0: i32) -> (i32, i32) {
    %c0_i32 = arith.constant 0 : i32
    %c0_i32_0 = arith.constant 0 : i32
    %c0_i32_1 = arith.constant 0 : i32
    return %c0_i32, %c0_i32_0 : i32, i32
  }
  func.func @transform_3(%arg0: i32) -> (i32, i32) {
    %c0_i32 = arith.constant 0 : i32
    %c0_i32_0 = arith.constant 0 : i32
    %c0_i32_1 = arith.constant 0 : i32
    return %c0_i32, %c0_i32_0 : i32, i32
  }
  func.func @transform_4(%arg0: i32) -> (i32, i32) {
    %c0_i32 = arith.constant 0 : i32
    %c0_i32_0 = arith.constant 0 : i32
    return %arg0, %c0_i32 : i32, i32
  }
  func.func @transform_5(%arg0: i32) -> (i32, i32) {
    %c0_i32 = arith.constant 0 : i32
    %c0_i32_0 = arith.constant 0 : i32
    return %arg0, %c0_i32 : i32, i32
  }
}

module attributes {stable_mosaic.version = 11 : i64} {
  func.func @_linear_kernel(%arg0: i32, %arg1: memref<8x32xbf16, #tpu.memory_space<vmem>>, %arg2: memref<32x2xbf16, #tpu.memory_space<vmem>>, %arg3: memref<1x2xf32, #tpu.memory_space<vmem>>, %arg4: memref<8x2xf32, #tpu.memory_space<vmem>>) attributes {dimension_semantics = [#tpu.dimension_semantics<parallel>], iteration_bounds = array<i64: 2>, scalar_prefetch = 0 : i64, scratch_operands = 0 : i64, tpu.core_type = #tpu.core_type<tc>, window_params = [{transform_indices = @transform_0, window_bounds = array<i64: 8, 32>}, {pipeline_mode = #tpu.pipeline_mode<synchronous>, transform_indices = @transform_1, window_bounds = array<i64: 32, 2>}, {pipeline_mode = #tpu.pipeline_mode<synchronous>, transform_indices = @transform_2, window_bounds = array<i64: 1, 2>}, {transform_indices = @transform_3, window_bounds = array<i64: 8, 2>}]} {
    %c0 = arith.constant 0 : index
    %c0_0 = arith.constant 0 : index
    %0 = vector.load %arg1[%c0, %c0_0] : memref<8x32xbf16, #tpu.memory_space<vmem>>, vector<8x32xbf16>
    %c0_1 = arith.constant 0 : index
    %c0_2 = arith.constant 0 : index
    %1 = vector.load %arg2[%c0_1, %c0_2] : memref<32x2xbf16, #tpu.memory_space<vmem>>, vector<32x2xbf16>
    %cst = arith.constant dense<0.000000e+00> : vector<8x2xf32>
    %2 = tpu.matmul %0, %1, %cst {dimension_numbers = #tpu.dot_dimension_numbers<[1], [0], [0], [1], [0, 0, 1, 1], [], []>} : vector<8x32xbf16>, vector<32x2xbf16>, vector<8x2xf32> -> vector<8x2xf32>
    %c0_3 = arith.constant 0 : index
    %c0_4 = arith.constant 0 : index
    %3 = vector.load %arg3[%c0_3, %c0_4] : memref<1x2xf32, #tpu.memory_space<vmem>>, vector<1x2xf32>
    %4 = vector.broadcast %3 : vector<1x2xf32> to vector<8x2xf32>
    %5 = arith.addf %2, %4 : vector<8x2xf32>
    %c0_5 = arith.constant 0 : index
    %c0_6 = arith.constant 0 : index
    %6 = vector.load %arg4[%c0_5, %c0_6] : memref<8x2xf32, #tpu.memory_space<vmem>>, vector<8x2xf32>
    tpu.vector_store %arg4[%c0_5, %c0_6], %5 {strides = array<i32>} : memref<8x2xf32, #tpu.memory_space<vmem>>, vector<8x2xf32>,
    return
  }
  func.func @transform_0(%arg0: i32) -> (i32, i32) {
    %c0_i32 = arith.constant 0 : i32
    %c0_i32_0 = arith.constant 0 : i32
    return %arg0, %c0_i32 : i32, i32
  }
  func.func @transform_1(%arg0: i32) -> (i32, i32) {
    %c0_i32 = arith.constant 0 : i32
    %c0_i32_0 = arith.constant 0 : i32
    %c0_i32_1 = arith.constant 0 : i32
    return %c0_i32, %c0_i32_0 : i32, i32
  }
  func.func @transform_2(%arg0: i32) -> (i32, i32) {
    %c0_i32 = arith.constant 0 : i32
    %c0_i32_0 = arith.constant 0 : i32
    %c0_i32_1 = arith.constant 0 : i32
    return %c0_i32, %c0_i32_0 : i32, i32
  }
  func.func @transform_3(%arg0: i32) -> (i32, i32) {
    %c0_i32 = arith.constant 0 : i32
    %c0_i32_0 = arith.constant 0 : i32
    return %arg0, %c0_i32 : i32, i32
  }
}

module attributes {stable_mosaic.version = 11 : i64} {
  func.func @_ffn_ln_kernel(%arg0: i32, %arg1: memref<8x32xbf16, #tpu.memory_space<vmem>>, %arg2: memref<32x64xbf16, #tpu.memory_space<vmem>>, %arg3: memref<1x64xf32, #tpu.memory_space<vmem>>, %arg4: memref<64x32xbf16, #tpu.memory_space<vmem>>, %arg5: memref<1x32xf32, #tpu.memory_space<vmem>>, %arg6: memref<1x32xf32, #tpu.memory_space<vmem>>, %arg7: memref<1x32xf32, #tpu.memory_space<vmem>>, %arg8: memref<8x32xbf16, #tpu.memory_space<vmem>>) attributes {dimension_semantics = [#tpu.dimension_semantics<parallel>], iteration_bounds = array<i64: 2>, scalar_prefetch = 0 : i64, scratch_operands = 0 : i64, tpu.core_type = #tpu.core_type<tc>, window_params = [{transform_indices = @transform_0, window_bounds = array<i64: 8, 32>}, {pipeline_mode = #tpu.pipeline_mode<synchronous>, transform_indices = @transform_1, window_bounds = array<i64: 32, 64>}, {pipeline_mode = #tpu.pipeline_mode<synchronous>, transform_indices = @transform_2, window_bounds = array<i64: 1, 64>}, {pipeline_mode = #tpu.pipeline_mode<synchronous>, transform_indices = @transform_3, window_bounds = array<i64: 64, 32>}, {pipeline_mode = #tpu.pipeline_mode<synchronous>, transform_indices = @transform_4, window_bounds = array<i64: 1, 32>}, {pipeline_mode = #tpu.pipeline_mode<synchronous>, transform_indices = @transform_5, window_bounds = array<i64: 1, 32>}, {pipeline_mode = #tpu.pipeline_mode<synchronous>, transform_indices = @transform_6, window_bounds = array<i64: 1, 32>}, {transform_indices = @transform_7, window_bounds = array<i64: 8, 32>}]} {
    %c0 = arith.constant 0 : index
    %c0_0 = arith.constant 0 : index
    %0 = vector.load %arg1[%c0, %c0_0] : memref<8x32xbf16, #tpu.memory_space<vmem>>, vector<8x32xbf16>
    %c0_1 = arith.constant 0 : index
    %c0_2 = arith.constant 0 : index
    %1 = vector.load %arg2[%c0_1, %c0_2] : memref<32x64xbf16, #tpu.memory_space<vmem>>, vector<32x64xbf16>
    %cst = arith.constant dense<0.000000e+00> : vector<8x64xf32>
    %2 = tpu.matmul %0, %1, %cst {dimension_numbers = #tpu.dot_dimension_numbers<[1], [0], [0], [1], [0, 0, 1, 1], [], []>} : vector<8x32xbf16>, vector<32x64xbf16>, vector<8x64xf32> -> vector<8x64xf32>
    %c0_3 = arith.constant 0 : index
    %c0_4 = arith.constant 0 : index
    %3 = vector.load %arg3[%c0_3, %c0_4] : memref<1x64xf32, #tpu.memory_space<vmem>>, vector<1x64xf32>
    %4 = vector.broadcast %3 : vector<1x64xf32> to vector<8x64xf32>
    %5 = arith.addf %2, %4 : vector<8x64xf32>
    %cst_5 = arith.constant 0.000000e+00 : f32
    %6 = vector.broadcast %cst_5 : f32 to vector<8x64xf32>
    %7 = arith.maximumf %5, %6 : vector<8x64xf32>
    %8 = arith.truncf %7 : vector<8x64xf32> to vector<8x64xbf16>
    %c0_6 = arith.constant 0 : index
    %c0_7 = arith.constant 0 : index
    %9 = vector.load %arg4[%c0_6, %c0_7] : memref<64x32xbf16, #tpu.memory_space<vmem>>, vector<64x32xbf16>
    %cst_8 = arith.constant dense<0.000000e+00> : vector<8x32xf32>
    %10 = tpu.matmul %8, %9, %cst_8 {dimension_numbers = #tpu.dot_dimension_numbers<[1], [0], [0], [1], [0, 0, 1, 1], [], []>} : vector<8x64xbf16>, vector<64x32xbf16>, vector<8x32xf32> -> vector<8x32xf32>
    %c0_9 = arith.constant 0 : index
    %c0_10 = arith.constant 0 : index
    %11 = vector.load %arg5[%c0_9, %c0_10] : memref<1x32xf32, #tpu.memory_space<vmem>>, vector<1x32xf32>
    %12 = vector.broadcast %11 : vector<1x32xf32> to vector<8x32xf32>
    %13 = arith.addf %10, %12 : vector<8x32xf32>
    %14 = arith.extf %0 : vector<8x32xbf16> to vector<8x32xf32>
    %15 = arith.addf %14, %13 : vector<8x32xf32>
    %cst_11 = arith.constant dense<0.000000e+00> : vector<8xf32>
    %16 = vector.multi_reduction <add>, %15, %cst_11 [1] : vector<8x32xf32> to vector<8xf32>
    %17 = vector.shape_cast %16 : vector<8xf32> to vector<8x1xf32>
    %cst_12 = arith.constant 3.200000e+01 : f32
    %18 = vector.broadcast %cst_12 : f32 to vector<8x1xf32>
    %19 = arith.divf %17, %18 : vector<8x1xf32>
    %20 = vector.broadcast %19 : vector<8x1xf32> to vector<8x32xf32>
    %21 = arith.subf %15, %20 : vector<8x32xf32>
    %22 = arith.mulf %21, %21 : vector<8x32xf32>
    %cst_13 = arith.constant dense<0.000000e+00> : vector<8xf32>
    %23 = vector.multi_reduction <add>, %22, %cst_13 [1] : vector<8x32xf32> to vector<8xf32>
    %24 = vector.shape_cast %23 : vector<8xf32> to vector<8x1xf32>
    %cst_14 = arith.constant 3.200000e+01 : f32
    %25 = vector.broadcast %cst_14 : f32 to vector<8x1xf32>
    %26 = arith.divf %24, %25 : vector<8x1xf32>
    %27 = vector.broadcast %19 : vector<8x1xf32> to vector<8x32xf32>
    %28 = arith.subf %15, %27 : vector<8x32xf32>
    %cst_15 = arith.constant 9.99999974E-6 : f32
    %29 = vector.broadcast %cst_15 : f32 to vector<8x1xf32>
    %30 = arith.addf %26, %29 : vector<8x1xf32>
    %31 = math.rsqrt %30 : vector<8x1xf32>
    %32 = vector.broadcast %31 : vector<8x1xf32> to vector<8x32xf32>
    %33 = arith.mulf %28, %32 : vector<8x32xf32>
    %c0_16 = arith.constant 0 : index
    %c0_17 = arith.constant 0 : index
    %34 = vector.load %arg6[%c0_16, %c0_17] : memref<1x32xf32, #tpu.memory_space<vmem>>, vector<1x32xf32>
    %35 = vector.broadcast %34 : vector<1x32xf32> to vector<8x32xf32>
    %36 = arith.mulf %33, %35 : vector<8x32xf32>
    %c0_18 = arith.constant 0 : index
    %c0_19 = arith.constant 0 : index
    %37 = vector.load %arg7[%c0_18, %c0_19] : memref<1x32xf32, #tpu.memory_space<vmem>>, vector<1x32xf32>
    %38 = vector.broadcast %37 : vector<1x32xf32> to vector<8x32xf32>
    %39 = arith.addf %36, %38 : vector<8x32xf32>
    %40 = arith.truncf %39 : vector<8x32xf32> to vector<8x32xbf16>
    %c0_20 = arith.constant 0 : index
    %c0_21 = arith.constant 0 : index
    %41 = vector.load %arg8[%c0_20, %c0_21] : memref<8x32xbf16, #tpu.memory_space<vmem>>, vector<8x32xbf16>
    tpu.vector_store %arg8[%c0_20, %c0_21], %40 {strides = array<i32>} : memref<8x32xbf16, #tpu.memory_space<vmem>>, vector<8x32xbf16>,
    return
  }
  func.func @transform_0(%arg0: i32) -> (i32, i32) {
    %c0_i32 = arith.constant 0 : i32
    %c0_i32_0 = arith.constant 0 : i32
    return %arg0, %c0_i32 : i32, i32
  }
  func.func @transform_1(%arg0: i32) -> (i32, i32) {
    %c0_i32 = arith.constant 0 : i32
    %c0_i32_0 = arith.constant 0 : i32
    %c0_i32_1 = arith.constant 0 : i32
    return %c0_i32, %c0_i32_0 : i32, i32
  }
  func.func @transform_2(%arg0: i32) -> (i32, i32) {
    %c0_i32 = arith.constant 0 : i32
    %c0_i32_0 = arith.constant 0 : i32
    %c0_i32_1 = arith.constant 0 : i32
    return %c0_i32, %c0_i32_0 : i32, i32
  }
  func.func @transform_3(%arg0: i32) -> (i32, i32) {
    %c0_i32 = arith.constant 0 : i32
    %c0_i32_0 = arith.constant 0 : i32
    %c0_i32_1 = arith.constant 0 : i32
    return %c0_i32, %c0_i32_0 : i32, i32
  }
  func.func @transform_4(%arg0: i32) -> (i32, i32) {
    %c0_i32 = arith.constant 0 : i32
    %c0_i32_0 = arith.constant 0 : i32
    %c0_i32_1 = arith.constant 0 : i32
    return %c0_i32, %c0_i32_0 : i32, i32
  }
  func.func @transform_5(%arg0: i32) -> (i32, i32) {
    %c0_i32 = arith.constant 0 : i32
    %c0_i32_0 = arith.constant 0 : i32
    %c0_i32_1 = arith.constant 0 : i32
    return %c0_i32, %c0_i32_0 : i32, i32
  }
  func.func @transform_6(%arg0: i32) -> (i32, i32) {
    %c0_i32 = arith.constant 0 : i32
    %c0_i32_0 = arith.constant 0 : i32
    %c0_i32_1 = arith.constant 0 : i32
    return %c0_i32, %c0_i32_0 : i32, i32
  }
  func.func @transform_7(%arg0: i32) -> (i32, i32) {
    %c0_i32 = arith.constant 0 : i32
    %c0_i32_0 = arith.constant 0 : i32
    return %arg0, %c0_i32 : i32, i32
  }
}

</mosaic_0001>

<bundles_post_ra>
// kernel: deformable_transformer_forward.23
= control target key start
LH: loop header
LB: loop body
LE: loop exit
PB: predicated region body
PF: predicated region fallthrough
CT: control target
= control target key end

     0   :  { %s694_s15 = smov 0   ;;  %s766_s0 = inlined_call_operand.vmem [shape: bf16[160,32], index: 0, kind: input, shape index: {}]   ;;  %s767_s1 = inlined_call_operand.vmem [shape: f32[160,1], index: 1, kind: input, shape index: {}]   ;;  %s768_s2 = inlined_call_operand.vmem [shape: bf16[32,32], index: 2, kind: input, shape index: {}]   ;;  %s769_s3 = inlined_call_operand.vmem [shape: f32[1,32], index: 3, kind: input, shape index: {}]   ;;  %s770_s4 = inlined_call_operand.vmem [shape: bf16[160,32], index: 4, kind: output, shape index: {}]  }
   0x1 LB: > { %s560_s16 = sadd.s32 4294967295, %s664_s15   ;;  %p564_p0 = scmp.ge.s32.totalorder %s664_s15, 1  ;;  %s664_s15 = sphi %s694_s15, %s14_s15  }
   0x2   : > { %p174_p1 = scmp.lt.s32.totalorder %s664_s15, 3 }
   0x4   : > { %p175_p2 = pnand %p564_p0, %p174_p1 }
   0x5   : > { %v651_v0 = vld [vmem:[%s768_s2] sm:$0xff] (!%p175_p2)   ;;  %v666_v1 = vmov (!%p175_p2), 0.0   ;;  %v652_v2 = vld [vmem:[%s768_s2 + $0x8] sm:$0xff] (!%p175_p2)   ;;  %s205_s21 = smul.u32 (!%p175_p2), 10, %s560_s16  ;;  %vm667_vm0 = vmmov (!%p175_p2), 0   ;;  %v668_v3 = vmov (!%p175_p2), 0  }
   0x6   : > { %178 = sbr.rel (%p175_p2) target bundleno = 254 (0xfe), region = 36  ;;  %610 = vmatprep.subr.bf16.mxu0 (!%p175_p2), %v666_v1  ;;  %634 = vmatprep.subr.bf16.mxu1 (!%p175_p2), %v666_v1  ;;  %vm282_vm1 = vcmask (!%p175_p2), 261120   ;;  %v568_v24 = vld [vmem:[%s769_s3] ss:$0 sm:$0xff] (!%p175_p2)  ;;  %vm481_vm2 = vcmask (!%p175_p2), 257024  }
   0x7   : > { %611 = vmatpush3.bf16.msra.mxu0 (!%p175_p2), %v651_v0  ;;  %636 = vmatpush3.bf16.msra.mxu1 (!%p175_p2), %v651_v0  ;;  %p206_p3 = scmp.lt.s32.totalorder (!%p175_p2), %s205_s21, 19 }
   0x8   : > { %612 = vmatprep.subr.bf16.mxu0 (!%p175_p2), %v666_v1  ;;  %635 = vmatprep.subr.bf16.mxu1 (!%p175_p2), %v666_v1 }
   0x9   : > { %614 = vmatprep.mubr.msk.bf16.mxu0 (!%p175_p2), %vm667_vm0, %v666_v1  ;;  %626 = vmatprep.mubr.msk.bf16.mxu1 (!%p175_p2), %vm667_vm0, %v666_v1 }
   0xa   : > { %650 = vset.pattern.permute.xlu1 (!%p175_p2), %v668_v3  ;;  %649 = vset.pattern.permute.xlu0 (!%p175_p2), %v668_v3 }
   0xb   : > { %613 = vmatpush3.bf16.msra.mxu0 (!%p175_p2), %v652_v2  ;;  %637 = vmatpush3.bf16.msra.mxu1 (!%p175_p2), %v652_v2 }
   0xd   : > { %s772_s21 = smov (!%p206_p3, %s205_s21), 19 }
   0xe   : > { %s565_s22 = sshll.u32 %s772_s21, 2  ;;  %s566_s26 = sshll.u32 %s772_s21, 3 }
   0xf   : > { %s209_s25 = scalar_lea.vmem %s766_s0, %s565_s22  ;;  %s215_s29 = scalar_lea.vmem %s767_s1, %s566_s26 }
  0x10   : > { %v653_v4 = vld [vmem:[%s209_s25] sm:$0xff]   ;;  %v654_v5 = vld [vmem:[%s209_s25 + $0x18] sm:$0xff]   ;;  %v373_v6 = vld [vmem:[%s215_s29 + $0x10] sm:$0xff]  ;;  %s740_s8 = scalar_lea.vmem %s770_s4, %s565_s22 }
  0x11   : > { %615 = vmatmul.mubr.msk.bf16.vlgmr.msra.gmra.mrb[0].mxu0 %vm282_vm1, %v653_v4  ;;  %627 = vmatmul.mubr.msk.bf16.vlgmr.msra.gmra.mrb[0].mxu1 %vm282_vm1, %v654_v5  ;;  %v371_v7 = vld [vmem:[%s215_s29] sm:$0xff]  ;;  %v655_v8 = vld [vmem:[%s209_s25 + $0x8] sm:$0xff]   ;;  %v374_v10 = vld [vmem:[%s215_s29 + $0x18] sm:$0xff] }
  0x12   : > { %618 = vmatprep.mubr.msk.bf16.mxu0 %vm667_vm0, %v666_v1  ;;  %630 = vmatprep.mubr.msk.bf16.mxu1 %vm667_vm0, %v666_v1  ;;  %v656_v9 = vld [vmem:[%s209_s25 + $0x20] sm:$0xff]   ;;  %v372_v11 = vld [vmem:[%s215_s29 + $0x8] sm:$0xff]  ;;  %v657_v14 = vld [vmem:[%s209_s25 + $0x10] sm:$0xff]  }
  0x13   : > { %393 = vperm.xlu1 %650, %v373_v6   ;;  %383 = vperm.xlu0 %649, %v371_v7   ;;  %v376_v12 = vld [vmem:[%s215_s29 + $0x28] sm:$0xff]  ;;  %v375_v13 = vld [vmem:[%s215_s29 + $0x20] sm:$0xff]  ;;  %v378_v15 = vld [vmem:[%s215_s29 + $0x38] sm:$0xff] }
  0x14   : > { %v377_v16 = vld [vmem:[%s215_s29 + $0x30] sm:$0xff]  ;;  %v380_v17 = vld [vmem:[%s215_s29 + $0x48] sm:$0xff]  ;;  %v379_v18 = vld [vmem:[%s215_s29 + $0x40] sm:$0xff] }
  0x17   : > { %398 = vperm.xlu1 %650, %v374_v10   ;;  %388 = vperm.xlu0 %649, %v372_v11  }
  0x19   : > { %619 = vmatmul.mubr.msk.bf16.gmra.mrb[4].mxu0 %vm282_vm1, %v655_v8  ;;  %631 = vmatmul.mubr.msk.bf16.gmra.mrb[4].mxu1 %vm282_vm1, %v656_v9 }
  0x1a   : > { %622 = vmatprep.mubr.msk.bf16.mxu0 %vm667_vm0, %v666_v1 }
  0x1b   : > { %408 = vperm.xlu1 %650, %v376_v12   ;;  %403 = vperm.xlu0 %649, %v375_v13  }
  0x1f   : > { %418 = vperm.xlu1 %650, %v378_v15   ;;  %413 = vperm.xlu0 %649, %v377_v16  }
  0x21   : > { %623 = vmatmul.mubr.msk.bf16.gmra.mrb[8].mxu0 %vm282_vm1, %v657_v14 }
  0x23   : > { %428 = vperm.xlu1 %650, %v380_v17   ;;  %423 = vperm.xlu0 %649, %v379_v18  }
  0x92   : > { %v384_v19 = vpop.permute.xlu0 %383  ;;  %v394_v20 = vpop.permute.xlu1 %393 }
  0x96   : > { %v389_v21 = vpop.permute.xlu0 %388  ;;  %v399_v22 = vpop.permute.xlu1 %398 }
  0x9a   : > { %v404_v23 = vpop.permute.xlu0 %403  ;;  %v733_v25 = vpop.permute.xlu1 %408 }
  0x9e   : > { %v414_v26 = vpop.permute.xlu0 %413  ;;  %v419_v41 = vpop.permute.xlu1 %418 }
  0xa2   : > { %v424_v48 = vpop.permute.xlu0 %423  ;;  %v429_v63 = vpop.permute.xlu1 %428 }
  0xe4   : > { %v332_v27 = vpop.f32.mrb[0].mxu0  ;;  %v356_v29 = vpop.f32.mrb[0].mxu1 }
  0xe5   : > { %v333_v28 = vadd.f32 %v568_v24, %v332_v27  ;;  %v616_v30 = vpop.f32.mrb[1].mxu0  ;;  %v357_v31 = vadd.f32 %v568_v24, %v356_v29  ;;  %v628_v32 = vpop.f32.mrb[1].mxu1 }
  0xe6   : > { %v335_v33 = vpop.f32.mrb[2].mxu0  ;;  %v359_v36 = vpop.f32.mrb[2].mxu1 }
  0xe7   : > { %v431_v34 = vmul.f32 %v384_v19, %v333_v28  ;;  %v336_v35 = vadd.f32 %v568_v24, %v335_v33  ;;  %v617_v37 = vpop.f32.mrb[3].mxu0  ;;  %v437_v38 = vmul.f32 %v414_v26, %v357_v31  ;;  %v360_v39 = vadd.f32 %v568_v24, %v359_v36  ;;  %v629_v40 = vpop.f32.mrb[3].mxu1 }
  0xe9   : > { %v593_v42 = vpack.c.bf16 %v431_v34, %v431_v34  ;;  %v432_v43 = vmul.f32 %v389_v21, %v336_v35  ;;  %v599_v44 = vpack.c.bf16 %v437_v38, %v437_v38  ;;  %v438_v45 = vmul.f32 %v419_v41, %v360_v39 }
  0xeb   : > { %482 = vst.msk [vmem:[%s740_s8] sm:$0xf] %vm481_vm2, %v593_v42  ;;  %v594_v46 = vpack.c.bf16 %v432_v43, %v432_v43  ;;  %488 = vst.msk [vmem:[%s740_s8 + $0x18] sm:$0xf] %vm481_vm2, %v599_v44  ;;  %v600_v47 = vpack.c.bf16 %v438_v45, %v438_v45 }
  0xec   : > { %v340_v49 = vpop.f32.mrb[4].mxu0  ;;  %v364_v51 = vpop.f32.mrb[4].mxu1 }
  0xed   : > { %483 = vst.msk [vmem:[%s740_s8 + $0x4] sm:$0xf] %vm481_vm2, %v594_v46  ;;  %v341_v50 = vadd.f32 %v568_v24, %v340_v49  ;;  %v620_v52 = vpop.f32.mrb[5].mxu0  ;;  %489 = vst.msk [vmem:[%s740_s8 + $0x1c] sm:$0xf] %vm481_vm2, %v600_v47  ;;  %v365_v53 = vadd.f32 %v568_v24, %v364_v51  ;;  %v632_v54 = vpop.f32.mrb[5].mxu1 }
  0xee   : > { %v343_v55 = vpop.f32.mrb[6].mxu0  ;;  %v367_v58 = vpop.f32.mrb[6].mxu1 }
  0xef   : > { %v433_v56 = vmul.f32 %v394_v20, %v341_v50  ;;  %v344_v57 = vadd.f32 %v568_v24, %v343_v55  ;;  %v621_v59 = vpop.f32.mrb[7].mxu0  ;;  %v439_v60 = vmul.f32 %v424_v48, %v365_v53  ;;  %v368_v61 = vadd.f32 %v568_v24, %v367_v58  ;;  %v633_v62 = vpop.f32.mrb[7].mxu1 }
  0xf1   : > { %v595_v0 = vpack.c.bf16 %v433_v56, %v433_v56  ;;  %v434_v1 = vmul.f32 %v399_v22, %v344_v57  ;;  %v601_v2 = vpack.c.bf16 %v439_v60, %v439_v60  ;;  %v440_v3 = vmul.f32 %v429_v63, %v368_v61 }
  0xf3   : > { %484 = vst.msk [vmem:[%s740_s8 + $0x8] sm:$0xf] %vm481_vm2, %v595_v0  ;;  %v596_v4 = vpack.c.bf16 %v434_v1, %v434_v1  ;;  %490 = vst.msk [vmem:[%s740_s8 + $0x20] sm:$0xf] %vm481_vm2, %v601_v2  ;;  %v602_v5 = vpack.c.bf16 %v440_v3, %v440_v3 }
  0xf4   : > { %v348_v6 = vpop.f32.mrb[8].mxu0 }
  0xf5   : > { %485 = vst.msk [vmem:[%s740_s8 + $0xc] sm:$0xf] %vm481_vm2, %v596_v4  ;;  %v349_v7 = vadd.f32 %v568_v24, %v348_v6  ;;  %v624_v8 = vpop.f32.mrb[9].mxu0  ;;  %491 = vst.msk [vmem:[%s740_s8 + $0x24] sm:$0xf] %vm481_vm2, %v602_v5 }
  0xf6   : > { %v351_v9 = vpop.f32.mrb[10].mxu0 }
  0xf7   : > { %v435_v10 = vmul.f32 %v404_v23, %v349_v7  ;;  %v352_v11 = vadd.f32 %v568_v24, %v351_v9  ;;  %v625_v12 = vpop.f32.mrb[11].mxu0 }
  0xf9   : > { %v597_v13 = vpack.c.bf16 %v435_v10, %v435_v10  ;;  %v436_v14 = vmul.f32 %v733_v25, %v352_v11 }
  0xfb   : > { %486 = vst.msk [vmem:[%s740_s8 + $0x10] sm:$0xf] %vm481_vm2, %v597_v13  ;;  %v598_v15 = vpack.c.bf16 %v436_v14, %v436_v14 }
  0xfd   : > { %487 = vst.msk [vmem:[%s740_s8 + $0x14] sm:$0xf] %vm481_vm2, %v598_v15 }
  0xfe PF: > { %s14_s15 = sadd.s32 1, %s664_s15  }
  0xff   : > { %p11_p4 = scmp.ge.s32.totalorder %s14_s15, 4  }
 0x101   :  { %13 = sbr.rel (!%p11_p4) target bundleno = 1 (0x1), region = 69 }

// kernel: deformable_transformer_forward.24
= control target key start
LH: loop header
LB: loop body
LE: loop exit
PB: predicated region body
PF: predicated region fallthrough
CT: control target
= control target key end

     0   :  { %s1631_s18 = smov 0   ;;  %s2209_s0 = inlined_call_operand.vmem [shape: bf16[160,32], index: 0, kind: input, shape index: {}]   ;;  %s2210_s1 = inlined_call_operand.vmem [shape: bf16[160,32], index: 1, kind: input, shape index: {}]   ;;  %s2211_s2 = inlined_call_operand.vmem [shape: bf16[32,48], index: 2, kind: input, shape index: {}]   ;;  %s2212_s3 = inlined_call_operand.vmem [shape: f32[1,48], index: 3, kind: input, shape index: {}]   ;;  %s2213_s4 = inlined_call_operand.vmem [shape: f32[160,32], index: 4, kind: output, shape index: {0}]   ;;  %s2214_s5 = inlined_call_operand.vmem [shape: f32[160,16], index: 5, kind: output, shape index: {1}]  }
   0x1 LB: > { %s1352_s19 = sadd.s32 4294967295, %s1593_s18   ;;  %p1356_p0 = scmp.ge.s32.totalorder %s1593_s18, 1  ;;  %s1593_s18 = sphi %s1631_s18, %s16_s18  }
   0x2   : > { %p202_p1 = scmp.lt.s32.totalorder %s1593_s18, 3 }
   0x4   : > { %p203_p2 = pnand %p1356_p0, %p202_p1 }
   0x5   : > { %v1425_v0 = vld [vmem:[%s2211_s2] sm:$0xff] (!%p203_p2)   ;;  %v1595_v1 = vmov (!%p203_p2), 0.0   ;;  %v1426_v2 = vld [vmem:[%s2211_s2 + $0x8] sm:$0xff] (!%p203_p2)   ;;  %s240_s24 = smul.u32 (!%p203_p2), 10, %s1352_s19  ;;  %vm1596_vm0 = vmmov (!%p203_p2), 0   ;;  %vm343_vm1 = vcmask (!%p203_p2), 261120  }
   0x6   : > { %206 = sbr.rel (%p203_p2) target bundleno = 904 (0x388), region = 36  ;;  %1383 = vmatprep.subr.bf16.mxu0 (!%p203_p2), %v1595_v1  ;;  %1407 = vmatprep.subr.bf16.mxu1 (!%p203_p2), %v1595_v1  ;;  %v1361_v38 = vld [vmem:[%s2212_s3] ss:$0 sm:$0xff] (!%p203_p2)  ;;  %vm745_vm2 = vcmask (!%p203_p2), 359744   ;;  %vm442_vm3 = vcmask (!%p203_p2), 294144   ;;  %vm896_vm4 = vcmask (!%p203_p2), 392544  }
   0x7   : > { %1384 = vmatpush3.bf16.msra.mxu0 (!%p203_p2), %v1425_v0  ;;  %1409 = vmatpush3.bf16.msra.mxu1 (!%p203_p2), %v1425_v0  ;;  %p241_p3 = scmp.lt.s32.totalorder (!%p203_p2), %s240_s24, 19  ;;  %vm594_vm5 = vcmask (!%p203_p2), 326944   ;;  %s1597_s13 = smov (!%p203_p2), 88   ;;  %vm543_vm6 = vcmask (!%p203_p2), 31744   ;;  %vm1217_vm7 = vcmask (!%p203_p2), 64512   ;;  %vm1228_vm8 = vcmask (!%p203_p2), 97280  }
   0x8   : > { %1385 = vmatprep.subr.bf16.mxu0 (!%p203_p2), %v1595_v1  ;;  %1408 = vmatprep.subr.bf16.mxu1 (!%p203_p2), %v1595_v1  ;;  %s1598_s14 = smov (!%p203_p2), 96   ;;  %s1599_s15 = smov (!%p203_p2), 92   ;;  %vm1239_vm9 = vcmask (!%p203_p2), 130048  }
   0x9   : > { %1387 = vmatprep.mubr.msk.bf16.mxu0 (!%p203_p2), %vm1596_vm0, %v1595_v1  ;;  %1399 = vmatprep.mubr.msk.bf16.mxu1 (!%p203_p2), %vm1596_vm0, %v1595_v1  ;;  %s1600_s16 = smov (!%p203_p2), 84  }
   0xb   : > { %1386 = vmatpush3.bf16.msra.mxu0 (!%p203_p2), %v1426_v2  ;;  %1410 = vmatpush3.bf16.msra.mxu1 (!%p203_p2), %v1426_v2 }
   0xd   : > { %s2216_s24 = smov (!%p241_p3, %s240_s24), 19 }
   0xe   : > { %s1357_s25 = sshll.u32 %s2216_s24, 2  ;;  %s1359_s7 = sshll.u32 %s2216_s24, 3 }
   0xf   : > { %s1653_s28 = scalar_lea.vmem %s2209_s0, %s1357_s25  ;;  %s1658_s6 = scalar_lea.vmem %s2210_s1, %s1357_s25 }
  0x10   : > { %v265_v3 = vld [vmem:[%s1653_s28] sm:$0xf]  ;;  %v266_v4 = vld [vmem:[%s1653_s28 + $0x4] sm:$0xf]  ;;  %v271_v8 = vld [vmem:[%s1653_s28 + $0x18] sm:$0xf]  ;;  %s1697_s12 = scalar_lea.vmem %s2213_s4, %s1359_s7  ;;  %s2155_s20 = scalar_lea.vmem %s2214_s5, %s1359_s7 }
  0x11   : > { %v275_v5 = vld [vmem:[%s1658_s6] sm:$0xf]  ;;  %v276_v6 = vld [vmem:[%s1658_s6 + $0x4] sm:$0xf]  ;;  %v272_v9 = vld [vmem:[%s1653_s28 + $0x1c] sm:$0xf] }
  0x12   : > { %v285_v7 = vadd.bf16 %v275_v5, %v265_v3  ;;  %v286_v10 = vadd.bf16 %v276_v6, %v266_v4  ;;  %v281_v11 = vld [vmem:[%s1658_s6 + $0x18] sm:$0xf]  ;;  %v282_v12 = vld [vmem:[%s1658_s6 + $0x1c] sm:$0xf]  ;;  %v267_v13 = vld [vmem:[%s1653_s28 + $0x8] sm:$0xf] }
  0x13   : > { %v291_v14 = vadd.bf16 %v281_v11, %v271_v8  ;;  %v292_v15 = vadd.bf16 %v282_v12, %v272_v9  ;;  %v268_v16 = vld [vmem:[%s1653_s28 + $0xc] sm:$0xf]  ;;  %v277_v17 = vld [vmem:[%s1658_s6 + $0x8] sm:$0xf]  ;;  %v273_v20 = vld [vmem:[%s1653_s28 + $0x20] sm:$0xf] }
  0x14   : > { %v278_v18 = vld [vmem:[%s1658_s6 + $0xc] sm:$0xf]  ;;  %v1362_v19 = vcombine.low %v285_v7, %v286_v10  ;;  %v274_v21 = vld [vmem:[%s1653_s28 + $0x24] sm:$0xf]  ;;  %v283_v22 = vld [vmem:[%s1658_s6 + $0x20] sm:$0xf]  ;;  %v287_v25 = vadd.bf16 %v277_v17, %v267_v13 }
  0x15   : > { %v1365_v23 = vcombine.low %v291_v14, %v292_v15  ;;  %v284_v24 = vld [vmem:[%s1658_s6 + $0x24] sm:$0xf]  ;;  %v288_v26 = vadd.bf16 %v278_v18, %v268_v16  ;;  %v293_v27 = vadd.bf16 %v283_v22, %v273_v20  ;;  %v269_v30 = vld [vmem:[%s1653_s28 + $0x10] sm:$0xf]  ;;  %v270_v32 = vld [vmem:[%s1653_s28 + $0x14] sm:$0xf] }
  0x16   : > { %1388 = vmatmul.mubr.msk.bf16.vlgmr.msra.gmra.mrb[0].mxu0 %vm343_vm1, %v1362_v19  ;;  %v294_v28 = vadd.bf16 %v284_v24, %v274_v21  ;;  %v279_v33 = vld [vmem:[%s1658_s6 + $0x10] sm:$0xf]  ;;  %v280_v34 = vld [vmem:[%s1658_s6 + $0x14] sm:$0xf] }
  0x17   : > { %1400 = vmatmul.mubr.msk.bf16.vlgmr.msra.gmra.mrb[0].mxu1 %vm343_vm1, %v1365_v23  ;;  %1391 = vmatprep.mubr.msk.bf16.mxu0 %vm1596_vm0, %v1595_v1  ;;  %v1363_v29 = vcombine.low %v287_v25, %v288_v26  ;;  %v289_v35 = vadd.bf16 %v279_v33, %v269_v30  ;;  %v290_v36 = vadd.bf16 %v280_v34, %v270_v32 }
  0x18   : > { %1403 = vmatprep.mubr.msk.bf16.mxu1 %vm1596_vm0, %v1595_v1  ;;  %v1366_v31 = vcombine.low %v293_v27, %v294_v28 }
  0x19   : > { %v1364_v37 = vcombine.low %v289_v35, %v290_v36 }
  0x1e   : > { %1392 = vmatmul.mubr.msk.bf16.gmra.mrb[4].mxu0 %vm343_vm1, %v1363_v29 }
  0x1f   : > { %1404 = vmatmul.mubr.msk.bf16.gmra.mrb[4].mxu1 %vm343_vm1, %v1366_v31  ;;  %1395 = vmatprep.mubr.msk.bf16.mxu0 %vm1596_vm0, %v1595_v1 }
  0x26   : > { %1396 = vmatmul.mubr.msk.bf16.gmra.mrb[8].mxu0 %vm343_vm1, %v1364_v37 }
  0xe9   : > { %v393_v39 = vpop.f32.mrb[0].mxu0 }
  0xea   : > { %v1699_v40 = vadd.f32 %v1361_v38, %v393_v39  ;;  %v1389_v41 = vpop.f32.mrb[1].mxu0  ;;  %v417_v42 = vpop.f32.mrb[0].mxu1 }
  0xeb   : > { %v1701_v43 = vadd.f32 %v1361_v38, %v417_v42  ;;  %v396_v44 = vpop.f32.mrb[2].mxu0  ;;  %v1401_v45 = vpop.f32.mrb[1].mxu1 }
  0xec   : > { %v1703_v46 = vadd.f32 %v1361_v38, %v396_v44  ;;  %v1390_v47 = vpop.f32.mrb[3].mxu0  ;;  %v420_v48 = vpop.f32.mrb[2].mxu1  ;;  %v746_v49 = vsel %vm745_vm2, %v1699_v40, -inf  ;;  %v443_v50 = vsel %vm442_vm3, %v1699_v40, -inf  ;;  %432 = vst.msk [vmem:[%s1697_s12] sm:$0xff] %vm343_vm1, %v1699_v40  ;;  %v897_v62 = vsel %vm896_vm4, %v1699_v40, -inf }
  0xed   : > { %v1712_v51 = vadd.f32 %v1361_v38, %v420_v48  ;;  %v1402_v52 = vpop.f32.mrb[3].mxu1  ;;  %747 = vmax.xlane.f32.xlu1 %v746_v49  ;;  %444 = vmax.xlane.f32.xlu0 %v443_v50  ;;  %438 = vst.msk [vmem:[%s1697_s12 + $0x30] sm:$0xff] %vm343_vm1, %v1701_v43  ;;  %v764_v53 = vsel %vm745_vm2, %v1701_v43, -inf  ;;  %v461_v54 = vsel %vm442_vm3, %v1701_v43, -inf  ;;  %v595_v63 = vsel %vm594_vm5, %v1699_v40, -inf }
  0xee   : > { %433 = vst.msk [vmem:[%s1697_s12 + $0x8] sm:$0xff] %vm343_vm1, %v1703_v46  ;;  %v915_v5 = vsel %vm896_vm4, %v1701_v43, -inf  ;;  %v613_v6 = vsel %vm594_vm5, %v1701_v43, -inf  ;;  %v446_v12 = vsel %vm442_vm3, %v1703_v46, -inf  ;;  %v598_v15 = vsel %vm594_vm5, %v1703_v46, -inf }
  0xef   : > { %439 = vst.msk [vmem:[%s1697_s12 + $0x38] sm:$0xff] %vm343_vm1, %v1712_v51  ;;  %v464_v11 = vsel %vm442_vm3, %v1712_v51, -inf  ;;  %v749_v16 = vsel %vm745_vm2, %v1703_v46, -inf  ;;  %v616_v17 = vsel %vm594_vm5, %v1712_v51, -inf  ;;  %v767_v18 = vsel %vm745_vm2, %v1712_v51, -inf }
  0xf0   : > { %v900_v20 = vsel %vm896_vm4, %v1703_v46, -inf  ;;  %v918_v22 = vsel %vm896_vm4, %v1712_v51, -inf }
  0xf1   : > { %765 = vmax.xlane.f32.xlu1 %v764_v53  ;;  %462 = vmax.xlane.f32.xlu0 %v461_v54  ;;  %v401_v55 = vpop.f32.mrb[4].mxu0 }
  0xf2   : > { %v1727_v56 = vadd.f32 %v1361_v38, %v401_v55  ;;  %v425_v57 = vpop.f32.mrb[4].mxu1  ;;  %v1393_v58 = vpop.f32.mrb[5].mxu0 }
  0xf3   : > { %v1729_v59 = vadd.f32 %v1361_v38, %v425_v57  ;;  %v404_v60 = vpop.f32.mrb[6].mxu0  ;;  %v1405_v61 = vpop.f32.mrb[5].mxu1 }
  0xf4   : > { %v1735_v0 = vadd.f32 %v1361_v38, %v404_v60  ;;  %v1394_v1 = vpop.f32.mrb[7].mxu0  ;;  %v428_v2 = vpop.f32.mrb[6].mxu1  ;;  %434 = vst.msk [vmem:[%s1697_s12 + $0x10] sm:$0xff] %vm343_vm1, %v1727_v56  ;;  %v449_v19 = vsel %vm442_vm3, %v1727_v56, -inf  ;;  %v903_v24 = vsel %vm896_vm4, %v1727_v56, -inf  ;;  %v601_v25 = vsel %vm594_vm5, %v1727_v56, -inf }
  0xf5   : > { %898 = vmax.xlane.f32.xlu1 %v897_v62  ;;  %596 = vmax.xlane.f32.xlu0 %v595_v63  ;;  %v1740_v3 = vadd.f32 %v1361_v38, %v428_v2  ;;  %v1406_v4 = vpop.f32.mrb[7].mxu1  ;;  %440 = vst.msk [vmem:[%s1697_s12 + $0x40] sm:$0xff] %vm343_vm1, %v1729_v59  ;;  %v770_v21 = vsel %vm745_vm2, %v1729_v59, -inf  ;;  %v467_v23 = vsel %vm442_vm3, %v1729_v59, -inf  ;;  %v921_v26 = vsel %vm896_vm4, %v1729_v59, -inf }
  0xf6   : > { %435 = vst.msk [vmem:[%s1697_s12 + $0x18] sm:$0xff] %vm343_vm1, %v1735_v0  ;;  %v619_v27 = vsel %vm594_vm5, %v1729_v59, -inf  ;;  %v452_v28 = vsel %vm442_vm3, %v1735_v0, -inf  ;;  %v752_v30 = vsel %vm745_vm2, %v1727_v56, -inf  ;;  %v755_v31 = vsel %vm745_vm2, %v1735_v0, -inf }
  0xf7   : > { %441 = vst.msk [vmem:[%s1697_s12 + $0x48] sm:$0xff] %vm343_vm1, %v1740_v3  ;;  %v470_v29 = vsel %vm442_vm3, %v1740_v3, -inf  ;;  %v604_v32 = vsel %vm594_vm5, %v1735_v0, -inf  ;;  %v773_v33 = vsel %vm745_vm2, %v1740_v3, -inf  ;;  %v622_v34 = vsel %vm594_vm5, %v1740_v3, -inf }
  0xf8   : > { %v906_v36 = vsel %vm896_vm4, %v1735_v0, -inf }
  0xf9   : > { %916 = vmax.xlane.f32.xlu1 %v915_v5  ;;  %614 = vmax.xlane.f32.xlu0 %v613_v6  ;;  %v409_v7 = vpop.f32.mrb[8].mxu0 }
  0xfa   : > { %v1755_v8 = vadd.f32 %v1361_v38, %v409_v7  ;;  %v1397_v9 = vpop.f32.mrb[9].mxu0 }
  0xfb   : > { %v412_v10 = vpop.f32.mrb[10].mxu0 }
  0xfc   : > { %v1761_v13 = vadd.f32 %v1361_v38, %v412_v10  ;;  %v1398_v14 = vpop.f32.mrb[11].mxu0  ;;  %436 = vst.msk [vmem:[%s1697_s12 + $0x20] sm:$0xff] %vm343_vm1, %v1755_v8  ;;  %v758_v35 = vsel %vm745_vm2, %v1755_v8, -inf  ;;  %v909_v37 = vsel %vm896_vm4, %v1755_v8, -inf  ;;  %v924_v38 = vsel %vm896_vm4, %v1740_v3, -inf }
  0xfd   : > { %465 = vmax.xlane.f32.xlu1 %v464_v11  ;;  %447 = vmax.xlane.f32.xlu0 %v446_v12  ;;  %v455_v39 = vsel %vm442_vm3, %v1755_v8, -inf  ;;  %v607_v42 = vsel %vm594_vm5, %v1755_v8, -inf }
  0xfe   : > { %437 = vst.msk [vmem:[%s1697_s12 + $0x28] sm:$0xff] %vm343_vm1, %v1761_v13  ;;  %v458_v41 = vsel %vm442_vm3, %v1761_v13, -inf  ;;  %v610_v44 = vsel %vm594_vm5, %v1761_v13, -inf  ;;  %v761_v45 = vsel %vm745_vm2, %v1761_v13, -inf  ;;  %v912_v47 = vsel %vm896_vm4, %v1761_v13, -inf }
 0x101   : > { %599 = vmax.xlane.f32.xlu1 %v598_v15  ;;  %750 = vmax.xlane.f32.xlu0 %v749_v16 }
 0x105   : > { %617 = vmax.xlane.f32.xlu1 %v616_v17  ;;  %768 = vmax.xlane.f32.xlu0 %v767_v18 }
 0x109   : > { %901 = vmax.xlane.f32.xlu0 %v900_v20  ;;  %450 = vmax.xlane.f32.xlu1 %v449_v19 }
 0x10d   : > { %919 = vmax.xlane.f32.xlu0 %v918_v22  ;;  %771 = vmax.xlane.f32.xlu1 %v770_v21 }
 0x111   : > { %468 = vmax.xlane.f32.xlu0 %v467_v23  ;;  %904 = vmax.xlane.f32.xlu1 %v903_v24 }
 0x115   : > { %602 = vmax.xlane.f32.xlu0 %v601_v25  ;;  %922 = vmax.xlane.f32.xlu1 %v921_v26 }
 0x119   : > { %620 = vmax.xlane.f32.xlu0 %v619_v27  ;;  %453 = vmax.xlane.f32.xlu1 %v452_v28 }
 0x11d   : > { %753 = vmax.xlane.f32.xlu0 %v752_v30  ;;  %471 = vmax.xlane.f32.xlu1 %v470_v29 }
 0x121   : > { %756 = vmax.xlane.f32.xlu0 %v755_v31  ;;  %605 = vmax.xlane.f32.xlu1 %v604_v32 }
 0x125   : > { %774 = vmax.xlane.f32.xlu0 %v773_v33  ;;  %623 = vmax.xlane.f32.xlu1 %v622_v34 }
 0x129   : > { %907 = vmax.xlane.f32.xlu0 %v906_v36  ;;  %759 = vmax.xlane.f32.xlu1 %v758_v35 }
 0x12d   : > { %925 = vmax.xlane.f32.xlu0 %v924_v38  ;;  %910 = vmax.xlane.f32.xlu1 %v909_v37 }
 0x131   : > { %456 = vmax.xlane.f32.xlu0 %v455_v39  ;;  %459 = vmax.xlane.f32.xlu1 %v458_v41 }
 0x135   : > { %608 = vmax.xlane.f32.xlu0 %v607_v42  ;;  %611 = vmax.xlane.f32.xlu1 %v610_v44 }
 0x139   : > { %762 = vmax.xlane.f32.xlu0 %v761_v45 }
 0x13d   : > { %913 = vmax.xlane.f32.xlu0 %v912_v47 }
 0x17a   : > { %v748_v48 = vpop.xlane.xlu1 %747  ;;  %v445_v49 = vpop.xlane.xlu0 %444 }
 0x17b   : > { %v776_v50 = vsub.f32 %v1699_v40, %v748_v48  ;;  %v473_v52 = vsub.f32 %v1699_v40, %v445_v49 }
 0x17d   : > { %v786_v53 = vmul.f32 1.442695, %v776_v50  ;;  %v483_v54 = vmul.f32 1.442695, %v473_v52 }
 0x17e   : > { %v766_v55 = vpop.xlane.xlu1 %765  ;;  %v463_v57 = vpop.xlane.xlu0 %462 }
 0x17f   : > { %1427 = vpow2.f32 %v786_v53  ;;  %v782_v58 = vsub.f32 %v1701_v43, %v766_v55  ;;  %v479_v60 = vsub.f32 %v1701_v43, %v463_v57 }
 0x180   : > { %1429 = vpow2.f32 %v483_v54 }
 0x181   : > { %v798_v61 = vmul.f32 1.442695, %v782_v58  ;;  %v495_v62 = vmul.f32 1.442695, %v479_v60 }
 0x182   : > { %v899_v63 = vpop.xlane.xlu1 %898  ;;  %v597_v1 = vpop.xlane.xlu0 %596 }
 0x183   : > { %1431 = vpow2.f32 %v798_v61  ;;  %v625_v2 = vsub.f32 %v1699_v40, %v597_v1  ;;  %v927_v7 = vsub.f32 %v1699_v40, %v899_v63 }
 0x184   : > { %1433 = vpow2.f32 %v495_v62 }
 0x185   : > { %v635_v4 = vmul.f32 1.442695, %v625_v2  ;;  %v937_v16 = vmul.f32 1.442695, %v927_v7 }
 0x186   : > { %v917_v5 = vpop.xlane.xlu1 %916  ;;  %v615_v6 = vpop.xlane.xlu0 %614 }
 0x187   : > { %v631_v9 = vsub.f32 %v1701_v43, %v615_v6  ;;  %1435 = vpow2.f32 %v635_v4  ;;  %v933_v17 = vsub.f32 %v1701_v43, %v917_v5 }
 0x189   : > { %v1836_v10 = vpop.eup %1427  ;;  %v647_v11 = vmul.f32 1.442695, %v631_v9  ;;  %v949_v43 = vmul.f32 1.442695, %v933_v17 }
 0x18a   : > { %v1838_v12 = vpop.eup %1429  ;;  %v466_v14 = vpop.xlane.xlu1 %465  ;;  %816 = vrot.lane.b32.xlu1 %v1836_v10, %s1597_s13 }
 0x18b   : > { %v448_v15 = vpop.xlane.xlu0 %447  ;;  %513 = vrot.lane.b32.xlu0 %v1838_v12, %s1598_s14  ;;  %1437 = vpow2.f32 %v647_v11  ;;  %v480_v40 = vsub.f32 %v1712_v51, %v466_v14 }
 0x18c   : > { %v474_v18 = vsub.f32 %v1703_v46, %v448_v15  ;;  %1439 = vpow2.f32 %v937_v16 }
 0x18d   : > { %v1847_v19 = vpop.eup %1431  ;;  %v497_v25 = vmul.f32 1.442695, %v480_v40 }
 0x18e   : > { %v485_v20 = vmul.f32 1.442695, %v474_v18  ;;  %v1849_v21 = vpop.eup %1433  ;;  %v600_v22 = vpop.xlane.xlu1 %599  ;;  %828 = vrot.lane.b32.xlu1 %v1847_v19, %s1597_s13 }
 0x18f   : > { %v751_v23 = vpop.xlane.xlu0 %750  ;;  %v626_v24 = vsub.f32 %v1703_v46, %v600_v22  ;;  %525 = vrot.lane.b32.xlu0 %v1849_v21, %s1598_s14 }
 0x190   : > { %1441 = vpow2.f32 %v485_v20  ;;  %v777_v26 = vsub.f32 %v1703_v46, %v751_v23 }
 0x191   : > { %v1857_v27 = vpop.eup %1435  ;;  %1443 = vpow2.f32 %v949_v43  ;;  %v637_v30 = vmul.f32 1.442695, %v626_v24 }
 0x192   : > { %v618_v28 = vpop.xlane.xlu1 %617  ;;  %1445 = vpow2.f32 %v497_v25  ;;  %v788_v31 = vmul.f32 1.442695, %v777_v26 }
 0x193   : > { %v769_v29 = vpop.xlane.xlu0 %768  ;;  %665 = vrot.lane.b32.xlu0 %v1857_v27, %s1599_s15  ;;  %v632_v32 = vsub.f32 %v1712_v51, %v618_v28  ;;  %1447 = vpow2.f32 %v637_v30 }
 0x194   : > { %1449 = vpow2.f32 %v788_v31  ;;  %v783_v37 = vsub.f32 %v1712_v51, %v769_v29 }
 0x195   : > { %v1862_v33 = vpop.eup %1437  ;;  %v649_v36 = vmul.f32 1.442695, %v632_v32 }
 0x196   : > { %v451_v35 = vpop.xlane.xlu1 %450  ;;  %v1867_v38 = vpop.eup %1439  ;;  %v800_v44 = vmul.f32 1.442695, %v783_v37 }
 0x197   : > { %v902_v34 = vpop.xlane.xlu0 %901  ;;  %677 = vrot.lane.b32.xlu0 %v1862_v33, %s1599_s15  ;;  %1451 = vpow2.f32 %v649_v36  ;;  %v475_v61 = vsub.f32 %v1727_v56, %v451_v35 }
 0x198   : > { %v928_v45 = vsub.f32 %v1703_v46, %v902_v34  ;;  %1453 = vpow2.f32 %v800_v44 }
 0x199   : > { %v487_v5 = vmul.f32 1.442695, %v475_v61 }
 0x19a   : > { %v1869_v39 = vpop.eup %1441  ;;  %v772_v42 = vpop.xlane.xlu1 %771  ;;  %v939_v53 = vmul.f32 1.442695, %v928_v45 }
 0x19b   : > { %v920_v41 = vpop.xlane.xlu0 %919  ;;  %967 = vrot.lane.b32.xlu0 %v1867_v38, %s1600_s16  ;;  %515 = vrot.lane.b32.xlu1 %v1869_v39, %s1598_s14  ;;  %v1876_v47 = vpop.eup %1443  ;;  %v784_v2 = vsub.f32 %v1729_v59, %v772_v42 }
 0x19c   : > { %v1878_v48 = vpop.eup %1445  ;;  %v934_v54 = vsub.f32 %v1712_v51, %v920_v41 }
 0x19d   : > { %v1886_v55 = vpop.eup %1447  ;;  %v802_v15 = vmul.f32 1.442695, %v784_v2 }
 0x19e   : > { %v905_v50 = vpop.xlane.xlu1 %904  ;;  %v1888_v57 = vpop.eup %1449  ;;  %v951_v62 = vmul.f32 1.442695, %v934_v54 }
 0x19f   : > { %v469_v49 = vpop.xlane.xlu0 %468  ;;  %979 = vrot.lane.b32.xlu0 %v1876_v47, %s1600_s16  ;;  %527 = vrot.lane.b32.xlu1 %v1878_v48, %s1598_s14  ;;  %v929_v16 = vsub.f32 %v1727_v56, %v905_v50 }
 0x1a0   : > { %v481_v52 = vsub.f32 %v1729_v59, %v469_v49 }
 0x1a1   : > { %v1895_v63 = vpop.eup %1451  ;;  %v941_v43 = vmul.f32 1.442695, %v929_v16 }
 0x1a2   : > { %v499_v46 = vmul.f32 1.442695, %v481_v52  ;;  %v923_v60 = vpop.xlane.xlu1 %922  ;;  %v1902_v9 = vpop.eup %1453 }
 0x1a3   : > { %v603_v58 = vpop.xlane.xlu0 %602  ;;  %818 = vrot.lane.b32.xlu0 %v1888_v57, %s1597_s13  ;;  %667 = vrot.lane.b32.xlu1 %v1886_v55, %s1599_s15  ;;  %v935_v24 = vsub.f32 %v1729_v59, %v923_v60 }
 0x1a4   : > { %1455 = vpow2.f32 %v499_v46  ;;  %v627_v6 = vsub.f32 %v1727_v56, %v603_v58 }
 0x1a5   : > { %1457 = vpow2.f32 %v939_v53  ;;  %v953_v29 = vmul.f32 1.442695, %v935_v24 }
 0x1a6   : > { %v454_v1 = vpop.xlane.xlu1 %453  ;;  %1459 = vpow2.f32 %v951_v62  ;;  %v639_v17 = vmul.f32 1.442695, %v627_v6 }
 0x1a7   : > { %v621_v51 = vpop.xlane.xlu0 %620  ;;  %679 = vrot.lane.b32.xlu1 %v1895_v63, %s1599_s15  ;;  %v476_v25 = vsub.f32 %v1735_v0, %v454_v1 }
 0x1a8   : > { %v633_v4 = vsub.f32 %v1729_v59, %v621_v51 }
 0x1a9   : > { %v489_v30 = vmul.f32 1.442695, %v476_v25 }
 0x1aa   : > { %v651_v7 = vmul.f32 1.442695, %v633_v4  ;;  %v472_v14 = vpop.xlane.xlu1 %471 }
 0x1ab   : > { %v754_v11 = vpop.xlane.xlu0 %753  ;;  %830 = vrot.lane.b32.xlu1 %v1902_v9, %s1597_s13  ;;  %v482_v31 = vsub.f32 %v1740_v3, %v472_v14 }
 0x1ac   : > { %1461 = vpow2.f32 %v651_v7  ;;  %v778_v18 = vsub.f32 %v1727_v56, %v754_v11 }
 0x1ad   : > { %1463 = vpow2.f32 %v487_v5  ;;  %v501_v36 = vmul.f32 1.442695, %v482_v31 }
 0x1ae   : > { %v1908_v40 = vpop.eup %1455  ;;  %v606_v23 = vpop.xlane.xlu1 %605  ;;  %1465 = vpow2.f32 %v802_v15  ;;  %v790_v56 = vmul.f32 1.442695, %v778_v18 }
 0x1af   : > { %v1910_v20 = vpop.eup %1457  ;;  %v757_v22 = vpop.xlane.xlu0 %756  ;;  %529 = vrot.lane.b32.xlu0 %v1908_v40, %s1598_s14  ;;  %1467 = vpow2.f32 %v639_v17  ;;  %v628_v37 = vsub.f32 %v1735_v0, %v606_v23 }
 0x1b0   : > { %969 = vrot.lane.b32.xlu1 %v1910_v20, %s1600_s16  ;;  %v1918_v26 = vpop.eup %1459  ;;  %1469 = vpow2.f32 %v941_v43  ;;  %v779_v58 = vsub.f32 %v1735_v0, %v757_v22 }
 0x1b1   : > { %1471 = vpow2.f32 %v790_v56  ;;  %v641_v49 = vmul.f32 1.442695, %v628_v37 }
 0x1b2   : > { %v624_v59 = vpop.xlane.xlu1 %623  ;;  %1473 = vpow2.f32 %v953_v29  ;;  %v792_v6 = vmul.f32 1.442695, %v779_v58 }
 0x1b3   : > { %v775_v28 = vpop.xlane.xlu0 %774  ;;  %1475 = vpow2.f32 %v489_v30  ;;  %v634_v50 = vsub.f32 %v1740_v3, %v624_v59 }
 0x1b4   : > { %981 = vrot.lane.b32.xlu1 %v1918_v26, %s1600_s16  ;;  %1477 = vpow2.f32 %v501_v36  ;;  %v785_v7 = vsub.f32 %v1740_v3, %v775_v28 }
 0x1b5   : > { %1479 = vpow2.f32 %v641_v49  ;;  %v653_v60 = vmul.f32 1.442695, %v634_v50 }
 0x1b6   : > { %v1923_v32 = vpop.eup %1461  ;;  %v760_v44 = vpop.xlane.xlu1 %759  ;;  %v804_v16 = vmul.f32 1.442695, %v785_v7 }
 0x1b7   : > { %v1925_v34 = vpop.eup %1463  ;;  %v908_v35 = vpop.xlane.xlu0 %907  ;;  %681 = vrot.lane.b32.xlu0 %v1923_v32, %s1599_s15 }
 0x1b8   : > { %517 = vrot.lane.b32.xlu1 %v1925_v34, %s1598_s14  ;;  %v1932_v41 = vpop.eup %1465  ;;  %v930_v17 = vsub.f32 %v1735_v0, %v908_v35  ;;  %v780_v0 = vsub.f32 %v1755_v8, %v760_v44 }
 0x1b9   : > { %v1934_v42 = vpop.eup %1467 }
 0x1ba   : > { %v1941_v52 = vpop.eup %1469  ;;  %v911_v61 = vpop.xlane.xlu1 %910  ;;  %v943_v22 = vmul.f32 1.442695, %v930_v17 }
 0x1bb   : > { %v926_v45 = vpop.xlane.xlu0 %925  ;;  %832 = vrot.lane.b32.xlu0 %v1932_v41, %s1597_s13  ;;  %v1943_v53 = vpop.eup %1471  ;;  %v931_v4 = vsub.f32 %v1755_v8, %v911_v61 }
 0x1bc   : > { %669 = vrot.lane.b32.xlu1 %v1934_v42, %s1599_s15  ;;  %v1951_v62 = vpop.eup %1473  ;;  %v936_v23 = vsub.f32 %v1740_v3, %v926_v45  ;;  %v794_v3 = vmul.f32 1.442695, %v780_v0 }
 0x1bd   : > { %v1953_v1 = vpop.eup %1475  ;;  %v945_v15 = vmul.f32 1.442695, %v931_v4 }
 0x1be   : > { %v1962_v14 = vpop.eup %1477  ;;  %v460_v25 = vpop.xlane.xlu1 %459  ;;  %v955_v56 = vmul.f32 1.442695, %v936_v23 }
 0x1bf   : > { %v457_v54 = vpop.xlane.xlu0 %456  ;;  %971 = vrot.lane.b32.xlu0 %v1941_v52, %s1600_s16  ;;  %v1967_v18 = vpop.eup %1479  ;;  %v478_v30 = vsub.f32 %v1761_v13, %v460_v25 }
 0x1c0   : > { %v477_v46 = vsub.f32 %v1755_v8, %v457_v54  ;;  %820 = vrot.lane.b32.xlu1 %v1943_v53, %s1597_s13 }
 0x1c1   : > { %v493_v36 = vmul.f32 1.442695, %v478_v30 }
 0x1c2   : > { %v491_v51 = vmul.f32 1.442695, %v477_v46  ;;  %v612_v59 = vpop.xlane.xlu1 %611 }
 0x1c3   : > { %v609_v2 = vpop.xlane.xlu0 %608  ;;  %983 = vrot.lane.b32.xlu0 %v1951_v62, %s1600_s16  ;;  %v630_v37 = vsub.f32 %v1761_v13, %v612_v59 }
 0x1c4   : > { %1481 = vpow2.f32 %v491_v51  ;;  %v629_v5 = vsub.f32 %v1755_v8, %v609_v2  ;;  %519 = vrot.lane.b32.xlu1 %v1953_v1, %s1598_s14 }
 0x1c5   : > { %1483 = vpow2.f32 %v653_v60  ;;  %v645_v45 = vmul.f32 1.442695, %v630_v37 }
 0x1c6   : > { %v643_v11 = vmul.f32 1.442695, %v629_v5 }
 0x1c7   : > { %v763_v8 = vpop.xlane.xlu0 %762 }
 0x1c8   : > { %1485 = vpow2.f32 %v643_v11  ;;  %531 = vrot.lane.b32.xlu1 %v1962_v14, %s1598_s14  ;;  %v781_v49 = vsub.f32 %v1761_v13, %v763_v8 }
 0x1c9   : > { %1487 = vpow2.f32 %v792_v6 }
 0x1ca   : > { %1489 = vpow2.f32 %v945_v15  ;;  %v796_v46 = vmul.f32 1.442695, %v781_v49 }
 0x1cb   : > { %1491 = vpow2.f32 %v804_v16  ;;  %v914_v50 = vpop.xlane.xlu0 %913 }
 0x1cc   : > { %671 = vrot.lane.b32.xlu1 %v1967_v18, %s1599_s15  ;;  %1493 = vpow2.f32 %v943_v22  ;;  %v932_v58 = vsub.f32 %v1761_v13, %v914_v50 }
 0x1cd   : > { %1495 = vpow2.f32 %v955_v56 }
 0x1ce   : > { %v1972_v43 = vpop.eup %1481  ;;  %1497 = vpow2.f32 %v794_v3  ;;  %v947_v61 = vmul.f32 1.442695, %v932_v58 }
 0x1cf   : > { %v1974_v24 = vpop.eup %1483  ;;  %521 = vrot.lane.b32.xlu0 %v1972_v43, %s1598_s14  ;;  %1499 = vpow2.f32 %v493_v36 }
 0x1d0   : > { %683 = vrot.lane.b32.xlu1 %v1974_v24, %s1599_s15  ;;  %1501 = vpow2.f32 %v645_v45 }
 0x1d1   : > { %1503 = vpow2.f32 %v796_v46 }
 0x1d2   : > { %v1981_v28 = vpop.eup %1485  ;;  %1505 = vpow2.f32 %v947_v61 }
 0x1d3   : > { %v1983_v29 = vpop.eup %1487  ;;  %673 = vrot.lane.b32.xlu0 %v1981_v28, %s1599_s15 }
 0x1d4   : > { %822 = vrot.lane.b32.xlu1 %v1983_v29, %s1597_s13  ;;  %v1990_v31 = vpop.eup %1489 }
 0x1d5   : > { %v1992_v35 = vpop.eup %1491 }
 0x1d6   : > { %v1999_v44 = vpop.eup %1493 }
 0x1d7   : > { %975 = vrot.lane.b32.xlu0 %v1990_v31, %s1600_s16  ;;  %v2004_v54 = vpop.eup %1495 }
 0x1d8   : > { %834 = vrot.lane.b32.xlu1 %v1992_v35, %s1597_s13  ;;  %v2009_v60 = vpop.eup %1497 }
 0x1d9   : > { %v2013_v51 = vpop.eup %1499 }
 0x1da   : > { %v2017_v2 = vpop.eup %1501 }
 0x1db   : > { %v2021_v4 = vpop.eup %1503 }
 0x1dc   : > { %973 = vrot.lane.b32.xlu1 %v1999_v44, %s1600_s16  ;;  %v2025_v13 = vpop.eup %1505 }
 0x1e0   : > { %985 = vrot.lane.b32.xlu1 %v2004_v54, %s1600_s16 }
 0x1e4   : > { %824 = vrot.lane.b32.xlu1 %v2009_v60, %s1597_s13 }
 0x1e8   : > { %523 = vrot.lane.b32.xlu1 %v2013_v51, %s1598_s14 }
 0x1ec   : > { %675 = vrot.lane.b32.xlu1 %v2017_v2, %s1599_s15 }
 0x1f0   : > { %826 = vrot.lane.b32.xlu1 %v2021_v4, %s1597_s13 }
 0x1f4   : > { %977 = vrot.lane.b32.xlu1 %v2025_v13, %s1600_s16 }
 0x1fc   : > { %v817_v15 = vpop.permute.xlu1 %816 }
 0x1fd   : > { %v514_v5 = vpop.permute.xlu0 %513  ;;  %v846_v56 = vsel %vm543_vm6, %v817_v15, 0.0 }
 0x1fe   : > { %v544_v6 = vsel %vm543_vm6, %v514_v5, 0.0 }
 0x1ff   : > { %545 = vadd.xlane.f32.xlu0 %v544_v6 }
 0x200   : > { %v829_v22 = vpop.permute.xlu1 %828 }
 0x201   : > { %v526_v7 = vpop.permute.xlu0 %525  ;;  %v864_v59 = vsel %vm543_vm6, %v829_v22, 0.0 }
 0x202   : > { %v562_v11 = vsel %vm543_vm6, %v526_v7, 0.0 }
 0x203   : > { %563 = vadd.xlane.f32.xlu0 %v562_v11 }
 0x205   : > { %v666_v16 = vpop.permute.xlu0 %665 }
 0x206   : > { %v695_v17 = vsel %vm543_vm6, %v666_v16, 0.0 }
 0x207   : > { %696 = vadd.xlane.f32.xlu0 %v695_v17 }
 0x209   : > { %v678_v23 = vpop.permute.xlu0 %677 }
 0x20a   : > { %v713_v25 = vsel %vm543_vm6, %v678_v23, 0.0 }
 0x20b   : > { %714 = vadd.xlane.f32.xlu0 %v713_v25 }
 0x20d   : > { %v516_v0 = vpop.permute.xlu1 %515  ;;  %v968_v3 = vpop.permute.xlu0 %967 }
 0x20e   : > { %v997_v37 = vsel %vm543_vm6, %v968_v3, 0.0  ;;  %v547_v45 = vsel %vm543_vm6, %v516_v0, 0.0 }
 0x20f   : > { %847 = vadd.xlane.f32.xlu0 %v846_v56 }
 0x211   : > { %v528_v30 = vpop.permute.xlu1 %527  ;;  %v980_v8 = vpop.permute.xlu0 %979 }
 0x212   : > { %v1015_v50 = vsel %vm543_vm6, %v980_v8, 0.0  ;;  %v565_v46 = vsel %vm543_vm6, %v528_v30, 0.0 }
 0x213   : > { %865 = vadd.xlane.f32.xlu0 %v864_v59 }
 0x215   : > { %v668_v36 = vpop.permute.xlu1 %667  ;;  %v819_v58 = vpop.permute.xlu0 %818 }
 0x216   : > { %v849_v5 = vsel %vm543_vm6, %v819_v58, 0.0  ;;  %v698_v6 = vsel %vm543_vm6, %v668_v36, 0.0 }
 0x217   : > { %998 = vadd.xlane.f32.xlu0 %v997_v37 }
 0x218   : > { %548 = vadd.xlane.f32.xlu1 %v547_v45 }
 0x219   : > { %v680_v49 = vpop.permute.xlu1 %679 }
 0x21a   : > { %v716_v11 = vsel %vm543_vm6, %v680_v49, 0.0 }
 0x21b   : > { %1016 = vadd.xlane.f32.xlu0 %v1015_v50 }
 0x21c   : > { %566 = vadd.xlane.f32.xlu1 %v565_v46 }
 0x21d   : > { %v831_v61 = vpop.permute.xlu1 %830 }
 0x21e   : > { %v867_v15 = vsel %vm543_vm6, %v831_v61, 0.0 }
 0x21f   : > { %699 = vadd.xlane.f32.xlu0 %v698_v6 }
 0x220   : > { %850 = vadd.xlane.f32.xlu1 %v849_v5 }
 0x221   : > { %v530_v0 = vpop.permute.xlu0 %529 }
 0x222   : > { %v970_v7 = vpop.permute.xlu1 %969  ;;  %v568_v3 = vsel %vm543_vm6, %v530_v0, 0.0 }
 0x223   : > { %717 = vadd.xlane.f32.xlu0 %v716_v11  ;;  %v1000_v17 = vsel %vm543_vm6, %v970_v7, 0.0 }
 0x224   : > { %868 = vadd.xlane.f32.xlu1 %v867_v15 }
 0x226   : > { %v982_v16 = vpop.permute.xlu1 %981 }
 0x227   : > { %v1018_v23 = vsel %vm543_vm6, %v982_v16, 0.0 }
 0x228   : > { %1001 = vadd.xlane.f32.xlu1 %v1000_v17 }
 0x229   : > { %v682_v30 = vpop.permute.xlu0 %681 }
 0x22a   : > { %v518_v22 = vpop.permute.xlu1 %517  ;;  %v719_v37 = vsel %vm543_vm6, %v682_v30, 0.0 }
 0x22b   : > { %v550_v25 = vsel %vm543_vm6, %v518_v22, 0.0 }
 0x22c   : > { %1019 = vadd.xlane.f32.xlu1 %v1018_v23  ;;  %551 = vadd.xlane.f32.xlu0 %v550_v25 }
 0x22d   : > { %v833_v45 = vpop.permute.xlu0 %832 }
 0x22e   : > { %v670_v56 = vpop.permute.xlu1 %669  ;;  %v870_v5 = vsel %vm543_vm6, %v833_v45, 0.0 }
 0x22f   : > { %v701_v8 = vsel %vm543_vm6, %v670_v56, 0.0 }
 0x230   : > { %569 = vadd.xlane.f32.xlu0 %v568_v3 }
 0x231   : > { %v972_v58 = vpop.permute.xlu0 %971 }
 0x232   : > { %v821_v59 = vpop.permute.xlu1 %820  ;;  %v1003_v7 = vsel %vm543_vm6, %v972_v58, 0.0 }
 0x233   : > { %v852_v46 = vsel %vm543_vm6, %v821_v59, 0.0 }
 0x234   : > { %702 = vadd.xlane.f32.xlu0 %v701_v8 }
 0x235   : > { %v984_v15 = vpop.permute.xlu0 %983 }
 0x236   : > { %v520_v36 = vpop.permute.xlu1 %519  ;;  %v1021_v17 = vsel %vm543_vm6, %v984_v15, 0.0 }
 0x237   : > { %v553_v0 = vsel %vm543_vm6, %v520_v36, 0.0 }
 0x238   : > { %720 = vadd.xlane.f32.xlu0 %v719_v37 }
 0x23a   : > { %v532_v49 = vpop.permute.xlu1 %531 }
 0x23b   : > { %v571_v50 = vsel %vm543_vm6, %v532_v49, 0.0 }
 0x23c   : > { %853 = vadd.xlane.f32.xlu0 %v852_v46  ;;  %572 = vadd.xlane.f32.xlu1 %v571_v50 }
 0x23e   : > { %v672_v61 = vpop.permute.xlu1 %671 }
 0x23f   : > { %v704_v30 = vsel %vm543_vm6, %v672_v61, 0.0 }
 0x240   : > { %871 = vadd.xlane.f32.xlu0 %v870_v5 }
 0x241   : > { %v522_v56 = vpop.permute.xlu0 %521 }
 0x242   : > { %v684_v6 = vpop.permute.xlu1 %683  ;;  %v556_v37 = vsel %vm543_vm6, %v522_v56, 0.0 }
 0x243   : > { %v722_v11 = vsel %vm543_vm6, %v684_v6, 0.0 }
 0x244   : > { %1004 = vadd.xlane.f32.xlu0 %v1003_v7  ;;  %723 = vadd.xlane.f32.xlu1 %v722_v11 }
 0x245   : > { %v674_v49 = vpop.permute.xlu0 %673 }
 0x246   : > { %v823_v16 = vpop.permute.xlu1 %822  ;;  %v707_v36 = vsel %vm543_vm6, %v674_v49, 0.0 }
 0x247   : > { %v855_v22 = vsel %vm543_vm6, %v823_v16, 0.0 }
 0x248   : > { %1022 = vadd.xlane.f32.xlu0 %v1021_v17  ;;  %856 = vadd.xlane.f32.xlu1 %v855_v22 }
 0x249   : > { %v976_v5 = vpop.permute.xlu0 %975 }
 0x24a   : > { %v835_v23 = vpop.permute.xlu1 %834  ;;  %v1009_v7 = vsel %vm543_vm6, %v976_v5, 0.0 }
 0x24b   : > { %v873_v25 = vsel %vm543_vm6, %v835_v23, 0.0 }
 0x24c   : > { %554 = vadd.xlane.f32.xlu0 %v553_v0  ;;  %874 = vadd.xlane.f32.xlu1 %v873_v25 }
 0x24e   : > { %v974_v3 = vpop.permute.xlu1 %973 }
 0x24f   : > { %v1006_v59 = vsel %vm543_vm6, %v974_v3, 0.0 }
 0x250   : > { %705 = vadd.xlane.f32.xlu0 %v704_v30  ;;  %1007 = vadd.xlane.f32.xlu1 %v1006_v59 }
 0x252   : > { %v986_v8 = vpop.permute.xlu1 %985 }
 0x253   : > { %v1024_v45 = vsel %vm543_vm6, %v986_v8, 0.0 }
 0x254   : > { %557 = vadd.xlane.f32.xlu0 %v556_v37  ;;  %1025 = vadd.xlane.f32.xlu1 %v1024_v45 }
 0x256   : > { %v825_v50 = vpop.permute.xlu1 %824 }
 0x257   : > { %v858_v58 = vsel %vm543_vm6, %v825_v50, 0.0 }
 0x258   : > { %708 = vadd.xlane.f32.xlu0 %v707_v36 }
 0x25a   : > { %v524_v46 = vpop.permute.xlu1 %523 }
 0x25b   : > { %v559_v61 = vsel %vm543_vm6, %v524_v46, 0.0 }
 0x25c   : > { %859 = vadd.xlane.f32.xlu0 %v858_v58  ;;  %560 = vadd.xlane.f32.xlu1 %v559_v61 }
 0x25e   : > { %v676_v6 = vpop.permute.xlu1 %675 }
 0x25f   : > { %v710_v11 = vsel %vm543_vm6, %v676_v6, 0.0 }
 0x260   : > { %1010 = vadd.xlane.f32.xlu0 %v1009_v7  ;;  %711 = vadd.xlane.f32.xlu1 %v710_v11 }
 0x262   : > { %v827_v15 = vpop.permute.xlu1 %826 }
 0x263   : > { %v861_v16 = vsel %vm543_vm6, %v827_v15, 0.0 }
 0x264   : > { %862 = vadd.xlane.f32.xlu1 %v861_v16 }
 0x266   : > { %v978_v17 = vpop.permute.xlu1 %977 }
 0x267   : > { %v1012_v22 = vsel %vm543_vm6, %v978_v17, 0.0 }
 0x268   : > { %1013 = vadd.xlane.f32.xlu1 %v1012_v22 }
 0x28c   : > { %v546_v23 = vpop.xlane.xlu0 %545 }
 0x28d   : > { %1507 = vrcp.f32 %v546_v23 }
 0x290   : > { %v564_v25 = vpop.xlane.xlu0 %563 }
 0x291   : > { %1509 = vrcp.f32 %v564_v25 }
 0x294   : > { %v697_v0 = vpop.xlane.xlu0 %696 }
 0x295   : > { %1511 = vrcp.f32 %v697_v0 }
 0x297   : > { %v1508_v56 = vpop.eup %1507 }
 0x298   : > { %v715_v3 = vpop.xlane.xlu0 %714  ;;  %v584_v30 = vmul.f32 %v1508_v56, %v1838_v12 }
 0x299   : > { %1513 = vrcp.f32 %v715_v3 }
 0x29a   : > { %1057 = vrot.lane.b32.xlu0 %v584_v30, %s1598_s14 }
 0x29b   : > { %v1510_v59 = vpop.eup %1509 }
 0x29c   : > { %v848_v8 = vpop.xlane.xlu0 %847  ;;  %v590_v37 = vmul.f32 %v1510_v59, %v1849_v21 }
 0x29d   : > { %1515 = vrcp.f32 %v848_v8 }
 0x29e   : > { %1069 = vrot.lane.b32.xlu0 %v590_v37, %s1598_s14 }
 0x29f   : > { %v1512_v45 = vpop.eup %1511 }
 0x2a0   : > { %v866_v49 = vpop.xlane.xlu0 %865  ;;  %v735_v50 = vmul.f32 %v1512_v45, %v1857_v27 }
 0x2a1   : > { %1517 = vrcp.f32 %v866_v49 }
 0x2a2   : > { %1097 = vrot.lane.b32.xlu0 %v735_v50, %s1598_s14 }
 0x2a3   : > { %v1514_v36 = vpop.eup %1513 }
 0x2a4   : > { %v999_v46 = vpop.xlane.xlu0 %998  ;;  %v741_v58 = vmul.f32 %v1514_v36, %v1862_v33 }
 0x2a5   : > { %v549_v12 = vpop.xlane.xlu1 %548  ;;  %1519 = vrcp.f32 %v999_v46 }
 0x2a6   : > { %1521 = vrcp.f32 %v549_v12  ;;  %1109 = vrot.lane.b32.xlu0 %v741_v58, %s1598_s14 }
 0x2a7   : > { %v1516_v21 = vpop.eup %1515 }
 0x2a8   : > { %v1017_v61 = vpop.xlane.xlu0 %1016  ;;  %v886_v6 = vmul.f32 %v1516_v21, %v1836_v10 }
 0x2a9   : > { %v567_v5 = vpop.xlane.xlu1 %566  ;;  %1523 = vrcp.f32 %v1017_v61 }
 0x2aa   : > { %1525 = vrcp.f32 %v567_v5  ;;  %1137 = vrot.lane.b32.xlu0 %v886_v6, %s1598_s14 }
 0x2ab   : > { %v1518_v27 = vpop.eup %1517 }
 0x2ac   : > { %v700_v7 = vpop.xlane.xlu0 %699  ;;  %v892_v15 = vmul.f32 %v1518_v27, %v1847_v19 }
 0x2ad   : > { %v851_v11 = vpop.xlane.xlu1 %850  ;;  %1527 = vrcp.f32 %v700_v7 }
 0x2ae   : > { %1149 = vrot.lane.b32.xlu0 %v892_v15, %s1598_s14 }
 0x2af   : > { %v1520_v33 = vpop.eup %1519 }
 0x2b0   : > { %v1522_v16 = vpop.eup %1521  ;;  %v718_v17 = vpop.xlane.xlu0 %717  ;;  %v1037_v22 = vmul.f32 %v1520_v33, %v1867_v38 }
 0x2b1   : > { %1529 = vrcp.f32 %v718_v17  ;;  %v869_v23 = vpop.xlane.xlu1 %868  ;;  %v585_v10 = vmul.f32 %v1522_v16, %v1869_v39 }
 0x2b2   : > { %1177 = vrot.lane.b32.xlu0 %v1037_v22, %s1598_s14  ;;  %1531 = vrcp.f32 %v851_v11 }
 0x2b3   : > { %v1524_v25 = vpop.eup %1523  ;;  %1059 = vrot.lane.b32.xlu1 %v585_v10, %s1598_s14  ;;  %1533 = vrcp.f32 %v869_v23 }
 0x2b4   : > { %v1526_v0 = vpop.eup %1525  ;;  %v1043_v19 = vmul.f32 %v1524_v25, %v1876_v47 }
 0x2b5   : > { %v591_v56 = vmul.f32 %v1526_v0, %v1878_v48  ;;  %v1002_v30 = vpop.xlane.xlu1 %1001 }
 0x2b6   : > { %1189 = vrot.lane.b32.xlu0 %v1043_v19, %s1598_s14  ;;  %1535 = vrcp.f32 %v1002_v30 }
 0x2b7   : > { %v1528_v3 = vpop.eup %1527  ;;  %1071 = vrot.lane.b32.xlu1 %v591_v56, %s1598_s14 }
 0x2b8   : > { %v736_v39 = vmul.f32 %v1528_v3, %v1886_v55 }
 0x2b9   : > { %v552_v38 = vpop.xlane.xlu0 %551  ;;  %v1020_v47 = vpop.xlane.xlu1 %1019 }
 0x2bb   : > { %v1530_v59 = vpop.eup %1529  ;;  %1099 = vrot.lane.b32.xlu1 %v736_v39, %s1598_s14 }
 0x2bc   : > { %v742_v37 = vmul.f32 %v1530_v59, %v1895_v63  ;;  %v1532_v48 = vpop.eup %1531 }
 0x2bd   : > { %v570_v8 = vpop.xlane.xlu0 %569  ;;  %v887_v49 = vmul.f32 %v1532_v48, %v1888_v57  ;;  %v1534_v50 = vpop.eup %1533 }
 0x2be   : > { %1537 = vrcp.f32 %v570_v8  ;;  %v893_v36 = vmul.f32 %v1534_v50, %v1902_v9 }
 0x2bf   : > { %1111 = vrot.lane.b32.xlu1 %v742_v37, %s1598_s14  ;;  %1539 = vrcp.f32 %v1020_v47 }
 0x2c0   : > { %v1536_v46 = vpop.eup %1535 }
 0x2c1   : > { %v703_v45 = vpop.xlane.xlu0 %702  ;;  %v1038_v21 = vmul.f32 %v1536_v46, %v1910_v20 }
 0x2c2   : > { %1541 = vrcp.f32 %v703_v45 }
 0x2c3   : > { %1139 = vrot.lane.b32.xlu1 %v887_v49, %s1598_s14  ;;  %1543 = vrcp.f32 %v552_v38 }
 0x2c5   : > { %v721_v55 = vpop.xlane.xlu0 %720 }
 0x2c6   : > { %1545 = vrcp.f32 %v721_v55 }
 0x2c7   : > { %1151 = vrot.lane.b32.xlu1 %v893_v36, %s1598_s14 }
 0x2c8   : > { %v1538_v63 = vpop.eup %1537 }
 0x2c9   : > { %v854_v12 = vpop.xlane.xlu0 %853  ;;  %v592_v58 = vmul.f32 %v1538_v63, %v1908_v40  ;;  %v1540_v61 = vpop.eup %1539 }
 0x2ca   : > { %1547 = vrcp.f32 %v854_v12  ;;  %v573_v5 = vpop.xlane.xlu1 %572  ;;  %v1044_v27 = vmul.f32 %v1540_v61, %v1918_v26 }
 0x2cb   : > { %1073 = vrot.lane.b32.xlu0 %v592_v58, %s1598_s14  ;;  %1179 = vrot.lane.b32.xlu1 %v1038_v21, %s1598_s14 }
 0x2cc   : > { %v1542_v57 = vpop.eup %1541 }
 0x2cd   : > { %v872_v6 = vpop.xlane.xlu0 %871  ;;  %v737_v9 = vmul.f32 %v1542_v57, %v1934_v42  ;;  %v1544_v7 = vpop.eup %1543 }
 0x2ce   : > { %1549 = vrcp.f32 %v872_v6  ;;  %v586_v33 = vmul.f32 %v1544_v7, %v1925_v34 }
 0x2cf   : > { %1101 = vrot.lane.b32.xlu0 %v737_v9, %s1598_s14  ;;  %1191 = vrot.lane.b32.xlu1 %v1044_v27, %s1598_s14 }
 0x2d0   : > { %v1546_v40 = vpop.eup %1545 }
 0x2d1   : > { %v1005_v20 = vpop.xlane.xlu0 %1004  ;;  %v724_v11 = vpop.xlane.xlu1 %723  ;;  %v743_v15 = vmul.f32 %v1546_v40, %v1923_v32 }
 0x2d2   : > { %1551 = vrcp.f32 %v1005_v20 }
 0x2d3   : > { %1113 = vrot.lane.b32.xlu0 %v743_v15, %s1598_s14  ;;  %1061 = vrot.lane.b32.xlu1 %v586_v33, %s1598_s14 }
 0x2d4   : > { %v1548_v16 = vpop.eup %1547 }
 0x2d5   : > { %v1023_v42 = vpop.xlane.xlu0 %1022  ;;  %v857_v26 = vpop.xlane.xlu1 %856  ;;  %v888_v17 = vmul.f32 %v1548_v16, %v1943_v53 }
 0x2d7   : > { %1141 = vrot.lane.b32.xlu0 %v888_v17, %s1598_s14 }
 0x2d8   : > { %v1550_v22 = vpop.eup %1549 }
 0x2d9   : > { %v555_v23 = vpop.xlane.xlu0 %554  ;;  %v894_v10 = vmul.f32 %v1550_v22, %v1932_v41  ;;  %v875_v32 = vpop.xlane.xlu1 %874 }
 0x2da   : > { %1553 = vrcp.f32 %v555_v23 }
 0x2db   : > { %1153 = vrot.lane.b32.xlu0 %v894_v10, %s1598_s14  ;;  %1555 = vrcp.f32 %v573_v5 }
 0x2dc   : > { %v1552_v34 = vpop.eup %1551 }
 0x2dd   : > { %v706_v25 = vpop.xlane.xlu0 %705  ;;  %v1039_v0 = vmul.f32 %v1552_v34, %v1941_v52  ;;  %v1008_v19 = vpop.xlane.xlu1 %1007 }
 0x2de   : > { %1557 = vrcp.f32 %v706_v25 }
 0x2df   : > { %1181 = vrot.lane.b32.xlu0 %v1039_v0, %s1598_s14 }
 0x2e1   : > { %v558_v53 = vpop.xlane.xlu0 %557  ;;  %v1026_v38 = vpop.xlane.xlu1 %1025 }
 0x2e2   : > { %1559 = vrcp.f32 %v558_v53 }
 0x2e3   : > { %1561 = vrcp.f32 %v724_v11 }
 0x2e4   : > { %v1554_v56 = vpop.eup %1553 }
 0x2e5   : > { %v709_v3 = vpop.xlane.xlu0 %708  ;;  %v587_v41 = vmul.f32 %v1554_v56, %v1953_v1  ;;  %v1556_v30 = vpop.eup %1555 }
 0x2e6   : > { %1563 = vrcp.f32 %v709_v3  ;;  %v593_v52 = vmul.f32 %v1556_v30, %v1962_v14 }
 0x2e7   : > { %1063 = vrot.lane.b32.xlu1 %v587_v41, %s1598_s14  ;;  %1565 = vrcp.f32 %v857_v26 }
 0x2e8   : > { %v1558_v59 = vpop.eup %1557 }
 0x2e9   : > { %v860_v39 = vpop.xlane.xlu0 %859  ;;  %v561_v8 = vpop.xlane.xlu1 %560  ;;  %v738_v1 = vmul.f32 %v1558_v59, %v1967_v18 }
 0x2ea   : > { %1567 = vrcp.f32 %v860_v39 }
 0x2eb   : > { %1075 = vrot.lane.b32.xlu1 %v593_v52, %s1598_s14  ;;  %1569 = vrcp.f32 %v875_v32 }
 0x2ec   : > { %v1560_v37 = vpop.eup %1559 }
 0x2ed   : > { %v1011_v47 = vpop.xlane.xlu0 %1010  ;;  %v588_v48 = vmul.f32 %v1560_v37, %v1972_v43  ;;  %v1562_v45 = vpop.eup %1561 }
 0x2ee   : > { %1571 = vrcp.f32 %v1011_v47  ;;  %v712_v49 = vpop.xlane.xlu1 %711  ;;  %v744_v55 = vmul.f32 %v1562_v45, %v1974_v24 }
 0x2ef   : > { %1573 = vrcp.f32 %v1023_v42  ;;  %1065 = vrot.lane.b32.xlu0 %v588_v48, %s1598_s14  ;;  %1103 = vrot.lane.b32.xlu1 %v738_v1, %s1598_s14 }
 0x2f0   : > { %v1564_v14 = vpop.eup %1563  ;;  %1575 = vrcp.f32 %v1008_v19 }
 0x2f1   : > { %v739_v50 = vmul.f32 %v1564_v14, %v1981_v28  ;;  %v1566_v36 = vpop.eup %1565  ;;  %1577 = vrcp.f32 %v561_v8 }
 0x2f2   : > { %v889_v46 = vmul.f32 %v1566_v36, %v1983_v29  ;;  %v863_v12 = vpop.xlane.xlu1 %862  ;;  %1579 = vrcp.f32 %v712_v49 }
 0x2f3   : > { %1105 = vrot.lane.b32.xlu0 %v739_v50, %s1598_s14  ;;  %1115 = vrot.lane.b32.xlu1 %v744_v55, %s1598_s14  ;;  %1581 = vrcp.f32 %v863_v12 }
 0x2f4   : > { %v1568_v18 = vpop.eup %1567 }
 0x2f5   : > { %v890_v43 = vmul.f32 %v1568_v18, %v2009_v60  ;;  %v1570_v63 = vpop.eup %1569 }
 0x2f6   : > { %v895_v21 = vmul.f32 %v1570_v63, %v1992_v35  ;;  %v1014_v29 = vpop.xlane.xlu1 %1013 }
 0x2f7   : > { %1145 = vrot.lane.b32.xlu0 %v890_v43, %s1598_s14  ;;  %1143 = vrot.lane.b32.xlu1 %v889_v46, %s1598_s14  ;;  %1583 = vrcp.f32 %v1014_v29 }
 0x2f8   : > { %v1572_v28 = vpop.eup %1571  ;;  %1585 = vrcp.f32 %v1026_v38 }
 0x2f9   : > { %v1574_v24 = vpop.eup %1573  ;;  %v1041_v58 = vmul.f32 %v1572_v28, %v1990_v31 }
 0x2fa   : > { %v1576_v61 = vpop.eup %1575  ;;  %v1045_v60 = vmul.f32 %v1574_v24, %v1951_v62 }
 0x2fb   : > { %1185 = vrot.lane.b32.xlu0 %v1041_v58, %s1598_s14  ;;  %1155 = vrot.lane.b32.xlu1 %v895_v21, %s1598_s14  ;;  %v1040_v57 = vmul.f32 %v1576_v61, %v1999_v44  ;;  %v1578_v5 = vpop.eup %1577 }
 0x2fc   : > { %v589_v31 = vmul.f32 %v1578_v5, %v2013_v51  ;;  %v1580_v35 = vpop.eup %1579 }
 0x2fd   : > { %v740_v6 = vmul.f32 %v1580_v35, %v2017_v2  ;;  %v1582_v9 = vpop.eup %1581 }
 0x2fe   : > { %v891_v62 = vmul.f32 %v1582_v9, %v2021_v4 }
 0x2ff   : > { %1193 = vrot.lane.b32.xlu0 %v1045_v60, %s1598_s14  ;;  %1183 = vrot.lane.b32.xlu1 %v1040_v57, %s1598_s14 }
 0x301   : > { %v1584_v44 = vpop.eup %1583 }
 0x302   : > { %v1042_v7 = vmul.f32 %v1584_v44, %v2025_v13  ;;  %v1586_v40 = vpop.eup %1585 }
 0x303   : > { %1067 = vrot.lane.b32.xlu1 %v589_v31, %s1598_s14  ;;  %v1046_v20 = vmul.f32 %v1586_v40, %v2004_v54 }
 0x307   : > { %1107 = vrot.lane.b32.xlu1 %v740_v6, %s1598_s14 }
 0x30b   : > { %1147 = vrot.lane.b32.xlu1 %v891_v62, %s1598_s14 }
 0x30c   : > { %v1058_v27 = vpop.permute.xlu0 %1057 }
 0x30f   : > { %1187 = vrot.lane.b32.xlu1 %v1042_v7, %s1598_s14 }
 0x310   : > { %v1070_v51 = vpop.permute.xlu0 %1069 }
 0x313   : > { %1195 = vrot.lane.b32.xlu1 %v1046_v20, %s1598_s14 }
 0x314   : > { %v1098_v2 = vpop.permute.xlu0 %1097 }
 0x315   : > { %v1207_v4 = vsel %vm543_vm6, %v1058_v27, %v1098_v2 }
 0x318   : > { %v1110_v11 = vpop.permute.xlu0 %1109 }
 0x319   : > { %v1213_v26 = vsel %vm543_vm6, %v1070_v51, %v1110_v11 }
 0x31c   : > { %v1138_v15 = vpop.permute.xlu0 %1137 }
 0x31d   : > { %v1218_v54 = vsel %vm1217_vm7, %v1207_v4, %v1138_v15 }
 0x320   : > { %v1150_v33 = vpop.permute.xlu0 %1149 }
 0x321   : > { %v1224_v17 = vsel %vm1217_vm7, %v1213_v26, %v1150_v33 }
 0x324   : > { %v1178_v13 = vpop.permute.xlu0 %1177 }
 0x325   : > { %v1229_v16 = vsel %vm1228_vm8, %v1218_v54, %v1178_v13  ;;  %v1060_v42 = vpop.permute.xlu1 %1059 }
 0x326   : > { %1240 = vst.msk [vmem:[%s2155_s20] sm:$0xff] %vm1239_vm9, %v1229_v16 }
 0x328   : > { %v1190_v22 = vpop.permute.xlu0 %1189 }
 0x329   : > { %v1235_v23 = vsel %vm1228_vm8, %v1224_v17, %v1190_v22  ;;  %v1072_v10 = vpop.permute.xlu1 %1071 }
 0x32a   : > { %1246 = vst.msk [vmem:[%s2155_s20 + $0x30] sm:$0xff] %vm1239_vm9, %v1235_v23 }
 0x32d   : > { %v1100_v32 = vpop.permute.xlu1 %1099 }
 0x32e   : > { %v1208_v19 = vsel %vm543_vm6, %v1060_v42, %v1100_v32 }
 0x331   : > { %v1112_v34 = vpop.permute.xlu1 %1111 }
 0x332   : > { %v1214_v30 = vsel %vm543_vm6, %v1072_v10, %v1112_v34 }
 0x335   : > { %v1140_v25 = vpop.permute.xlu1 %1139 }
 0x336   : > { %v1219_v56 = vsel %vm1217_vm7, %v1208_v19, %v1140_v25 }
 0x339   : > { %v1152_v0 = vpop.permute.xlu1 %1151 }
 0x33a   : > { %v1225_v39 = vsel %vm1217_vm7, %v1214_v30, %v1152_v0 }
 0x33d   : > { %v1074_v53 = vpop.permute.xlu0 %1073  ;;  %v1180_v3 = vpop.permute.xlu1 %1179 }
 0x33e   : > { %v1230_v41 = vsel %vm1228_vm8, %v1219_v56, %v1180_v3 }
 0x33f   : > { %1241 = vst.msk [vmem:[%s2155_s20 + $0x8] sm:$0xff] %vm1239_vm9, %v1230_v41 }
 0x341   : > { %v1102_v38 = vpop.permute.xlu0 %1101  ;;  %v1192_v52 = vpop.permute.xlu1 %1191 }
 0x342   : > { %v1236_v59 = vsel %vm1228_vm8, %v1225_v39, %v1192_v52 }
 0x343   : > { %1247 = vst.msk [vmem:[%s2155_s20 + $0x38] sm:$0xff] %vm1239_vm9, %v1236_v59 }
 0x345   : > { %v1114_v8 = vpop.permute.xlu0 %1113  ;;  %v1062_v47 = vpop.permute.xlu1 %1061 }
 0x346   : > { %v1209_v1 = vsel %vm543_vm6, %v1062_v47, %v1102_v38  ;;  %v1215_v29 = vsel %vm543_vm6, %v1074_v53, %v1114_v8 }
 0x349   : > { %v1142_v37 = vpop.permute.xlu0 %1141 }
 0x34a   : > { %v1220_v45 = vsel %vm1217_vm7, %v1209_v1, %v1142_v37 }
 0x34d   : > { %v1154_v48 = vpop.permute.xlu0 %1153 }
 0x34e   : > { %v1226_v57 = vsel %vm1217_vm7, %v1215_v29, %v1154_v48 }
 0x351   : > { %v1182_v14 = vpop.permute.xlu0 %1181 }
 0x352   : > { %v1231_v49 = vsel %vm1228_vm8, %v1220_v45, %v1182_v14 }
 0x353   : > { %1242 = vst.msk [vmem:[%s2155_s20 + $0x10] sm:$0xff] %vm1239_vm9, %v1231_v49 }
 0x359   : > { %v1064_v50 = vpop.permute.xlu1 %1063 }
 0x35d   : > { %v1076_v55 = vpop.permute.xlu1 %1075 }
 0x361   : > { %v1066_v36 = vpop.permute.xlu0 %1065  ;;  %v1104_v18 = vpop.permute.xlu1 %1103 }
 0x362   : > { %v1210_v60 = vsel %vm543_vm6, %v1064_v50, %v1104_v18 }
 0x365   : > { %v1106_v43 = vpop.permute.xlu0 %1105  ;;  %v1116_v46 = vpop.permute.xlu1 %1115 }
 0x366   : > { %v1211_v28 = vsel %vm543_vm6, %v1066_v36, %v1106_v43  ;;  %v1216_v2 = vsel %vm543_vm6, %v1076_v55, %v1116_v46 }
 0x369   : > { %v1146_v63 = vpop.permute.xlu0 %1145  ;;  %v1144_v12 = vpop.permute.xlu1 %1143 }
 0x36a   : > { %v1222_v24 = vsel %vm1217_vm7, %v1211_v28, %v1146_v63  ;;  %v1221_v5 = vsel %vm1217_vm7, %v1210_v60, %v1144_v12 }
 0x36d   : > { %v1186_v58 = vpop.permute.xlu0 %1185  ;;  %v1156_v21 = vpop.permute.xlu1 %1155 }
 0x36e   : > { %v1233_v61 = vsel %vm1228_vm8, %v1222_v24, %v1186_v58  ;;  %v1227_v11 = vsel %vm1217_vm7, %v1216_v2, %v1156_v21 }
 0x36f   : > { %1244 = vst.msk [vmem:[%s2155_s20 + $0x20] sm:$0xff] %vm1239_vm9, %v1233_v61 }
 0x371   : > { %v1194_v31 = vpop.permute.xlu0 %1193  ;;  %v1184_v35 = vpop.permute.xlu1 %1183 }
 0x372   : > { %v1237_v6 = vsel %vm1228_vm8, %v1226_v57, %v1194_v31  ;;  %v1232_v9 = vsel %vm1228_vm8, %v1221_v5, %v1184_v35 }
 0x373   : > { %1248 = vst.msk [vmem:[%s2155_s20 + $0x40] sm:$0xff] %vm1239_vm9, %v1237_v6  ;;  %1243 = vst.msk [vmem:[%s2155_s20 + $0x18] sm:$0xff] %vm1239_vm9, %v1232_v9 }
 0x375   : > { %v1068_v62 = vpop.permute.xlu1 %1067 }
 0x379   : > { %v1108_v44 = vpop.permute.xlu1 %1107 }
 0x37a   : > { %v1212_v7 = vsel %vm543_vm6, %v1068_v62, %v1108_v44 }
 0x37d   : > { %v1148_v27 = vpop.permute.xlu1 %1147 }
 0x37e   : > { %v1223_v40 = vsel %vm1217_vm7, %v1212_v7, %v1148_v27 }
 0x381   : > { %v1188_v51 = vpop.permute.xlu1 %1187 }
 0x382   : > { %v1234_v20 = vsel %vm1228_vm8, %v1223_v40, %v1188_v51 }
 0x383   : > { %1245 = vst.msk [vmem:[%s2155_s20 + $0x28] sm:$0xff] %vm1239_vm9, %v1234_v20 }
 0x385   : > { %v1196_v15 = vpop.permute.xlu1 %1195 }
 0x386   : > { %v1238_v33 = vsel %vm1228_vm8, %v1227_v11, %v1196_v15 }
 0x387   : > { %1249 = vst.msk [vmem:[%s2155_s20 + $0x48] sm:$0xff] %vm1239_vm9, %v1238_v33 }
 0x388 PF: > { %s16_s18 = sadd.s32 1, %s1593_s18  }
 0x389   : > { %p13_p4 = scmp.ge.s32.totalorder %s16_s18, 4  }
 0x38b   :  { %15 = sbr.rel (!%p13_p4) target bundleno = 1 (0x1), region = 81 }

// kernel: deformable_transformer_forward.25
= control target key start
LH: loop header
LB: loop body
LE: loop exit
PB: predicated region body
PF: predicated region fallthrough
CT: control target
= control target key end

     0   :  { %s925_s21 = smov 0   ;;  %s1110_s0 = inlined_call_operand.vmem [shape: bf16[160,32], index: 0, kind: input, shape index: {}]   ;;  %s1111_s1 = inlined_call_operand.vmem [shape: bf16[160,32], index: 1, kind: input, shape index: {}]   ;;  %s1112_s2 = inlined_call_operand.vmem [shape: bf16[32,32], index: 2, kind: input, shape index: {}]   ;;  %s1113_s3 = inlined_call_operand.vmem [shape: f32[1,32], index: 3, kind: input, shape index: {}]   ;;  %s1114_s4 = inlined_call_operand.vmem [shape: f32[1,32], index: 4, kind: input, shape index: {}]   ;;  %s1115_s5 = inlined_call_operand.vmem [shape: f32[1,32], index: 5, kind: input, shape index: {}]   ;;  %s1116_s6 = inlined_call_operand.vmem [shape: bf16[160,32], index: 6, kind: output, shape index: {}]  }
   0x1 LB: > { %s739_s22 = sadd.s32 4294967295, %s886_s21   ;;  %p743_p0 = scmp.ge.s32.totalorder %s886_s21, 1  ;;  %s886_s21 = sphi %s925_s21, %s16_s21  }
   0x2   : > { %p224_p1 = scmp.lt.s32.totalorder %s886_s21, 3 }
   0x4   : > { %p225_p2 = pnand %p743_p0, %p224_p1 }
   0x5   : > { %v853_v0 = vld [vmem:[%s1112_s2] sm:$0xff] (!%p225_p2)   ;;  %v888_v1 = vmov (!%p225_p2), 0.0   ;;  %v854_v2 = vld [vmem:[%s1112_s2 + $0x8] sm:$0xff] (!%p225_p2)   ;;  %s259_s27 = smul.u32 (!%p225_p2), 10, %s739_s22  ;;  %vm889_vm0 = vmmov (!%p225_p2), 0   ;;  %vm336_vm1 = vcmask (!%p225_p2), 261120  }
   0x6   : > { %228 = sbr.rel (%p225_p2) target bundleno = 573 (0x23d), region = 44  ;;  %815 = vmatprep.subr.bf16.mxu0 (!%p225_p2), %v888_v1  ;;  %839 = vmatprep.subr.bf16.mxu1 (!%p225_p2), %v888_v1  ;;  %v747_v9 = vld [vmem:[%s1113_s3] ss:$0 sm:$0xff] (!%p225_p2)  ;;  %vm660_vm2 = vcmask (!%p225_p2), 257024  }
   0x7   : > { %816 = vmatpush3.bf16.msra.mxu0 (!%p225_p2), %v853_v0  ;;  %841 = vmatpush3.bf16.msra.mxu1 (!%p225_p2), %v853_v0  ;;  %p260_p3 = scmp.lt.s32.totalorder (!%p225_p2), %s259_s27, 19 }
   0x8   : > { %817 = vmatprep.subr.bf16.mxu0 (!%p225_p2), %v888_v1  ;;  %840 = vmatprep.subr.bf16.mxu1 (!%p225_p2), %v888_v1 }
   0x9   : > { %819 = vmatprep.mubr.msk.bf16.mxu0 (!%p225_p2), %vm889_vm0, %v888_v1  ;;  %831 = vmatprep.mubr.msk.bf16.mxu1 (!%p225_p2), %vm889_vm0, %v888_v1 }
   0xb   : > { %818 = vmatpush3.bf16.msra.mxu0 (!%p225_p2), %v854_v2  ;;  %842 = vmatpush3.bf16.msra.mxu1 (!%p225_p2), %v854_v2 }
   0xd   : > { %s1118_s27 = smov (!%p260_p3, %s259_s27), 19 }
   0xe   : > { %s941_s28 = sshll.u32 %s1118_s27, 2 }
   0xf   : > { %s263_s7 = scalar_lea.vmem %s1110_s0, %s941_s28  ;;  %s959_s10 = scalar_lea.vmem %s1111_s1, %s941_s28 }
  0x10   : > { %v855_v3 = vld [vmem:[%s263_s7] sm:$0xff]   ;;  %v856_v4 = vld [vmem:[%s263_s7 + $0x18] sm:$0xff]   ;;  %v857_v5 = vld [vmem:[%s263_s7 + $0x8] sm:$0xff]   ;;  %s1059_s19 = scalar_lea.vmem %s1116_s6, %s941_s28 }
  0x11   : > { %820 = vmatmul.mubr.msk.bf16.vlgmr.msra.gmra.mrb[0].mxu0 %vm336_vm1, %v855_v3  ;;  %832 = vmatmul.mubr.msk.bf16.vlgmr.msra.gmra.mrb[0].mxu1 %vm336_vm1, %v856_v4  ;;  %v859_v6 = vld [vmem:[%s263_s7 + $0x20] sm:$0xff]   ;;  %v858_v7 = vld [vmem:[%s263_s7 + $0x10] sm:$0xff]   ;;  %v806_v11 = vld [vmem:[%s959_s10 + $0x18] sm:$0xff]  }
  0x12   : > { %823 = vmatprep.mubr.msk.bf16.mxu0 %vm889_vm0, %v888_v1  ;;  %835 = vmatprep.mubr.msk.bf16.mxu1 %vm889_vm0, %v888_v1  ;;  %v785_v8 = vld [vmem:[%s959_s10] sm:$0xff]   ;;  %v798_v13 = vunpack.c.l.bf16 %v806_v11  ;;  %v799_v20 = vunpack.c.h.bf16 %v806_v11  ;;  %v804_v27 = vld [vmem:[%s959_s10 + $0x8] sm:$0xff]   ;;  %v805_v48 = vld [vmem:[%s959_s10 + $0x10] sm:$0xff]  }
  0x13   : > { %v786_v10 = vunpack.c.l.bf16 %v785_v8  ;;  %v787_v30 = vunpack.c.h.bf16 %v785_v8  ;;  %v790_v33 = vunpack.c.l.bf16 %v804_v27  ;;  %v791_v39 = vunpack.c.h.bf16 %v804_v27  ;;  %v807_v49 = vld [vmem:[%s959_s10 + $0x20] sm:$0xff]  }
  0x14   : > { %v794_v54 = vunpack.c.l.bf16 %v805_v48  ;;  %v802_v55 = vunpack.c.l.bf16 %v807_v49  ;;  %v795_v57 = vunpack.c.h.bf16 %v805_v48  ;;  %v803_v62 = vunpack.c.h.bf16 %v807_v49 }
  0x19   : > { %824 = vmatmul.mubr.msk.bf16.gmra.mrb[4].mxu0 %vm336_vm1, %v857_v5  ;;  %836 = vmatmul.mubr.msk.bf16.gmra.mrb[4].mxu1 %vm336_vm1, %v859_v6 }
  0x1a   : > { %827 = vmatprep.mubr.msk.bf16.mxu0 %vm889_vm0, %v888_v1 }
  0x21   : > { %828 = vmatmul.mubr.msk.bf16.gmra.mrb[8].mxu0 %vm336_vm1, %v858_v7 }
  0xe4   : > { %v386_v12 = vpop.f32.mrb[0].mxu0  ;;  %v410_v15 = vpop.f32.mrb[0].mxu1 }
  0xe5   : > { %v387_v14 = vadd.f32 %v747_v9, %v386_v12  ;;  %v821_v16 = vpop.f32.mrb[1].mxu0  ;;  %v411_v17 = vadd.f32 %v747_v9, %v410_v15  ;;  %v833_v18 = vpop.f32.mrb[1].mxu1 }
  0xe6   : > { %v389_v19 = vpop.f32.mrb[2].mxu0  ;;  %v413_v21 = vpop.f32.mrb[2].mxu1 }
  0xe7   : > { %v822_v22 = vpop.f32.mrb[3].mxu0  ;;  %v966_v23 = vadd.f32 %v786_v10, %v387_v14  ;;  %v414_v24 = vadd.f32 %v747_v9, %v413_v21  ;;  %v834_v25 = vpop.f32.mrb[3].mxu1  ;;  %v968_v26 = vadd.f32 %v798_v13, %v411_v17  ;;  %v390_v28 = vadd.f32 %v747_v9, %v389_v19 }
  0xe9   : > { %v455_v29 = vsel %vm336_vm1, %v966_v23, 0.0  ;;  %v973_v31 = vadd.f32 %v799_v20, %v414_v24  ;;  %v473_v32 = vsel %vm336_vm1, %v968_v26, 0.0  ;;  %v446_v38 = vadd.f32 %v787_v30, %v390_v28 }
  0xea   : > { %456 = vadd.xlane.f32.xlu0 %v455_v29 }
  0xeb   : > { %v476_v34 = vsel %vm336_vm1, %v973_v31, 0.0  ;;  %v458_v50 = vsel %vm336_vm1, %v446_v38, 0.0 }
  0xec   : > { %v394_v35 = vpop.f32.mrb[4].mxu0  ;;  %477 = vadd.xlane.f32.xlu1 %v476_v34  ;;  %v418_v40 = vpop.f32.mrb[4].mxu1 }
  0xed   : > { %v395_v36 = vadd.f32 %v747_v9, %v394_v35  ;;  %v825_v37 = vpop.f32.mrb[5].mxu0  ;;  %v837_v42 = vpop.f32.mrb[5].mxu1  ;;  %v419_v53 = vadd.f32 %v747_v9, %v418_v40 }
  0xee   : > { %474 = vadd.xlane.f32.xlu0 %v473_v32  ;;  %v397_v41 = vpop.f32.mrb[6].mxu0  ;;  %v421_v46 = vpop.f32.mrb[6].mxu1 }
  0xef   : > { %v398_v43 = vadd.f32 %v747_v9, %v397_v41  ;;  %v826_v44 = vpop.f32.mrb[7].mxu0  ;;  %v447_v45 = vadd.f32 %v790_v33, %v395_v36  ;;  %v838_v47 = vpop.f32.mrb[7].mxu1  ;;  %v422_v61 = vadd.f32 %v747_v9, %v421_v46  ;;  %v453_v3 = vadd.f32 %v802_v55, %v419_v53 }
  0xf1   : > { %v461_v51 = vsel %vm336_vm1, %v447_v45, 0.0  ;;  %v448_v52 = vadd.f32 %v791_v39, %v398_v43  ;;  %v454_v6 = vadd.f32 %v803_v62, %v422_v61  ;;  %v479_v8 = vsel %vm336_vm1, %v453_v3, 0.0 }
  0xf2   : > { %459 = vadd.xlane.f32.xlu0 %v458_v50  ;;  %462 = vadd.xlane.f32.xlu1 %v461_v51 }
  0xf3   : > { %v464_v60 = vsel %vm336_vm1, %v448_v52, 0.0  ;;  %v482_v10 = vsel %vm336_vm1, %v454_v6, 0.0 }
  0xf4   : > { %v402_v56 = vpop.f32.mrb[8].mxu0 }
  0xf5   : > { %v403_v58 = vadd.f32 %v747_v9, %v402_v56  ;;  %v829_v59 = vpop.f32.mrb[9].mxu0 }
  0xf6   : > { %465 = vadd.xlane.f32.xlu1 %v464_v60  ;;  %v405_v63 = vpop.f32.mrb[10].mxu0 }
  0xf7   : > { %v406_v0 = vadd.f32 %v747_v9, %v405_v63  ;;  %v830_v1 = vpop.f32.mrb[11].mxu0  ;;  %v449_v2 = vadd.f32 %v794_v54, %v403_v58 }
  0xf9   : > { %v467_v4 = vsel %vm336_vm1, %v449_v2, 0.0  ;;  %v450_v5 = vadd.f32 %v795_v57, %v406_v0 }
  0xfa   : > { %468 = vadd.xlane.f32.xlu0 %v467_v4 }
  0xfb   : > { %v470_v7 = vsel %vm336_vm1, %v450_v5, 0.0 }
  0xfc   : > { %471 = vadd.xlane.f32.xlu1 %v470_v7 }
  0xfe   : > { %480 = vadd.xlane.f32.xlu0 %v479_v8 }
 0x100   : > { %483 = vadd.xlane.f32.xlu1 %v482_v10 }
 0x177   : > { %v457_v11 = vpop.xlane.xlu0 %456 }
 0x178   : > { %v486_v12 = vmul.f32 0.03125, %v457_v11 }
 0x179   : > { %v478_v13 = vpop.xlane.xlu1 %477 }
 0x17a   : > { %v989_v9 = vsub.f32 %v966_v23, %v486_v12  ;;  %v493_v17 = vmul.f32 0.03125, %v478_v13  ;;  %v1044_v12 = vld [vmem:[%s1114_s4] ss:$0 sm:$0xff] }
 0x17b   : > { %v475_v14 = vpop.xlane.xlu0 %474 }
 0x17c   : > { %v492_v15 = vmul.f32 0.03125, %v475_v14  ;;  %v506_v16 = vmul.f32 %v989_v9, %v989_v9  ;;  %v1000_v25 = vsub.f32 %v973_v31, %v493_v17  ;;  %v1050_v17 = vld [vmem:[%s1115_s5] ss:$0 sm:$0xff] }
 0x17e   : > { %v994_v18 = vsub.f32 %v968_v26, %v492_v15  ;;  %v516_v19 = vsel %vm336_vm1, %v506_v16, 0.0  ;;  %v513_v36 = vmul.f32 %v1000_v25, %v1000_v25 }
 0x17f   : > { %v460_v20 = vpop.xlane.xlu0 %459  ;;  %v463_v21 = vpop.xlane.xlu1 %462  ;;  %517 = vadd.xlane.f32.xlu0 %v516_v19 }
 0x180   : > { %v487_v22 = vmul.f32 0.03125, %v460_v20  ;;  %v488_v24 = vmul.f32 0.03125, %v463_v21  ;;  %v512_v23 = vmul.f32 %v994_v18, %v994_v18  ;;  %v537_v43 = vsel %vm336_vm1, %v513_v36, 0.0 }
 0x182   : > { %v1002_v27 = vsub.f32 %v446_v38, %v487_v22  ;;  %v1004_v28 = vsub.f32 %v447_v45, %v488_v24  ;;  %v534_v26 = vsel %vm336_vm1, %v512_v23, 0.0 }
 0x183   : > { %v466_v29 = vpop.xlane.xlu1 %465  ;;  %535 = vadd.xlane.f32.xlu0 %v534_v26 }
 0x184   : > { %v489_v30 = vmul.f32 0.03125, %v466_v29  ;;  %v508_v32 = vmul.f32 %v1004_v28, %v1004_v28  ;;  %v507_v33 = vmul.f32 %v1002_v27, %v1002_v27 }
 0x186   : > { %v1011_v34 = vsub.f32 %v448_v52, %v489_v30  ;;  %v522_v31 = vsel %vm336_vm1, %v508_v32, 0.0  ;;  %v519_v35 = vsel %vm336_vm1, %v507_v33, 0.0 }
 0x187   : > { %523 = vadd.xlane.f32.xlu0 %v522_v31  ;;  %v469_v37 = vpop.xlane.xlu0 %468  ;;  %520 = vadd.xlane.f32.xlu1 %v519_v35 }
 0x188   : > { %v490_v38 = vmul.f32 0.03125, %v469_v37  ;;  %v509_v40 = vmul.f32 %v1011_v34, %v1011_v34 }
 0x189   : > { %v472_v39 = vpop.xlane.xlu1 %471 }
 0x18a   : > { %v1019_v41 = vsub.f32 %v449_v2, %v490_v38  ;;  %v491_v42 = vmul.f32 0.03125, %v472_v39  ;;  %v525_v49 = vsel %vm336_vm1, %v509_v40, 0.0 }
 0x18b   : > { %v481_v44 = vpop.xlane.xlu0 %480  ;;  %538 = vadd.xlane.f32.xlu1 %v537_v43 }
 0x18c   : > { %v1022_v45 = vsub.f32 %v450_v5, %v491_v42  ;;  %v494_v46 = vmul.f32 0.03125, %v481_v44  ;;  %v510_v47 = vmul.f32 %v1019_v41, %v1019_v41 }
 0x18d   : > { %v484_v48 = vpop.xlane.xlu1 %483 }
 0x18e   : > { %v1027_v50 = vsub.f32 %v453_v3, %v494_v46  ;;  %v495_v51 = vmul.f32 0.03125, %v484_v48  ;;  %v528_v52 = vsel %vm336_vm1, %v510_v47, 0.0  ;;  %v511_v53 = vmul.f32 %v1022_v45, %v1022_v45 }
 0x18f   : > { %529 = vadd.xlane.f32.xlu0 %v528_v52  ;;  %526 = vadd.xlane.f32.xlu1 %v525_v49 }
 0x190   : > { %v1032_v54 = vsub.f32 %v454_v6, %v495_v51  ;;  %v514_v55 = vmul.f32 %v1027_v50, %v1027_v50  ;;  %v531_v57 = vsel %vm336_vm1, %v511_v53, 0.0 }
 0x192   : > { %v540_v56 = vsel %vm336_vm1, %v514_v55, 0.0  ;;  %v515_v58 = vmul.f32 %v1032_v54, %v1032_v54 }
 0x193   : > { %541 = vadd.xlane.f32.xlu0 %v540_v56  ;;  %532 = vadd.xlane.f32.xlu1 %v531_v57 }
 0x194   : > { %v543_v59 = vsel %vm336_vm1, %v515_v58, 0.0 }
 0x197   : > { %544 = vadd.xlane.f32.xlu1 %v543_v59 }
 0x20c   : > { %v518_v60 = vpop.xlane.xlu0 %517 }
 0x20d   : > { %v546_v61 = vmul.f32 0.03125, %v518_v60 }
 0x20f   : > { %v556_v62 = vadd.f32 1e-05, %v546_v61 }
 0x210   : > { %v536_v63 = vpop.xlane.xlu0 %535 }
 0x211   : > { %860 = vrsqrt.f32 %v556_v62  ;;  %v552_v0 = vmul.f32 0.03125, %v536_v63 }
 0x213   : > { %v562_v1 = vadd.f32 1e-05, %v552_v0 }
 0x214   : > { %v524_v2 = vpop.xlane.xlu0 %523  ;;  %v521_v3 = vpop.xlane.xlu1 %520 }
 0x215   : > { %862 = vrsqrt.f32 %v562_v1  ;;  %v548_v4 = vmul.f32 0.03125, %v524_v2  ;;  %v547_v5 = vmul.f32 0.03125, %v521_v3 }
 0x217   : > { %v558_v6 = vadd.f32 1e-05, %v548_v4  ;;  %v557_v7 = vadd.f32 1e-05, %v547_v5 }
 0x218   : > { %v539_v8 = vpop.xlane.xlu1 %538 }
 0x219   : > { %864 = vrsqrt.f32 %v558_v6  ;;  %v553_v10 = vmul.f32 0.03125, %v539_v8 }
 0x21a   : > { %866 = vrsqrt.f32 %v557_v7 }
 0x21b   : > { %v861_v11 = vpop.eup %860  ;;  %v563_v13 = vadd.f32 1e-05, %v553_v10 }
 0x21c   : > { %v576_v14 = vmul.f32 %v861_v11, %v989_v9  ;;  %v530_v15 = vpop.xlane.xlu0 %529  ;;  %v527_v16 = vpop.xlane.xlu1 %526 }
 0x21d   : > { %868 = vrsqrt.f32 %v563_v13  ;;  %v550_v19 = vmul.f32 0.03125, %v530_v15  ;;  %v549_v20 = vmul.f32 0.03125, %v527_v16 }
 0x21e   : > { %v593_v21 = vmul.f32 %v1044_v12, %v576_v14 }
 0x21f   : > { %v863_v22 = vpop.eup %862  ;;  %v560_v24 = vadd.f32 1e-05, %v550_v19  ;;  %v559_v23 = vadd.f32 1e-05, %v549_v20 }
 0x220   : > { %v610_v26 = vadd.f32 %v1050_v17, %v593_v21  ;;  %v582_v29 = vmul.f32 %v863_v22, %v994_v18  ;;  %v542_v9 = vpop.xlane.xlu0 %541  ;;  %v533_v30 = vpop.xlane.xlu1 %532 }
 0x221   : > { %870 = vrsqrt.f32 %v560_v24  ;;  %v554_v32 = vmul.f32 0.03125, %v542_v9  ;;  %v551_v33 = vmul.f32 0.03125, %v533_v30 }
 0x222   : > { %v774_v31 = vpack.c.bf16 %v610_v26, %v610_v26  ;;  %v599_v35 = vmul.f32 %v1044_v12, %v582_v29  ;;  %872 = vrsqrt.f32 %v559_v23 }
 0x223   : > { %v865_v36 = vpop.eup %864  ;;  %v564_v37 = vadd.f32 1e-05, %v554_v32  ;;  %v561_v18 = vadd.f32 1e-05, %v551_v33 }
 0x224   : > { %v867_v38 = vpop.eup %866  ;;  %661 = vst.msk [vmem:[%s1059_s19] sm:$0xf] %vm660_vm2, %v774_v31  ;;  %v616_v39 = vadd.f32 %v1050_v17, %v599_v35  ;;  %v578_v40 = vmul.f32 %v865_v36, %v1004_v28  ;;  %v545_v42 = vpop.xlane.xlu1 %544 }
 0x225   : > { %v577_v43 = vmul.f32 %v867_v38, %v1002_v27  ;;  %874 = vrsqrt.f32 %v564_v37  ;;  %v555_v44 = vmul.f32 0.03125, %v545_v42 }
 0x226   : > { %v780_v46 = vpack.c.bf16 %v616_v39, %v616_v39  ;;  %v595_v47 = vmul.f32 %v1044_v12, %v578_v40  ;;  %876 = vrsqrt.f32 %v561_v18 }
 0x227   : > { %v869_v48 = vpop.eup %868  ;;  %v594_v49 = vmul.f32 %v1044_v12, %v577_v43  ;;  %v565_v51 = vadd.f32 1e-05, %v555_v44 }
 0x228   : > { %667 = vst.msk [vmem:[%s1059_s19 + $0x18] sm:$0xf] %vm660_vm2, %v780_v46  ;;  %v612_v52 = vadd.f32 %v1050_v17, %v595_v47  ;;  %v583_v28 = vmul.f32 %v869_v48, %v1000_v25 }
 0x229   : > { %v611_v27 = vadd.f32 %v1050_v17, %v594_v49  ;;  %878 = vrsqrt.f32 %v565_v51 }
 0x22a   : > { %v776_v53 = vpack.c.bf16 %v612_v52, %v612_v52  ;;  %v600_v55 = vmul.f32 %v1044_v12, %v583_v28 }
 0x22b   : > { %v871_v56 = vpop.eup %870  ;;  %v775_v57 = vpack.c.bf16 %v611_v27, %v611_v27 }
 0x22c   : > { %v873_v58 = vpop.eup %872  ;;  %663 = vst.msk [vmem:[%s1059_s19 + $0x8] sm:$0xf] %vm660_vm2, %v776_v53  ;;  %v617_v59 = vadd.f32 %v1050_v17, %v600_v55  ;;  %v580_v60 = vmul.f32 %v871_v56, %v1019_v41 }
 0x22d   : > { %662 = vst.msk [vmem:[%s1059_s19 + $0x4] sm:$0xf] %vm660_vm2, %v775_v57  ;;  %v579_v25 = vmul.f32 %v873_v58, %v1011_v34 }
 0x22e   : > { %v781_v61 = vpack.c.bf16 %v617_v59, %v617_v59  ;;  %v597_v62 = vmul.f32 %v1044_v12, %v580_v60 }
 0x22f   : > { %v875_v63 = vpop.eup %874  ;;  %v596_v0 = vmul.f32 %v1044_v12, %v579_v25 }
 0x230   : > { %v877_v1 = vpop.eup %876  ;;  %668 = vst.msk [vmem:[%s1059_s19 + $0x1c] sm:$0xf] %vm660_vm2, %v781_v61  ;;  %v614_v2 = vadd.f32 %v1050_v17, %v597_v62  ;;  %v584_v3 = vmul.f32 %v875_v63, %v1027_v50 }
 0x231   : > { %v613_v41 = vadd.f32 %v1050_v17, %v596_v0  ;;  %v581_v34 = vmul.f32 %v877_v1, %v1022_v45 }
 0x232   : > { %v778_v4 = vpack.c.bf16 %v614_v2, %v614_v2  ;;  %v601_v5 = vmul.f32 %v1044_v12, %v584_v3 }
 0x233   : > { %v879_v6 = vpop.eup %878  ;;  %v777_v7 = vpack.c.bf16 %v613_v41, %v613_v41  ;;  %v598_v8 = vmul.f32 %v1044_v12, %v581_v34 }
 0x234   : > { %665 = vst.msk [vmem:[%s1059_s19 + $0x10] sm:$0xf] %vm660_vm2, %v778_v4  ;;  %v618_v10 = vadd.f32 %v1050_v17, %v601_v5  ;;  %v585_v50 = vmul.f32 %v879_v6, %v1032_v54 }
 0x235   : > { %664 = vst.msk [vmem:[%s1059_s19 + $0xc] sm:$0xf] %vm660_vm2, %v777_v7  ;;  %v615_v11 = vadd.f32 %v1050_v17, %v598_v8 }
 0x236   : > { %v782_v45 = vpack.c.bf16 %v618_v10, %v618_v10  ;;  %v602_v13 = vmul.f32 %v1044_v12, %v585_v50 }
 0x237   : > { %v779_v14 = vpack.c.bf16 %v615_v11, %v615_v11 }
 0x238   : > { %669 = vst.msk [vmem:[%s1059_s19 + $0x20] sm:$0xf] %vm660_vm2, %v782_v45  ;;  %v619_v15 = vadd.f32 %v1050_v17, %v602_v13 }
 0x239   : > { %666 = vst.msk [vmem:[%s1059_s19 + $0x14] sm:$0xf] %vm660_vm2, %v779_v14 }
 0x23a   : > { %v783_v16 = vpack.c.bf16 %v619_v15, %v619_v15 }
 0x23c   : > { %670 = vst.msk [vmem:[%s1059_s19 + $0x24] sm:$0xf] %vm660_vm2, %v783_v16 }
 0x23d PF: > { %s16_s21 = sadd.s32 1, %s886_s21  }
 0x23e   : > { %p13_p4 = scmp.ge.s32.totalorder %s16_s21, 4  }
 0x240   :  { %15 = sbr.rel (!%p13_p4) target bundleno = 1 (0x1), region = 77 }

// kernel: deformable_transformer_forward.26
= control target key start
LH: loop header
LB: loop body
LE: loop exit
PB: predicated region body
PF: predicated region fallthrough
CT: control target
= control target key end

     0   :  { %s1083_s24 = smov 0   ;;  %s1338_s0 = inlined_call_operand.vmem [shape: bf16[160,32], index: 0, kind: input, shape index: {}]   ;;  %s1339_s1 = inlined_call_operand.vmem [shape: bf16[32,64], index: 1, kind: input, shape index: {}]   ;;  %s1340_s2 = inlined_call_operand.vmem [shape: f32[1,64], index: 2, kind: input, shape index: {}]   ;;  %s1341_s3 = inlined_call_operand.vmem [shape: bf16[64,32], index: 3, kind: input, shape index: {}]   ;;  %s1342_s4 = inlined_call_operand.vmem [shape: f32[1,32], index: 4, kind: input, shape index: {}]   ;;  %s1343_s5 = inlined_call_operand.vmem [shape: f32[1,32], index: 5, kind: input, shape index: {}]   ;;  %s1344_s6 = inlined_call_operand.vmem [shape: f32[1,32], index: 6, kind: input, shape index: {}]   ;;  %s1345_s7 = inlined_call_operand.vmem [shape: bf16[160,32], index: 7, kind: output, shape index: {}]  }
   0x1 LB: > { %s865_s25 = sadd.s32 4294967295, %s1039_s24   ;;  %p869_p0 = scmp.ge.s32.totalorder %s1039_s24, 1  ;;  %s1039_s24 = sphi %s1083_s24, %s17_s24  }
   0x2   : > { %p238_p1 = scmp.lt.s32.totalorder %s1039_s24, 3 }
   0x4   : > { %p239_p2 = pnand %p869_p0, %p238_p1 }
   0x5   : > { %v997_v0 = vld [vmem:[%s1339_s1] sm:$0xff] (!%p239_p2)   ;;  %v1041_v1 = vmov (!%p239_p2), 0.0   ;;  %v998_v2 = vld [vmem:[%s1339_s1 + $0x8] sm:$0xff] (!%p239_p2)   ;;  %vm1042_vm0 = vmmov (!%p239_p2), 0   ;;  %s270_s30 = smul.u32 (!%p239_p2), 10, %s865_s25  ;;  %vm341_vm1 = vcmask (!%p239_p2), 261120  }
   0x6   : > { %242 = sbr.rel (%p239_p2) target bundleno = 803 (0x323), region = 48  ;;  %935 = vmatprep.subr.bf16.mxu0 (!%p239_p2), %v1041_v1  ;;  %959 = vmatprep.subr.bf16.mxu1 (!%p239_p2), %v1041_v1  ;;  %v1004_v3 = vld [vmem:[%s1341_s3] sm:$0xff] (!%p239_p2)   ;;  %v1005_v4 = vld [vmem:[%s1341_s3 + $0x8] sm:$0xff] (!%p239_p2)   ;;  %v1006_v10 = vld [vmem:[%s1341_s3 + $0x10] sm:$0xff] (!%p239_p2)   ;;  %vm484_vm2 = vcmask (!%p239_p2), 523264   ;;  %vm798_vm3 = vcmask (!%p239_p2), 257024  }
   0x7   : > { %936 = vmatpush3.bf16.msra.mxu0 (!%p239_p2), %v997_v0  ;;  %939 = vmatprep.mubr.msk.bf16.mxu0 (!%p239_p2), %vm1042_vm0, %v1041_v1  ;;  %p271_p3 = scmp.lt.s32.totalorder (!%p239_p2), %s270_s30, 19  ;;  %v1007_v11 = vld [vmem:[%s1341_s3 + $0x18] sm:$0xff] (!%p239_p2)   ;;  %v872_v12 = vld [vmem:[%s1340_s2] ss:$0 sm:$0xff] (!%p239_p2) }
   0x8   : > { %937 = vmatprep.subr.bf16.mxu0 (!%p239_p2), %v1041_v1  ;;  %967 = vmatprep.mubr.msk.bf16.mxu1 (!%p239_p2), %vm1042_vm0, %v1041_v1  ;;  %v1174_v58 = vld [vmem:[%s1342_s4] ss:$0 sm:$0xff] (!%p239_p2) }
   0x9   : > { %960 = vmatpush3.bf16.msra.mxu1 (!%p239_p2), %v1004_v3 }
   0xa   : > { %961 = vmatprep.subr.bf16.mxu1 (!%p239_p2), %v1041_v1 }
   0xb   : > { %938 = vmatpush3.bf16.msra.mxu0 (!%p239_p2), %v998_v2 }
   0xd   : > { %s1347_s30 = smov (!%p271_p3, %s270_s30), 19  ;;  %962 = vmatpush3.bf16.msra.mxu1 %v1005_v4 }
   0xe   : > { %s870_s12 = sshll.u32 %s1347_s30, 2  ;;  %963 = vmatprep.subr.bf16.mxu1 %v1041_v1 }
   0xf   : > { %s274_s15 = scalar_lea.vmem %s1338_s0, %s870_s12  ;;  %s1287_s9 = scalar_lea.vmem %s1345_s7, %s870_s12 }
  0x10   : > { %v1119_v5 = vld [vmem:[%s274_s15] sm:$0xff]   ;;  %v1126_v6 = vld [vmem:[%s274_s15 + $0x8] sm:$0xff]   ;;  %v1132_v7 = vld [vmem:[%s274_s15 + $0x10] sm:$0xff]  }
  0x11   : > { %940 = vmatmul.mubr.msk.bf16.vlgmr.msra.gmra.mrb[0].mxu0 %vm341_vm1, %v1119_v5  ;;  %v1138_v8 = vld [vmem:[%s274_s15 + $0x18] sm:$0xff]   ;;  %v1144_v9 = vld [vmem:[%s274_s15 + $0x20] sm:$0xff]   ;;  %964 = vmatpush3.bf16.msra.mxu1 %v1006_v10  ;;  %v573_v59 = vunpack.c.l.bf16 %v1119_v5  ;;  %v574_v63 = vunpack.c.h.bf16 %v1119_v5 }
  0x12   : > { %943 = vmatprep.mubr.msk.bf16.mxu0 %vm1042_vm0, %v1041_v1  ;;  %965 = vmatprep.subr.bf16.mxu1 %v1041_v1 }
  0x15   : > { %966 = vmatpush3.bf16.msra.mxu1 %v1007_v11  ;;  %v575_v11 = vunpack.c.l.bf16 %v1126_v6 }
  0x19   : > { %944 = vmatmul.mubr.msk.bf16.gmra.mrb[4].mxu0 %vm341_vm1, %v1126_v6 }
  0x1a   : > { %947 = vmatprep.mubr.msk.bf16.mxu0 %vm1042_vm0, %v1041_v1 }
  0x21   : > { %948 = vmatmul.mubr.msk.bf16.gmra.mrb[8].mxu0 %vm341_vm1, %v1132_v7 }
  0x22   : > { %951 = vmatprep.mubr.msk.bf16.mxu0 %vm1042_vm0, %v1041_v1 }
  0x29   : > { %952 = vmatmul.mubr.msk.bf16.gmra.mrb[12].mxu0 %vm341_vm1, %v1138_v8 }
  0x2a   : > { %955 = vmatprep.mubr.msk.bf16.mxu0 %vm1042_vm0, %v1041_v1 }
  0x31   : > { %956 = vmatmul.mubr.msk.bf16.gmra.mrb[16].mxu0 %vm341_vm1, %v1144_v9 }
  0xe4   : > { %v391_v13 = vpop.f32.mrb[0].mxu0 }
  0xe5   : > { %v392_v14 = vadd.f32 %v872_v12, %v391_v13  ;;  %v941_v15 = vpop.f32.mrb[1].mxu0 }
  0xe6   : > { %v394_v16 = vpop.f32.mrb[2].mxu0  ;;  %v576_v15 = vunpack.c.h.bf16 %v1126_v6 }
  0xe7   : > { %v395_v17 = vadd.f32 %v872_v12, %v394_v16  ;;  %v942_v18 = vpop.f32.mrb[3].mxu0  ;;  %v430_v19 = vmax.f32 %v392_v14, 0.0 }
  0xe9   : > { %v431_v20 = vmax.f32 %v395_v17, 0.0 }
  0xeb   : > { %v440_v21 = vpack.c.bf16 %v431_v20, %v430_v19 }
  0xec   : > { %v399_v22 = vpop.f32.mrb[4].mxu0 }
  0xed   : > { %v400_v23 = vadd.f32 %v872_v12, %v399_v22  ;;  %v945_v24 = vpop.f32.mrb[5].mxu0  ;;  %968 = vmatmul.mubr.msk.bf16.vlgmr.msra.gmra.mrb[0].mxu1 %vm484_vm2, %v440_v21  ;;  %v577_v22 = vunpack.c.l.bf16 %v1132_v7 }
  0xee   : > { %v402_v25 = vpop.f32.mrb[6].mxu0  ;;  %971 = vmatprep.mubr.msk.bf16.mxu1 %vm1042_vm0, %v1041_v1 }
  0xef   : > { %v403_v26 = vadd.f32 %v872_v12, %v402_v25  ;;  %v946_v27 = vpop.f32.mrb[7].mxu0  ;;  %v432_v28 = vmax.f32 %v400_v23, 0.0 }
  0xf1   : > { %v433_v29 = vmax.f32 %v403_v26, 0.0  ;;  %v578_v26 = vunpack.c.h.bf16 %v1132_v7  ;;  %v580_v7 = vunpack.c.h.bf16 %v1138_v8 }
  0xf3   : > { %v441_v30 = vpack.c.bf16 %v433_v29, %v432_v28 }
  0xf4   : > { %v407_v31 = vpop.f32.mrb[8].mxu0 }
  0xf5   : > { %v408_v32 = vadd.f32 %v872_v12, %v407_v31  ;;  %v949_v33 = vpop.f32.mrb[9].mxu0  ;;  %972 = vmatmul.mubr.msk.bf16.gmra.mrb[4].mxu1 %vm484_vm2, %v441_v30 }
  0xf6   : > { %v410_v34 = vpop.f32.mrb[10].mxu0  ;;  %975 = vmatprep.mubr.msk.bf16.mxu1 %vm1042_vm0, %v1041_v1 }
  0xf7   : > { %v411_v35 = vadd.f32 %v872_v12, %v410_v34  ;;  %v950_v36 = vpop.f32.mrb[11].mxu0  ;;  %v434_v37 = vmax.f32 %v408_v32, 0.0  ;;  %v579_v34 = vunpack.c.l.bf16 %v1138_v8  ;;  %v582_v8 = vunpack.c.h.bf16 %v1144_v9 }
  0xf9   : > { %v435_v38 = vmax.f32 %v411_v35, 0.0 }
  0xfb   : > { %v442_v39 = vpack.c.bf16 %v435_v38, %v434_v37 }
  0xfc   : > { %v415_v40 = vpop.f32.mrb[12].mxu0 }
  0xfd   : > { %v416_v41 = vadd.f32 %v872_v12, %v415_v40  ;;  %v953_v42 = vpop.f32.mrb[13].mxu0  ;;  %976 = vmatmul.mubr.msk.bf16.gmra.mrb[8].mxu1 %vm484_vm2, %v442_v39 }
  0xfe   : > { %v418_v43 = vpop.f32.mrb[14].mxu0  ;;  %979 = vmatprep.mubr.msk.bf16.mxu1 %vm1042_vm0, %v1041_v1 }
  0xff   : > { %v419_v44 = vadd.f32 %v872_v12, %v418_v43  ;;  %v954_v45 = vpop.f32.mrb[15].mxu0  ;;  %v436_v46 = vmax.f32 %v416_v41, 0.0 }
 0x100   : > { %v581_v45 = vunpack.c.l.bf16 %v1144_v9 }
 0x101   : > { %v437_v47 = vmax.f32 %v419_v44, 0.0 }
 0x103   : > { %v443_v48 = vpack.c.bf16 %v437_v47, %v436_v46 }
 0x104   : > { %v423_v49 = vpop.f32.mrb[16].mxu0 }
 0x105   : > { %v424_v50 = vadd.f32 %v872_v12, %v423_v49  ;;  %v957_v51 = vpop.f32.mrb[17].mxu0  ;;  %980 = vmatmul.mubr.msk.bf16.gmra.mrb[12].mxu1 %vm484_vm2, %v443_v48 }
 0x106   : > { %v426_v52 = vpop.f32.mrb[18].mxu0  ;;  %983 = vmatprep.mubr.msk.bf16.mxu1 %vm1042_vm0, %v1041_v1 }
 0x107   : > { %v427_v53 = vadd.f32 %v872_v12, %v426_v52  ;;  %v958_v54 = vpop.f32.mrb[19].mxu0  ;;  %v438_v55 = vmax.f32 %v424_v50, 0.0 }
 0x109   : > { %v439_v56 = vmax.f32 %v427_v53, 0.0 }
 0x10b   : > { %v444_v57 = vpack.c.bf16 %v439_v56, %v438_v55 }
 0x10d   : > { %984 = vmatmul.mubr.msk.bf16.gmra.mrb[16].mxu1 %vm484_vm2, %v444_v57 }
 0x1c0   : > { %v534_v60 = vpop.f32.mrb[0].mxu1 }
 0x1c1   : > { %v535_v61 = vadd.f32 %v1174_v58, %v534_v60  ;;  %v969_v62 = vpop.f32.mrb[1].mxu1 }
 0x1c2   : > { %v537_v0 = vpop.f32.mrb[2].mxu1 }
 0x1c3   : > { %v538_v1 = vadd.f32 %v1174_v58, %v537_v0  ;;  %v970_v2 = vpop.f32.mrb[3].mxu1  ;;  %v1180_v3 = vadd.f32 %v573_v59, %v535_v61 }
 0x1c5   : > { %v593_v4 = vsel %vm341_vm1, %v1180_v3, 0.0  ;;  %v1184_v10 = vadd.f32 %v574_v63, %v538_v1 }
 0x1c6   : > { %594 = vadd.xlane.f32.xlu0 %v593_v4 }
 0x1c7   : > { %v596_v5 = vsel %vm341_vm1, %v1184_v10, 0.0 }
 0x1c8   : > { %v542_v12 = vpop.f32.mrb[4].mxu1 }
 0x1c9   : > { %v543_v13 = vadd.f32 %v1174_v58, %v542_v12  ;;  %v973_v14 = vpop.f32.mrb[5].mxu1 }
 0x1ca   : > { %597 = vadd.xlane.f32.xlu0 %v596_v5  ;;  %v545_v16 = vpop.f32.mrb[6].mxu1 }
 0x1cb   : > { %v546_v17 = vadd.f32 %v1174_v58, %v545_v16  ;;  %v974_v18 = vpop.f32.mrb[7].mxu1  ;;  %v585_v19 = vadd.f32 %v575_v11, %v543_v13 }
 0x1cd   : > { %v599_v20 = vsel %vm341_vm1, %v585_v19, 0.0  ;;  %v1193_v21 = vadd.f32 %v576_v15, %v546_v17 }
 0x1ce   : > { %600 = vadd.xlane.f32.xlu1 %v599_v20 }
 0x1cf   : > { %v602_v6 = vsel %vm341_vm1, %v1193_v21, 0.0 }
 0x1d0   : > { %v550_v23 = vpop.f32.mrb[8].mxu1 }
 0x1d1   : > { %v551_v24 = vadd.f32 %v1174_v58, %v550_v23  ;;  %v977_v25 = vpop.f32.mrb[9].mxu1 }
 0x1d2   : > { %603 = vadd.xlane.f32.xlu1 %v602_v6  ;;  %v553_v27 = vpop.f32.mrb[10].mxu1 }
 0x1d3   : > { %v554_v28 = vadd.f32 %v1174_v58, %v553_v27  ;;  %v978_v29 = vpop.f32.mrb[11].mxu1  ;;  %v587_v30 = vadd.f32 %v577_v22, %v551_v24 }
 0x1d5   : > { %v605_v31 = vsel %vm341_vm1, %v587_v30, 0.0  ;;  %v588_v32 = vadd.f32 %v578_v26, %v554_v28 }
 0x1d6   : > { %606 = vadd.xlane.f32.xlu0 %v605_v31 }
 0x1d7   : > { %v608_v33 = vsel %vm341_vm1, %v588_v32, 0.0 }
 0x1d8   : > { %609 = vadd.xlane.f32.xlu1 %v608_v33  ;;  %v558_v35 = vpop.f32.mrb[12].mxu1 }
 0x1d9   : > { %v559_v36 = vadd.f32 %v1174_v58, %v558_v35  ;;  %v981_v37 = vpop.f32.mrb[13].mxu1 }
 0x1da   : > { %v561_v38 = vpop.f32.mrb[14].mxu1 }
 0x1db   : > { %v562_v39 = vadd.f32 %v1174_v58, %v561_v38  ;;  %v982_v40 = vpop.f32.mrb[15].mxu1  ;;  %v589_v41 = vadd.f32 %v579_v34, %v559_v36 }
 0x1dd   : > { %v611_v42 = vsel %vm341_vm1, %v589_v41, 0.0  ;;  %v590_v43 = vadd.f32 %v580_v7, %v562_v39 }
 0x1de   : > { %612 = vadd.xlane.f32.xlu0 %v611_v42 }
 0x1df   : > { %v614_v44 = vsel %vm341_vm1, %v590_v43, 0.0 }
 0x1e0   : > { %615 = vadd.xlane.f32.xlu1 %v614_v44  ;;  %v566_v46 = vpop.f32.mrb[16].mxu1 }
 0x1e1   : > { %v567_v47 = vadd.f32 %v1174_v58, %v566_v46  ;;  %v985_v48 = vpop.f32.mrb[17].mxu1 }
 0x1e2   : > { %v569_v49 = vpop.f32.mrb[18].mxu1 }
 0x1e3   : > { %v570_v50 = vadd.f32 %v1174_v58, %v569_v49  ;;  %v986_v51 = vpop.f32.mrb[19].mxu1  ;;  %v591_v52 = vadd.f32 %v581_v45, %v567_v47 }
 0x1e5   : > { %v617_v53 = vsel %vm341_vm1, %v591_v52, 0.0  ;;  %v592_v54 = vadd.f32 %v582_v8, %v570_v50 }
 0x1e6   : > { %618 = vadd.xlane.f32.xlu0 %v617_v53 }
 0x1e7   : > { %v620_v55 = vsel %vm341_vm1, %v592_v54, 0.0 }
 0x1e8   : > { %621 = vadd.xlane.f32.xlu1 %v620_v55 }
 0x253   : > { %v595_v56 = vpop.xlane.xlu0 %594 }
 0x254   : > { %v624_v57 = vmul.f32 0.03125, %v595_v56 }
 0x256   : > { %v1216_v59 = vsub.f32 %v1180_v3, %v624_v57 }
 0x257   : > { %v598_v60 = vpop.xlane.xlu0 %597 }
 0x258   : > { %v625_v61 = vmul.f32 0.03125, %v598_v60  ;;  %v644_v9 = vmul.f32 %v1216_v59, %v1216_v59  ;;  %v1277_v60 = vld [vmem:[%s1344_s6] ss:$0 sm:$0xff] }
 0x25a   : > { %v1221_v58 = vsub.f32 %v1184_v10, %v625_v61  ;;  %v654_v62 = vsel %vm341_vm1, %v644_v9, 0.0 }
 0x25b   : > { %v601_v63 = vpop.xlane.xlu1 %600  ;;  %655 = vadd.xlane.f32.xlu0 %v654_v62 }
 0x25c   : > { %v626_v0 = vmul.f32 0.03125, %v601_v63  ;;  %v645_v1 = vmul.f32 %v1221_v58, %v1221_v58 }
 0x25e   : > { %v1226_v2 = vsub.f32 %v585_v19, %v626_v0  ;;  %v657_v3 = vsel %vm341_vm1, %v645_v1, 0.0 }
 0x25f   : > { %v604_v4 = vpop.xlane.xlu1 %603  ;;  %658 = vadd.xlane.f32.xlu1 %v657_v3 }
 0x260   : > { %v627_v11 = vmul.f32 0.03125, %v604_v4  ;;  %v646_v12 = vmul.f32 %v1226_v2, %v1226_v2 }
 0x262   : > { %v1232_v10 = vsub.f32 %v1193_v21, %v627_v11  ;;  %v660_v13 = vsel %vm341_vm1, %v646_v12, 0.0 }
 0x263   : > { %v607_v14 = vpop.xlane.xlu0 %606  ;;  %661 = vadd.xlane.f32.xlu0 %v660_v13 }
 0x264   : > { %v628_v5 = vmul.f32 0.03125, %v607_v14  ;;  %v647_v15 = vmul.f32 %v1232_v10, %v1232_v10 }
 0x265   : > { %v610_v16 = vpop.xlane.xlu1 %609 }
 0x266   : > { %v1237_v17 = vsub.f32 %v587_v30, %v628_v5  ;;  %v629_v18 = vmul.f32 0.03125, %v610_v16  ;;  %v663_v19 = vsel %vm341_vm1, %v647_v15, 0.0 }
 0x267   : > { %664 = vadd.xlane.f32.xlu1 %v663_v19 }
 0x268   : > { %v1240_v20 = vsub.f32 %v588_v32, %v629_v18  ;;  %v648_v21 = vmul.f32 %v1237_v17, %v1237_v17 }
 0x26a   : > { %v666_v22 = vsel %vm341_vm1, %v648_v21, 0.0  ;;  %v649_v23 = vmul.f32 %v1240_v20, %v1240_v20 }
 0x26b   : > { %v613_v24 = vpop.xlane.xlu0 %612  ;;  %667 = vadd.xlane.f32.xlu0 %v666_v22 }
 0x26c   : > { %v630_v25 = vmul.f32 0.03125, %v613_v24  ;;  %v669_v6 = vsel %vm341_vm1, %v649_v23, 0.0 }
 0x26d   : > { %v616_v26 = vpop.xlane.xlu1 %615  ;;  %670 = vadd.xlane.f32.xlu1 %v669_v6 }
 0x26e   : > { %v1248_v27 = vsub.f32 %v589_v41, %v630_v25  ;;  %v631_v28 = vmul.f32 0.03125, %v616_v26 }
 0x270   : > { %v1250_v29 = vsub.f32 %v590_v43, %v631_v28  ;;  %v650_v30 = vmul.f32 %v1248_v27, %v1248_v27 }
 0x272   : > { %v672_v31 = vsel %vm341_vm1, %v650_v30, 0.0  ;;  %v651_v32 = vmul.f32 %v1250_v29, %v1250_v29 }
 0x273   : > { %673 = vadd.xlane.f32.xlu0 %v672_v31  ;;  %v619_v33 = vpop.xlane.xlu0 %618 }
 0x274   : > { %v632_v34 = vmul.f32 0.03125, %v619_v33  ;;  %v675_v35 = vsel %vm341_vm1, %v651_v32, 0.0 }
 0x275   : > { %676 = vadd.xlane.f32.xlu1 %v675_v35  ;;  %v622_v36 = vpop.xlane.xlu1 %621 }
 0x276   : > { %v1258_v37 = vsub.f32 %v591_v52, %v632_v34  ;;  %v633_v7 = vmul.f32 0.03125, %v622_v36 }
 0x278   : > { %v1260_v38 = vsub.f32 %v592_v54, %v633_v7  ;;  %v652_v39 = vmul.f32 %v1258_v37, %v1258_v37  ;;  %v1271_v54 = vld [vmem:[%s1343_s5] ss:$0 sm:$0xff] }
 0x27a   : > { %v678_v40 = vsel %vm341_vm1, %v652_v39, 0.0  ;;  %v653_v41 = vmul.f32 %v1260_v38, %v1260_v38 }
 0x27b   : > { %679 = vadd.xlane.f32.xlu0 %v678_v40 }
 0x27c   : > { %v681_v42 = vsel %vm341_vm1, %v653_v41, 0.0 }
 0x27d   : > { %682 = vadd.xlane.f32.xlu1 %v681_v42 }
 0x2e8   : > { %v656_v43 = vpop.xlane.xlu0 %655 }
 0x2e9   : > { %v684_v44 = vmul.f32 0.03125, %v656_v43 }
 0x2eb   : > { %v694_v45 = vadd.f32 1e-05, %v684_v44 }
 0x2ec   : > { %v659_v46 = vpop.xlane.xlu1 %658 }
 0x2ed   : > { %1013 = vrsqrt.f32 %v694_v45  ;;  %v685_v47 = vmul.f32 0.03125, %v659_v46 }
 0x2ef   : > { %v695_v48 = vadd.f32 1e-05, %v685_v47 }
 0x2f0   : > { %v662_v8 = vpop.xlane.xlu0 %661 }
 0x2f1   : > { %1015 = vrsqrt.f32 %v695_v48  ;;  %v686_v49 = vmul.f32 0.03125, %v662_v8 }
 0x2f3   : > { %v696_v50 = vadd.f32 1e-05, %v686_v49 }
 0x2f4   : > { %v665_v51 = vpop.xlane.xlu1 %664 }
 0x2f5   : > { %1017 = vrsqrt.f32 %v696_v50  ;;  %v687_v52 = vmul.f32 0.03125, %v665_v51 }
 0x2f7   : > { %v1014_v53 = vpop.eup %1013  ;;  %v697_v55 = vadd.f32 1e-05, %v687_v52 }
 0x2f8   : > { %v714_v56 = vmul.f32 %v1014_v53, %v1216_v59  ;;  %v668_v57 = vpop.xlane.xlu0 %667 }
 0x2f9   : > { %1019 = vrsqrt.f32 %v697_v55  ;;  %v688_v61 = vmul.f32 0.03125, %v668_v57 }
 0x2fa   : > { %v731_v9 = vmul.f32 %v1271_v54, %v714_v56  ;;  %v671_v62 = vpop.xlane.xlu1 %670 }
 0x2fb   : > { %v1016_v63 = vpop.eup %1015  ;;  %v698_v0 = vadd.f32 1e-05, %v688_v61  ;;  %v689_v1 = vmul.f32 0.03125, %v671_v62 }
 0x2fc   : > { %v748_v3 = vadd.f32 %v1277_v60, %v731_v9  ;;  %v715_v4 = vmul.f32 %v1016_v63, %v1221_v58 }
 0x2fd   : > { %1021 = vrsqrt.f32 %v698_v0  ;;  %v699_v59 = vadd.f32 1e-05, %v689_v1 }
 0x2fe   : > { %v909_v11 = vpack.c.bf16 %v748_v3, %v748_v3  ;;  %v732_v12 = vmul.f32 %v1271_v54, %v715_v4 }
 0x2ff   : > { %v1018_v13 = vpop.eup %1017  ;;  %1023 = vrsqrt.f32 %v699_v59 }
 0x300   : > { %799 = vst.msk [vmem:[%s1287_s9] sm:$0xf] %vm798_vm3, %v909_v11  ;;  %v749_v58 = vadd.f32 %v1277_v60, %v732_v12  ;;  %v716_v14 = vmul.f32 %v1018_v13, %v1226_v2  ;;  %v674_v5 = vpop.xlane.xlu0 %673 }
 0x301   : > { %v690_v15 = vmul.f32 0.03125, %v674_v5 }
 0x302   : > { %v910_v16 = vpack.c.bf16 %v749_v58, %v749_v58  ;;  %v733_v18 = vmul.f32 %v1271_v54, %v716_v14  ;;  %v677_v19 = vpop.xlane.xlu1 %676 }
 0x303   : > { %v1020_v21 = vpop.eup %1019  ;;  %v700_v22 = vadd.f32 1e-05, %v690_v15  ;;  %v691_v23 = vmul.f32 0.03125, %v677_v19 }
 0x304   : > { %800 = vst.msk [vmem:[%s1287_s9 + $0x4] sm:$0xf] %vm798_vm3, %v910_v16  ;;  %v750_v24 = vadd.f32 %v1277_v60, %v733_v18  ;;  %v717_v25 = vmul.f32 %v1020_v21, %v1232_v10 }
 0x305   : > { %1025 = vrsqrt.f32 %v700_v22  ;;  %v701_v6 = vadd.f32 1e-05, %v691_v23 }
 0x306   : > { %v911_v26 = vpack.c.bf16 %v750_v24, %v750_v24  ;;  %v734_v2 = vmul.f32 %v1271_v54, %v717_v25 }
 0x307   : > { %v1022_v28 = vpop.eup %1021  ;;  %1027 = vrsqrt.f32 %v701_v6 }
 0x308   : > { %801 = vst.msk [vmem:[%s1287_s9 + $0x8] sm:$0xf] %vm798_vm3, %v911_v26  ;;  %v751_v30 = vadd.f32 %v1277_v60, %v734_v2  ;;  %v718_v31 = vmul.f32 %v1022_v28, %v1237_v17  ;;  %v680_v32 = vpop.xlane.xlu0 %679 }
 0x309   : > { %v1024_v33 = vpop.eup %1023  ;;  %v692_v34 = vmul.f32 0.03125, %v680_v32 }
 0x30a   : > { %v912_v35 = vpack.c.bf16 %v751_v30, %v751_v30  ;;  %v735_v10 = vmul.f32 %v1271_v54, %v718_v31  ;;  %v719_v36 = vmul.f32 %v1024_v33, %v1240_v20  ;;  %v683_v7 = vpop.xlane.xlu1 %682 }
 0x30b   : > { %v702_v39 = vadd.f32 1e-05, %v692_v34  ;;  %v693_v40 = vmul.f32 0.03125, %v683_v7 }
 0x30c   : > { %802 = vst.msk [vmem:[%s1287_s9 + $0xc] sm:$0xf] %vm798_vm3, %v912_v35  ;;  %v752_v41 = vadd.f32 %v1277_v60, %v735_v10  ;;  %v736_v42 = vmul.f32 %v1271_v54, %v719_v36 }
 0x30d   : > { %1029 = vrsqrt.f32 %v702_v39  ;;  %v703_v17 = vadd.f32 1e-05, %v693_v40 }
 0x30e   : > { %v913_v43 = vpack.c.bf16 %v752_v41, %v752_v41  ;;  %v753_v44 = vadd.f32 %v1277_v60, %v736_v42 }
 0x30f   : > { %v1026_v45 = vpop.eup %1025  ;;  %1031 = vrsqrt.f32 %v703_v17 }
 0x310   : > { %803 = vst.msk [vmem:[%s1287_s9 + $0x10] sm:$0xf] %vm798_vm3, %v913_v43  ;;  %v914_v20 = vpack.c.bf16 %v753_v44, %v753_v44  ;;  %v720_v46 = vmul.f32 %v1026_v45, %v1248_v27 }
 0x311   : > { %v1028_v47 = vpop.eup %1027 }
 0x312   : > { %804 = vst.msk [vmem:[%s1287_s9 + $0x14] sm:$0xf] %vm798_vm3, %v914_v20  ;;  %v737_v48 = vmul.f32 %v1271_v54, %v720_v46  ;;  %v721_v8 = vmul.f32 %v1028_v47, %v1250_v29 }
 0x314   : > { %v754_v49 = vadd.f32 %v1277_v60, %v737_v48  ;;  %v738_v50 = vmul.f32 %v1271_v54, %v721_v8 }
 0x316   : > { %v915_v51 = vpack.c.bf16 %v754_v49, %v754_v49  ;;  %v755_v52 = vadd.f32 %v1277_v60, %v738_v50 }
 0x317   : > { %v1030_v53 = vpop.eup %1029 }
 0x318   : > { %805 = vst.msk [vmem:[%s1287_s9 + $0x18] sm:$0xf] %vm798_vm3, %v915_v51  ;;  %v916_v27 = vpack.c.bf16 %v755_v52, %v755_v52  ;;  %v722_v55 = vmul.f32 %v1030_v53, %v1258_v37 }
 0x319   : > { %v1032_v56 = vpop.eup %1031 }
 0x31a   : > { %806 = vst.msk [vmem:[%s1287_s9 + $0x1c] sm:$0xf] %vm798_vm3, %v916_v27  ;;  %v739_v29 = vmul.f32 %v1271_v54, %v722_v55  ;;  %v723_v57 = vmul.f32 %v1032_v56, %v1260_v38 }
 0x31c   : > { %v756_v61 = vadd.f32 %v1277_v60, %v739_v29  ;;  %v740_v9 = vmul.f32 %v1271_v54, %v723_v57 }
 0x31e   : > { %v917_v62 = vpack.c.bf16 %v756_v61, %v756_v61  ;;  %v757_v63 = vadd.f32 %v1277_v60, %v740_v9 }
 0x320   : > { %807 = vst.msk [vmem:[%s1287_s9 + $0x20] sm:$0xf] %vm798_vm3, %v917_v62  ;;  %v918_v0 = vpack.c.bf16 %v757_v63, %v757_v63 }
 0x322   : > { %808 = vst.msk [vmem:[%s1287_s9 + $0x24] sm:$0xf] %vm798_vm3, %v918_v0 }
 0x323 PF: > { %s17_s24 = sadd.s32 1, %s1039_s24  }
 0x324   : > { %p14_p4 = scmp.ge.s32.totalorder %s17_s24, 4  }
 0x326   :  { %16 = sbr.rel (!%p14_p4) target bundleno = 1 (0x1), region = 78 }

// kernel: deformable_transformer_forward.32
= control target key start
LH: loop header
LB: loop body
LE: loop exit
PB: predicated region body
PF: predicated region fallthrough
CT: control target
= control target key end

     0   :  { %s647_s24 = smov 0   ;;  %s694_s0 = inlined_call_operand.vmem [shape: bf16[16,32], index: 0, kind: input, shape index: {}]   ;;  %s695_s1 = inlined_call_operand.vmem [shape: bf16[16,32], index: 1, kind: input, shape index: {}]   ;;  %s696_s2 = inlined_call_operand.vmem [shape: bf16[32,64], index: 2, kind: input, shape index: {}]   ;;  %s697_s3 = inlined_call_operand.vmem [shape: f32[1,64], index: 3, kind: input, shape index: {}]   ;;  %s698_s4 = inlined_call_operand.vmem [shape: bf16[32,32], index: 4, kind: input, shape index: {}]   ;;  %s699_s5 = inlined_call_operand.vmem [shape: f32[1,32], index: 5, kind: input, shape index: {}]   ;;  %s700_s6 = inlined_call_operand.vmem [shape: bf16[16,64], index: 6, kind: output, shape index: {0}]   ;;  %s701_s7 = inlined_call_operand.vmem [shape: bf16[16,32], index: 7, kind: output, shape index: {1}]  }
   0x1 LB: > { %s542_s25 = sadd.s32 4294967295, %s603_s24   ;;  %p546_p0 = scmp.ge.s32.totalorder %s603_s24, 1  ;;  %s603_s24 = sphi %s647_s24, %s18_s24  }
   0x2   : > { %p248_p1 = scmp.lt.s32.totalorder %s603_s24, 3 }
   0x4   : > { %p249_p2 = pnand %p546_p0, %p248_p1 }
   0x5   : > { %v593_v0 = vld [vmem:[%s696_s2] sm:$0xff] (!%p249_p2)   ;;  %v605_v1 = vmov (!%p249_p2), 0.0   ;;  %v595_v3 = vld [vmem:[%s696_s2 + $0x8] sm:$0xff] (!%p249_p2)   ;;  %vm606_vm0 = vmmov (!%p249_p2), 0   ;;  %p286_p3 = scmp.lt.s32.totalorder (!%p249_p2), %s542_s25, 1  ;;  %vm329_vm1 = vcmask (!%p249_p2), 261120  }
   0x6   : > { %252 = sbr.rel (%p249_p2) target bundleno = 237 (0xed), region = 44  ;;  %567 = vmatprep.subr.bf16.mxu0 (!%p249_p2), %v605_v1  ;;  %575 = vmatprep.subr.bf16.mxu1 (!%p249_p2), %v605_v1  ;;  %v594_v2 = vld [vmem:[%s698_s4] sm:$0xff] (!%p249_p2)   ;;  %v596_v4 = vld [vmem:[%s698_s4 + $0x8] sm:$0xff] (!%p249_p2)   ;;  %vm444_vm2 = vcmask (!%p249_p2), 257024   ;;  %vm374_vm3 = vcmask (!%p249_p2), 519168  }
   0x7   : > { %568 = vmatpush3.bf16.msra.mxu0 (!%p249_p2), %v593_v0  ;;  %571 = vmatprep.mubr.msk.bf16.mxu0 (!%p249_p2), %vm606_vm0, %v605_v1  ;;  %v555_v9 = vld [vmem:[%s699_s5] ss:$0 sm:$0xff] (!%p249_p2) }
   0x8   : > { %576 = vmatpush3.bf16.msra.mxu1 (!%p249_p2), %v594_v2  ;;  %569 = vmatprep.subr.bf16.mxu0 (!%p249_p2), %v605_v1  ;;  %v551_v10 = vld [vmem:[%s697_s3] ss:$0 sm:$0xff] (!%p249_p2) }
   0x9   : > { %577 = vmatprep.subr.bf16.mxu1 (!%p249_p2), %v605_v1  ;;  %579 = vmatprep.mubr.msk.bf16.mxu1 (!%p249_p2), %vm606_vm0, %v605_v1 }
   0xb   : > { %570 = vmatpush3.bf16.msra.mxu0 (!%p249_p2), %v595_v3 }
   0xc   : > { %578 = vmatpush3.bf16.msra.mxu1 (!%p249_p2), %v596_v4 }
   0xd   : > { %s703_s25 = smov (!%p286_p3, %s542_s25), 1 }
   0xe   : > { %s667_s11 = sshll.u32 %s703_s25, 2 }
   0xf   : > { %s289_s14 = scalar_lea.vmem %s694_s0, %s667_s11  ;;  %s293_s17 = scalar_lea.vmem %s695_s1, %s667_s11 }
  0x10   : > { %v303_v5 = vld [vmem:[%s289_s14] sm:$0xf]  ;;  %s301_s25 = scalar_lea.vmem %s701_s7, %s667_s11  ;;  %s297_s28 = scalar_lea.vmem %s700_s6, %s667_s11 }
  0x11   : > { %v304_v6 = vld [vmem:[%s293_s17] sm:$0xf] }
  0x12   : > { %v376_v7 = vld [vmem:[%s289_s14] sm:$0xf]  ;;  %v305_v8 = vadd.bf16 %v304_v6, %v303_v5 }
  0x13   : > { %580 = vmatmul.mubr.msk.bf16.vlgmr.msra.gmra.mrb[0].mxu1 %vm329_vm1, %v376_v7 }
  0x14   : > { %572 = vmatmul.mubr.msk.bf16.vlgmr.msra.gmra.mrb[0].mxu0 %vm329_vm1, %v305_v8 }
  0xe6   : > { %v437_v11 = vpop.f32.mrb[0].mxu1 }
  0xe7   : > { %v367_v12 = vpop.f32.mrb[0].mxu0  ;;  %v438_v13 = vadd.f32 %v555_v9, %v437_v11  ;;  %v581_v14 = vpop.f32.mrb[1].mxu1 }
  0xe8   : > { %v368_v15 = vadd.f32 %v551_v10, %v367_v12  ;;  %v573_v16 = vpop.f32.mrb[1].mxu0  ;;  %v440_v17 = vpop.f32.mrb[2].mxu1 }
  0xe9   : > { %v443_v18 = vpack.c.bf16 %v438_v13, %v438_v13  ;;  %v370_v19 = vpop.f32.mrb[2].mxu0  ;;  %v582_v20 = vpop.f32.mrb[3].mxu1 }
  0xea   : > { %v373_v21 = vpack.c.bf16 %v368_v15, %v368_v15  ;;  %v574_v22 = vpop.f32.mrb[3].mxu0 }
  0xeb   : > { %445 = vst.msk [vmem:[%s301_s25] sm:$0xf] %vm444_vm2, %v443_v18 }
  0xec   : > { %375 = vst.msk [vmem:[%s297_s28] sm:$0xf] %vm374_vm3, %v373_v21 }
  0xed PF: > { %s18_s24 = sadd.s32 1, %s603_s24  }
  0xee   : > { %p15_p4 = scmp.ge.s32.totalorder %s18_s24, 4  }
  0xf0   :  { %17 = sbr.rel (!%p15_p4) target bundleno = 1 (0x1), region = 89 }

// kernel: deformable_transformer_forward.33
= control target key start
LH: loop header
LB: loop body
LE: loop exit
PB: predicated region body
PF: predicated region fallthrough
CT: control target
= control target key end

     0   :  { %s885_s12 = smov 0   ;;  %s962_s0 = inlined_call_operand.vmem [shape: bf16[8,8,8], index: 0, kind: input, shape index: {}]   ;;  %s963_s1 = inlined_call_operand.vmem [shape: bf16[8,8,8], index: 1, kind: input, shape index: {}]   ;;  %s964_s2 = inlined_call_operand.vmem [shape: bf16[8,8,8], index: 2, kind: input, shape index: {}]   ;;  %s965_s3 = inlined_call_operand.vmem [shape: bf16[8,8,8], index: 3, kind: output, shape index: {}]  }
   0x1 LB: > { %s742_s13 = sadd.s32 4294967295, %s861_s12   ;;  %p746_p0 = scmp.ge.s32.totalorder %s861_s12, 1  ;;  %s861_s12 = sphi %s885_s12, %s13_s12  }
   0x2   : > { %p160_p1 = scmp.lt.s32.totalorder %s861_s12, 3 }
   0x4   : > { %p161_p2 = pnand %p746_p0, %p160_p1 }
   0x5   : > { %s747_s14 = sshll.u32 (!%p161_p2), %s742_s13, 2  ;;  %v863_v0 = vmov (!%p161_p2), 0.0   ;;  %vm864_vm0 = vmmov (!%p161_p2), 0   ;;  %vm227_vm1 = vcmask (!%p161_p2), 64512   ;;  %vm471_vm2 = vcmask (!%p161_p2), 1043456  }
   0x6   : > { %164 = sbr.rel (%p161_p2) target bundleno = 782 (0x30e), region = 32  ;;  %781 = vmatprep.subr.bf16.mxu0 (!%p161_p2), %v863_v0  ;;  %p195_p3 = scmp.lt.s32.totalorder (!%p161_p2), %s747_s14, 7  ;;  %787 = vmatprep.subr.bf16.mxu1 (!%p161_p2), %v863_v0  ;;  %vm657_vm3 = vcmask (!%p161_p2), 60416  }
   0x7   : > { %783 = vmatprep.mubr.msk.bf16.mxu0 (!%p161_p2), %vm864_vm0, %v863_v0  ;;  %789 = vmatprep.mubr.msk.bf16.mxu1 (!%p161_p2), %vm864_vm0, %v863_v0 }
   0xd   : > { %s967_s14 = smov (!%p195_p3, %s747_s14), 7 }
   0xe   : > { %s899_s15 = sshll.u32 %s967_s14, 2 }
   0xf   : > { %s204_s18 = scalar_lea.vmem %s963_s1, %s899_s15  ;;  %s198_s21 = scalar_lea.vmem %s962_s0, %s899_s15 }
  0x10   : > { %v223_v1 = vld [vmem:[%s204_s18] sm:$0xf]  ;;  %v224_v2 = vld [vmem:[%s204_s18 + $0x4] sm:$0xf]  ;;  %v225_v5 = vld [vmem:[%s204_s18 + $0x8] sm:$0xf]  ;;  %s210_s24 = scalar_lea.vmem %s964_s2, %s899_s15  ;;  %s216_s27 = scalar_lea.vmem %s965_s3, %s899_s15 }
  0x11   : > { %v232_v3 = vsel %vm227_vm1, %v223_v1, 0  ;;  %v278_v4 = vsel %vm227_vm1, %v224_v2, 0  ;;  %v226_v6 = vld [vmem:[%s204_s18 + $0xc] sm:$0xf]  ;;  %v219_v7 = vld [vmem:[%s198_s21] sm:$0xf] }
  0x12   : > { %782 = vmatpush3.bf16.xpose.msra.mxu0 %v232_v3  ;;  %788 = vmatpush3.bf16.xpose.msra.mxu1 %v278_v4  ;;  %v220_v8 = vld [vmem:[%s198_s21 + $0x4] sm:$0xf]  ;;  %v324_v9 = vsel %vm227_vm1, %v225_v5, 0  ;;  %v370_v10 = vsel %vm227_vm1, %v226_v6, 0  ;;  %v221_v11 = vld [vmem:[%s198_s21 + $0x8] sm:$0xf] }
  0x13   : > { %793 = vmatprep.subr.bf16.mxu0 %v863_v0  ;;  %799 = vmatprep.subr.bf16.mxu1 %v863_v0  ;;  %v222_v12 = vld [vmem:[%s198_s21 + $0xc] sm:$0xf]  ;;  %v464_v57 = vld [vmem:[%s210_s24] sm:$0xf]  ;;  %v465_v59 = vld [vmem:[%s210_s24 + $0x4] sm:$0xf] }
  0x14   : > { %v473_v58 = vsel %vm471_vm2, %v464_v57, 0  ;;  %v519_v60 = vsel %vm471_vm2, %v465_v59, 0  ;;  %v466_v61 = vld [vmem:[%s210_s24 + $0x8] sm:$0xf]  ;;  %v467_v63 = vld [vmem:[%s210_s24 + $0xc] sm:$0xf] }
  0x15   : > { %v565_v62 = vsel %vm471_vm2, %v466_v61, 0  ;;  %v611_v1 = vsel %vm471_vm2, %v467_v63, 0 }
  0x19   : > { %784 = vmatmul.mubr.msk.bf16.vlgmr.msra.gmra.mrb[0].mxu0 %vm227_vm1, %v219_v7  ;;  %790 = vmatmul.mubr.msk.bf16.vlgmr.msra.gmra.mrb[0].mxu1 %vm227_vm1, %v220_v8 }
  0x1a   : > { %794 = vmatpush3.bf16.xpose.msra.mxu0 %v324_v9  ;;  %800 = vmatpush3.bf16.xpose.msra.mxu1 %v370_v10 }
  0x1b   : > { %795 = vmatprep.mubr.msk.bf16.mxu0 %vm864_vm0, %v863_v0  ;;  %801 = vmatprep.mubr.msk.bf16.mxu1 %vm864_vm0, %v863_v0 }
  0x1c   : > { %805 = vmatprep.subr.bf16.mxu0 %v863_v0  ;;  %811 = vmatprep.subr.bf16.mxu1 %v863_v0 }
  0x21   : > { %796 = vmatmul.mubr.msk.bf16.vlgmr.msra.gmra.mrb[4].mxu0 %vm227_vm1, %v221_v11  ;;  %802 = vmatmul.mubr.msk.bf16.vlgmr.msra.gmra.mrb[4].mxu1 %vm227_vm1, %v222_v12 }
  0x22   : > { %807 = vmatprep.mubr.msk.bf16.mxu0 %vm864_vm0, %v863_v0  ;;  %813 = vmatprep.mubr.msk.bf16.mxu1 %vm864_vm0, %v863_v0 }
  0x23   : > { %806 = vmatpush3.bf16.msra.mxu0 %v473_v58  ;;  %812 = vmatpush3.bf16.msra.mxu1 %v519_v60 }
  0x24   : > { %817 = vmatprep.subr.bf16.mxu0 %v863_v0  ;;  %823 = vmatprep.subr.bf16.mxu1 %v863_v0 }
  0xec   : > { %v268_v13 = vpop.f32.mrb[0].mxu0  ;;  %v314_v14 = vpop.f32.mrb[0].mxu1 }
  0xed   : > { %v412_v15 = vmul.f32 0.35355338, %v268_v13  ;;  %v785_v16 = vpop.f32.mrb[1].mxu0  ;;  %v413_v17 = vmul.f32 0.35355338, %v314_v14  ;;  %v791_v18 = vpop.f32.mrb[1].mxu1 }
  0xee   : > { %v271_v19 = vpop.f32.mrb[2].mxu0  ;;  %v317_v20 = vpop.f32.mrb[2].mxu1 }
  0xef   : > { %v786_v21 = vpop.f32.mrb[3].mxu0  ;;  %v416_v22 = vsel %vm227_vm1, %v412_v15, -inf  ;;  %v792_v23 = vpop.f32.mrb[3].mxu1  ;;  %v419_v24 = vsel %vm227_vm1, %v413_v17, -inf }
  0xf0   : > { %417 = vmax.xlane.f32.xlu0 %v416_v22 }
  0xf4   : > { %420 = vmax.xlane.f32.xlu0 %v419_v24  ;;  %v360_v25 = vpop.f32.mrb[4].mxu0  ;;  %v406_v26 = vpop.f32.mrb[4].mxu1 }
  0xf5   : > { %v414_v27 = vmul.f32 0.35355338, %v360_v25  ;;  %v797_v28 = vpop.f32.mrb[5].mxu0  ;;  %v415_v29 = vmul.f32 0.35355338, %v406_v26  ;;  %v803_v30 = vpop.f32.mrb[5].mxu1 }
  0xf6   : > { %v363_v31 = vpop.f32.mrb[6].mxu0  ;;  %v409_v32 = vpop.f32.mrb[6].mxu1 }
  0xf7   : > { %v798_v33 = vpop.f32.mrb[7].mxu0  ;;  %v422_v34 = vsel %vm227_vm1, %v414_v27, -inf  ;;  %v804_v35 = vpop.f32.mrb[7].mxu1  ;;  %v425_v36 = vsel %vm227_vm1, %v415_v29, -inf }
  0xf8   : > { %423 = vmax.xlane.f32.xlu1 %v422_v34 }
  0xfc   : > { %426 = vmax.xlane.f32.xlu1 %v425_v36 }
 0x17d   : > { %v418_v37 = vpop.xlane.xlu0 %417 }
 0x17e   : > { %v428_v38 = vsub.f32 %v412_v15, %v418_v37 }
 0x180   : > { %v432_v39 = vmul.f32 1.442695, %v428_v38 }
 0x181   : > { %v421_v40 = vpop.xlane.xlu0 %420 }
 0x182   : > { %839 = vpow2.f32 %v432_v39  ;;  %v429_v41 = vsub.f32 %v413_v17, %v421_v40 }
 0x184   : > { %v434_v42 = vmul.f32 1.442695, %v429_v41 }
 0x185   : > { %v424_v43 = vpop.xlane.xlu1 %423 }
 0x186   : > { %841 = vpow2.f32 %v434_v42  ;;  %v430_v44 = vsub.f32 %v414_v27, %v424_v43 }
 0x188   : > { %v436_v45 = vmul.f32 1.442695, %v430_v44 }
 0x189   : > { %v427_v46 = vpop.xlane.xlu1 %426 }
 0x18a   : > { %843 = vpow2.f32 %v436_v45  ;;  %v431_v47 = vsub.f32 %v415_v29, %v427_v46 }
 0x18c   : > { %v840_v48 = vpop.eup %839  ;;  %v438_v49 = vmul.f32 1.442695, %v431_v47 }
 0x18d   : > { %v440_v50 = vsel %vm227_vm1, %v840_v48, 0.0 }
 0x18e   : > { %845 = vpow2.f32 %v438_v49  ;;  %441 = vadd.xlane.f32.xlu0 %v440_v50 }
 0x190   : > { %v842_v51 = vpop.eup %841 }
 0x191   : > { %v443_v52 = vsel %vm227_vm1, %v842_v51, 0.0 }
 0x192   : > { %444 = vadd.xlane.f32.xlu1 %v443_v52 }
 0x194   : > { %v844_v53 = vpop.eup %843 }
 0x195   : > { %v446_v54 = vsel %vm227_vm1, %v844_v53, 0.0 }
 0x196   : > { %447 = vadd.xlane.f32.xlu0 %v446_v54 }
 0x198   : > { %v846_v55 = vpop.eup %845 }
 0x199   : > { %v449_v56 = vsel %vm227_vm1, %v846_v55, 0.0 }
 0x19a   : > { %450 = vadd.xlane.f32.xlu1 %v449_v56 }
 0x21b   : > { %v442_v2 = vpop.xlane.xlu0 %441 }
 0x21c   : > { %847 = vrcp.f32 %v442_v2 }
 0x21f   : > { %v445_v3 = vpop.xlane.xlu1 %444 }
 0x220   : > { %849 = vrcp.f32 %v445_v3 }
 0x223   : > { %v448_v4 = vpop.xlane.xlu0 %447 }
 0x224   : > { %851 = vrcp.f32 %v448_v4 }
 0x226   : > { %v848_v5 = vpop.eup %847 }
 0x227   : > { %v456_v6 = vmul.f32 %v848_v5, %v840_v48  ;;  %v451_v7 = vpop.xlane.xlu1 %450 }
 0x228   : > { %853 = vrcp.f32 %v451_v7 }
 0x229   : > { %v460_v8 = vpack.c.bf16 %v456_v6, %v456_v6 }
 0x22a   : > { %v850_v9 = vpop.eup %849 }
 0x22b   : > { %v457_v10 = vmul.f32 %v850_v9, %v842_v51  ;;  %808 = vmatmul.mubr.msk.bf16.vlgmr.msra.gmra.mrb[8].mxu0 %vm227_vm1, %v460_v8 }
 0x22c   : > { %818 = vmatpush3.bf16.msra.mxu0 %v565_v62  ;;  %819 = vmatprep.mubr.msk.bf16.mxu0 %vm864_vm0, %v863_v0 }
 0x22d   : > { %v461_v11 = vpack.c.bf16 %v457_v10, %v457_v10 }
 0x22e   : > { %v852_v12 = vpop.eup %851 }
 0x22f   : > { %v458_v13 = vmul.f32 %v852_v12, %v844_v53  ;;  %814 = vmatmul.mubr.msk.bf16.vlgmr.msra.gmra.mrb[8].mxu1 %vm227_vm1, %v461_v11 }
 0x230   : > { %824 = vmatpush3.bf16.msra.mxu1 %v611_v1  ;;  %825 = vmatprep.mubr.msk.bf16.mxu1 %vm864_vm0, %v863_v0 }
 0x231   : > { %v462_v14 = vpack.c.bf16 %v458_v13, %v458_v13 }
 0x232   : > { %v854_v15 = vpop.eup %853 }
 0x233   : > { %v459_v16 = vmul.f32 %v854_v15, %v846_v55  ;;  %820 = vmatmul.mubr.msk.bf16.vlgmr.msra.gmra.mrb[12].mxu0 %vm227_vm1, %v462_v14 }
 0x235   : > { %v463_v17 = vpack.c.bf16 %v459_v16, %v459_v16 }
 0x237   : > { %826 = vmatmul.mubr.msk.bf16.vlgmr.msra.gmra.mrb[12].mxu1 %vm227_vm1, %v463_v17 }
 0x2fe   : > { %v509_v18 = vpop.f32.mrb[8].mxu0 }
 0x2ff   : > { %v653_v19 = vpack.c.bf16 %v509_v18, %v509_v18  ;;  %v809_v20 = vpop.f32.mrb[9].mxu0 }
 0x300   : > { %v512_v21 = vpop.f32.mrb[10].mxu0 }
 0x301   : > { %658 = vst.msk [vmem:[%s216_s27] sm:$0xf] %vm657_vm3, %v653_v19  ;;  %v810_v0 = vpop.f32.mrb[11].mxu0 }
 0x302   : > { %v555_v22 = vpop.f32.mrb[8].mxu1 }
 0x303   : > { %v654_v23 = vpack.c.bf16 %v555_v22, %v555_v22  ;;  %v815_v24 = vpop.f32.mrb[9].mxu1 }
 0x304   : > { %v558_v25 = vpop.f32.mrb[10].mxu1 }
 0x305   : > { %659 = vst.msk [vmem:[%s216_s27 + $0x4] sm:$0xf] %vm657_vm3, %v654_v23  ;;  %v816_v26 = vpop.f32.mrb[11].mxu1 }
 0x306   : > { %v601_v27 = vpop.f32.mrb[12].mxu0 }
 0x307   : > { %v655_v28 = vpack.c.bf16 %v601_v27, %v601_v27  ;;  %v821_v29 = vpop.f32.mrb[13].mxu0 }
 0x308   : > { %v604_v30 = vpop.f32.mrb[14].mxu0 }
 0x309   : > { %660 = vst.msk [vmem:[%s216_s27 + $0x8] sm:$0xf] %vm657_vm3, %v655_v28  ;;  %v822_v31 = vpop.f32.mrb[15].mxu0 }
 0x30a   : > { %v647_v32 = vpop.f32.mrb[12].mxu1 }
 0x30b   : > { %v656_v33 = vpack.c.bf16 %v647_v32, %v647_v32  ;;  %v827_v34 = vpop.f32.mrb[13].mxu1 }
 0x30c   : > { %v650_v35 = vpop.f32.mrb[14].mxu1 }
 0x30d   : > { %661 = vst.msk [vmem:[%s216_s27 + $0xc] sm:$0xf] %vm657_vm3, %v656_v33  ;;  %v828_v36 = vpop.f32.mrb[15].mxu1 }
 0x30e PF: > { %s13_s12 = sadd.s32 1, %s861_s12  }
 0x30f   : > { %p10_p4 = scmp.ge.s32.totalorder %s13_s12, 4  }
 0x311   :  { %12 = sbr.rel (!%p10_p4) target bundleno = 1 (0x1), region = 68 }

// kernel: deformable_transformer_forward.34
= control target key start
LH: loop header
LB: loop body
LE: loop exit
PB: predicated region body
PF: predicated region fallthrough
CT: control target
= control target key end

     0   :  { %s520_s21 = smov 0   ;;  %s563_s0 = inlined_call_operand.vmem [shape: bf16[16,32], index: 0, kind: input, shape index: {}]   ;;  %s564_s1 = inlined_call_operand.vmem [shape: bf16[16,32], index: 1, kind: input, shape index: {}]   ;;  %s565_s2 = inlined_call_operand.vmem [shape: bf16[32,32], index: 2, kind: input, shape index: {}]   ;;  %s566_s3 = inlined_call_operand.vmem [shape: f32[1,32], index: 3, kind: input, shape index: {}]   ;;  %s567_s4 = inlined_call_operand.vmem [shape: f32[1,32], index: 4, kind: input, shape index: {}]   ;;  %s568_s5 = inlined_call_operand.vmem [shape: f32[1,32], index: 5, kind: input, shape index: {}]   ;;  %s569_s6 = inlined_call_operand.vmem [shape: bf16[16,32], index: 6, kind: output, shape index: {}]  }
   0x1 LB: > { %s434_s22 = sadd.s32 4294967295, %s481_s21   ;;  %p438_p0 = scmp.ge.s32.totalorder %s481_s21, 1  ;;  %s481_s21 = sphi %s520_s21, %s16_s21  }
   0x2   : > { %p220_p1 = scmp.lt.s32.totalorder %s481_s21, 3 }
   0x4   : > { %p221_p2 = pnand %p438_p0, %p220_p1 }
   0x5   : > { %v471_v0 = vld [vmem:[%s565_s2] sm:$0xff] (!%p221_p2)   ;;  %v483_v1 = vmov (!%p221_p2), 0.0   ;;  %v472_v2 = vld [vmem:[%s565_s2 + $0x8] sm:$0xff] (!%p221_p2)   ;;  %vm484_vm0 = vmmov (!%p221_p2), 0   ;;  %p252_p3 = scmp.lt.s32.totalorder (!%p221_p2), %s434_s22, 1  ;;  %vm289_vm1 = vcmask (!%p221_p2), 261120  }
   0x6   : > { %224 = sbr.rel (%p221_p2) target bundleno = 549 (0x225), region = 44  ;;  %453 = vmatprep.subr.bf16.mxu0 (!%p221_p2), %v483_v1  ;;  %457 = vmatprep.mubr.msk.bf16.mxu0 (!%p221_p2), %vm484_vm0, %v483_v1  ;;  %v442_v5 = vld [vmem:[%s566_s3] ss:$0 sm:$0xff] (!%p221_p2)  ;;  %vm367_vm2 = vcmask (!%p221_p2), 257024  }
   0x7   : > { %454 = vmatpush3.bf16.msra.mxu0 (!%p221_p2), %v471_v0  ;;  %v446_v23 = vld [vmem:[%s567_s4] ss:$0 sm:$0xff] (!%p221_p2) }
   0x8   : > { %455 = vmatprep.subr.bf16.mxu0 (!%p221_p2), %v483_v1  ;;  %v447_v25 = vld [vmem:[%s568_s5] ss:$0 sm:$0xff] (!%p221_p2) }
   0xb   : > { %456 = vmatpush3.bf16.msra.mxu0 (!%p221_p2), %v472_v2 }
   0xd   : > { %s571_s22 = smov (!%p252_p3, %s434_s22), 1 }
   0xe   : > { %s534_s27 = sshll.u32 %s571_s22, 2 }
   0xf   : > { %s255_s30 = scalar_lea.vmem %s563_s0, %s534_s27  ;;  %s259_s9 = scalar_lea.vmem %s564_s1, %s534_s27 }
  0x10   : > { %v265_v3 = vld [vmem:[%s255_s30] sm:$0xf]  ;;  %s263_s18 = scalar_lea.vmem %s569_s6, %s534_s27 }
  0x11   : > { %458 = vmatmul.mubr.msk.bf16.vlgmr.msra.gmra.mrb[0].mxu0 %vm289_vm1, %v265_v3  ;;  %v333_v4 = vld [vmem:[%s259_s9] sm:$0xf] }
  0x12   : > { %v334_v6 = vunpack.c.l.bf16 %v333_v4 }
  0xe4   : > { %v327_v7 = vpop.f32.mrb[0].mxu0 }
  0xe5   : > { %v328_v8 = vadd.f32 %v442_v5, %v327_v7  ;;  %v459_v9 = vpop.f32.mrb[1].mxu0 }
  0xe6   : > { %v330_v10 = vpop.f32.mrb[2].mxu0 }
  0xe7   : > { %v460_v11 = vpop.f32.mrb[3].mxu0  ;;  %v335_v12 = vadd.f32 %v334_v6, %v328_v8 }
  0xe9   : > { %v336_v13 = vsel %vm289_vm1, %v335_v12, 0.0 }
  0xea   : > { %337 = vadd.xlane.f32.xlu0 %v336_v13 }
 0x177   : > { %v338_v14 = vpop.xlane.xlu0 %337 }
 0x178   : > { %v340_v15 = vmul.f32 0.03125, %v338_v14 }
 0x17a   : > { %v341_v16 = vsub.f32 %v335_v12, %v340_v15 }
 0x17c   : > { %v342_v17 = vmul.f32 %v341_v16, %v341_v16 }
 0x17e   : > { %v343_v18 = vsel %vm289_vm1, %v342_v17, 0.0 }
 0x17f   : > { %344 = vadd.xlane.f32.xlu0 %v343_v18 }
 0x20c   : > { %v345_v19 = vpop.xlane.xlu0 %344 }
 0x20d   : > { %v346_v20 = vmul.f32 0.03125, %v345_v19 }
 0x20f   : > { %v347_v21 = vadd.f32 1e-05, %v346_v20 }
 0x211   : > { %473 = vrsqrt.f32 %v347_v21 }
 0x21b   : > { %v474_v22 = vpop.eup %473 }
 0x21c   : > { %v349_v24 = vmul.f32 %v474_v22, %v341_v16 }
 0x21e   : > { %v357_v26 = vmul.f32 %v446_v23, %v349_v24 }
 0x220   : > { %v365_v27 = vadd.f32 %v447_v25, %v357_v26 }
 0x222   : > { %v366_v28 = vpack.c.bf16 %v365_v27, %v365_v27 }
 0x224   : > { %368 = vst.msk [vmem:[%s263_s18] sm:$0xf] %vm367_vm2, %v366_v28 }
 0x225 PF: > { %s16_s21 = sadd.s32 1, %s481_s21  }
 0x226   : > { %p13_p4 = scmp.ge.s32.totalorder %s16_s21, 4  }
 0x228   :  { %15 = sbr.rel (!%p13_p4) target bundleno = 1 (0x1), region = 77 }

// kernel: deformable_transformer_forward.36
= control target key start
LH: loop header
LB: loop body
LE: loop exit
PB: predicated region body
PF: predicated region fallthrough
CT: control target
= control target key end

     0   :  { %s606_s18 = smov 0   ;;  %s656_s0 = inlined_call_operand.vmem [shape: bf16[16,32], index: 0, kind: input, shape index: {}]   ;;  %s657_s1 = inlined_call_operand.vmem [shape: bf16[16,32], index: 1, kind: input, shape index: {}]   ;;  %s658_s2 = inlined_call_operand.vmem [shape: bf16[32,48], index: 2, kind: input, shape index: {}]   ;;  %s659_s3 = inlined_call_operand.vmem [shape: f32[1,48], index: 3, kind: input, shape index: {}]   ;;  %s660_s4 = inlined_call_operand.vmem [shape: f32[16,32], index: 4, kind: output, shape index: {0}]   ;;  %s661_s5 = inlined_call_operand.vmem [shape: f32[16,16], index: 5, kind: output, shape index: {1}]  }
   0x1 LB: > { %s504_s19 = sadd.s32 4294967295, %s568_s18   ;;  %p508_p0 = scmp.ge.s32.totalorder %s568_s18, 1  ;;  %s568_s18 = sphi %s606_s18, %s16_s18  }
   0x2   : > { %p198_p1 = scmp.lt.s32.totalorder %s568_s18, 3 }
   0x4   : > { %p199_p2 = pnand %p508_p0, %p198_p1 }
   0x5   : > { %v544_v0 = vld [vmem:[%s658_s2] sm:$0xff] (!%p199_p2)   ;;  %v570_v1 = vmov (!%p199_p2), 0.0   ;;  %v545_v2 = vld [vmem:[%s658_s2 + $0x8] sm:$0xff] (!%p199_p2)   ;;  %vm571_vm0 = vmmov (!%p199_p2), 0   ;;  %p232_p3 = scmp.lt.s32.totalorder (!%p199_p2), %s504_s19, 1  ;;  %vm275_vm1 = vcmask (!%p199_p2), 261120  }
   0x6   : > { %202 = sbr.rel (%p199_p2) target bundleno = 792 (0x318), region = 36  ;;  %522 = vmatprep.subr.bf16.mxu0 (!%p199_p2), %v570_v1  ;;  %526 = vmatprep.mubr.msk.bf16.mxu0 (!%p199_p2), %vm571_vm0, %v570_v1  ;;  %v513_v6 = vld [vmem:[%s659_s3] ss:$0 sm:$0xff] (!%p199_p2)  ;;  %vm353_vm2 = vcmask (!%p199_p2), 359744   ;;  %vm320_vm3 = vcmask (!%p199_p2), 294144   ;;  %vm369_vm4 = vcmask (!%p199_p2), 392544  }
   0x7   : > { %523 = vmatpush3.bf16.msra.mxu0 (!%p199_p2), %v544_v0  ;;  %vm337_vm5 = vcmask (!%p199_p2), 326944   ;;  %s572_s12 = smov (!%p199_p2), 96   ;;  %s573_s13 = smov (!%p199_p2), 92   ;;  %vm331_vm6 = vcmask (!%p199_p2), 31744   ;;  %vm402_vm7 = vcmask (!%p199_p2), 64512   ;;  %vm404_vm8 = vcmask (!%p199_p2), 97280  }
   0x8   : > { %524 = vmatprep.subr.bf16.mxu0 (!%p199_p2), %v570_v1  ;;  %s574_s14 = smov (!%p199_p2), 88   ;;  %s575_s15 = smov (!%p199_p2), 84   ;;  %vm406_vm9 = vcmask (!%p199_p2), 130048  }
   0xb   : > { %525 = vmatpush3.bf16.msra.mxu0 (!%p199_p2), %v545_v2 }
   0xd   : > { %s663_s19 = smov (!%p232_p3, %s504_s19), 1 }
   0xe   : > { %s509_s24 = sshll.u32 %s663_s19, 2  ;;  %s511_s6 = sshll.u32 %s663_s19, 3 }
   0xf   : > { %s235_s27 = scalar_lea.vmem %s656_s0, %s509_s24  ;;  %s239_s30 = scalar_lea.vmem %s657_s1, %s509_s24 }
  0x10   : > { %v249_v3 = vld [vmem:[%s235_s27] sm:$0xf]  ;;  %s243_s11 = scalar_lea.vmem %s660_s4, %s511_s6  ;;  %s247_s20 = scalar_lea.vmem %s661_s5, %s511_s6 }
  0x11   : > { %v250_v4 = vld [vmem:[%s239_s30] sm:$0xf] }
  0x12   : > { %v251_v5 = vadd.bf16 %v250_v4, %v249_v3 }
  0x14   : > { %527 = vmatmul.mubr.msk.bf16.vlgmr.msra.gmra.mrb[0].mxu0 %vm275_vm1, %v251_v5 }
  0xe7   : > { %v313_v7 = vpop.f32.mrb[0].mxu0 }
  0xe8   : > { %v314_v8 = vadd.f32 %v513_v6, %v313_v7  ;;  %v528_v9 = vpop.f32.mrb[1].mxu0 }
  0xe9   : > { %v316_v10 = vpop.f32.mrb[2].mxu0 }
  0xea   : > { %v529_v11 = vpop.f32.mrb[3].mxu0  ;;  %v354_v12 = vsel %vm353_vm2, %v314_v8, -inf  ;;  %v321_v13 = vsel %vm320_vm3, %v314_v8, -inf  ;;  %319 = vst.msk [vmem:[%s243_s11] sm:$0xff] %vm275_vm1, %v314_v8  ;;  %v370_v14 = vsel %vm369_vm4, %v314_v8, -inf  ;;  %v338_v15 = vsel %vm337_vm5, %v314_v8, -inf }
  0xeb   : > { %355 = vmax.xlane.f32.xlu1 %v354_v12  ;;  %322 = vmax.xlane.f32.xlu0 %v321_v13 }
  0xef   : > { %371 = vmax.xlane.f32.xlu1 %v370_v14  ;;  %339 = vmax.xlane.f32.xlu0 %v338_v15 }
 0x178   : > { %v323_v16 = vpop.xlane.xlu0 %322  ;;  %v356_v17 = vpop.xlane.xlu1 %355 }
 0x179   : > { %v324_v18 = vsub.f32 %v314_v8, %v323_v16  ;;  %v357_v22 = vsub.f32 %v314_v8, %v356_v17 }
 0x17b   : > { %v325_v19 = vmul.f32 1.442695, %v324_v18  ;;  %v358_v25 = vmul.f32 1.442695, %v357_v22 }
 0x17c   : > { %v340_v20 = vpop.xlane.xlu0 %339  ;;  %v372_v23 = vpop.xlane.xlu1 %371 }
 0x17d   : > { %v341_v21 = vsub.f32 %v314_v8, %v340_v20  ;;  %546 = vpow2.f32 %v325_v19  ;;  %v373_v26 = vsub.f32 %v314_v8, %v372_v23 }
 0x17f   : > { %v342_v24 = vmul.f32 1.442695, %v341_v21  ;;  %v374_v27 = vmul.f32 1.442695, %v373_v26 }
 0x181   : > { %548 = vpow2.f32 %v342_v24 }
 0x182   : > { %550 = vpow2.f32 %v358_v25 }
 0x183   : > { %552 = vpow2.f32 %v374_v27 }
 0x187   : > { %v547_v28 = vpop.eup %546 }
 0x188   : > { %328 = vrot.lane.b32.xlu0 %v547_v28, %s572_s12 }
 0x18b   : > { %v549_v29 = vpop.eup %548 }
 0x18c   : > { %345 = vrot.lane.b32.xlu1 %v549_v29, %s573_s13  ;;  %v551_v30 = vpop.eup %550 }
 0x18d   : > { %v553_v31 = vpop.eup %552 }
 0x190   : > { %361 = vrot.lane.b32.xlu1 %v551_v30, %s574_s14 }
 0x194   : > { %377 = vrot.lane.b32.xlu1 %v553_v31, %s575_s15 }
 0x1fa   : > { %v329_v32 = vpop.permute.xlu0 %328 }
 0x1fb   : > { %v332_v33 = vsel %vm331_vm6, %v329_v32, 0.0 }
 0x1fc   : > { %333 = vadd.xlane.f32.xlu0 %v332_v33 }
 0x1fe   : > { %v346_v34 = vpop.permute.xlu1 %345 }
 0x1ff   : > { %v348_v35 = vsel %vm331_vm6, %v346_v34, 0.0 }
 0x200   : > { %349 = vadd.xlane.f32.xlu1 %v348_v35 }
 0x202   : > { %v362_v36 = vpop.permute.xlu1 %361 }
 0x203   : > { %v364_v37 = vsel %vm331_vm6, %v362_v36, 0.0 }
 0x204   : > { %365 = vadd.xlane.f32.xlu0 %v364_v37 }
 0x206   : > { %v378_v38 = vpop.permute.xlu1 %377 }
 0x207   : > { %v380_v39 = vsel %vm331_vm6, %v378_v38, 0.0 }
 0x208   : > { %381 = vadd.xlane.f32.xlu0 %v380_v39 }
 0x289   : > { %v334_v40 = vpop.xlane.xlu0 %333 }
 0x28a   : > { %554 = vrcp.f32 %v334_v40 }
 0x28d   : > { %v350_v41 = vpop.xlane.xlu1 %349 }
 0x28e   : > { %556 = vrcp.f32 %v350_v41 }
 0x291   : > { %v366_v42 = vpop.xlane.xlu0 %365 }
 0x292   : > { %558 = vrcp.f32 %v366_v42 }
 0x294   : > { %v555_v43 = vpop.eup %554 }
 0x295   : > { %v382_v44 = vpop.xlane.xlu0 %381  ;;  %v336_v45 = vmul.f32 %v555_v43, %v547_v28 }
 0x296   : > { %560 = vrcp.f32 %v382_v44 }
 0x297   : > { %386 = vrot.lane.b32.xlu0 %v336_v45, %s572_s12 }
 0x298   : > { %v557_v46 = vpop.eup %556 }
 0x299   : > { %v352_v47 = vmul.f32 %v557_v46, %v549_v29 }
 0x29b   : > { %390 = vrot.lane.b32.xlu1 %v352_v47, %s572_s12 }
 0x29c   : > { %v559_v48 = vpop.eup %558 }
 0x29d   : > { %v368_v49 = vmul.f32 %v559_v48, %v551_v30 }
 0x29f   : > { %394 = vrot.lane.b32.xlu1 %v368_v49, %s572_s12 }
 0x2a0   : > { %v561_v50 = vpop.eup %560 }
 0x2a1   : > { %v384_v51 = vmul.f32 %v561_v50, %v553_v31 }
 0x2a3   : > { %398 = vrot.lane.b32.xlu1 %v384_v51, %s572_s12 }
 0x309   : > { %v387_v54 = vpop.permute.xlu0 %386 }
 0x30d   : > { %v391_v52 = vpop.permute.xlu1 %390 }
 0x30e   : > { %v401_v55 = vsel %vm331_vm6, %v387_v54, %v391_v52 }
 0x311   : > { %v395_v53 = vpop.permute.xlu1 %394 }
 0x312   : > { %v403_v56 = vsel %vm402_vm7, %v401_v55, %v395_v53 }
 0x315   : > { %v399_v57 = vpop.permute.xlu1 %398 }
 0x316   : > { %v405_v58 = vsel %vm404_vm8, %v403_v56, %v399_v57 }
 0x317   : > { %407 = vst.msk [vmem:[%s247_s20] sm:$0xff] %vm406_vm9, %v405_v58 }
 0x318 PF: > { %s16_s18 = sadd.s32 1, %s568_s18  }
 0x319   : > { %p13_p4 = scmp.ge.s32.totalorder %s16_s18, 4  }
 0x31b   :  { %15 = sbr.rel (!%p13_p4) target bundleno = 1 (0x1), region = 81 }

// kernel: deformable_transformer_forward.31
= control target key start
LH: loop header
LB: loop body
LE: loop exit
PB: predicated region body
PF: predicated region fallthrough
CT: control target
= control target key end

     0   :  { %s356_s12 = smov 0   ;;  %s382_s0 = inlined_call_operand.vmem [shape: bf16[16,32], index: 0, kind: input, shape index: {}]   ;;  %s383_s1 = inlined_call_operand.vmem [shape: bf16[32,2], index: 1, kind: input, shape index: {}]   ;;  %s384_s2 = inlined_call_operand.vmem [shape: f32[1,2], index: 2, kind: input, shape index: {}]   ;;  %s385_s3 = inlined_call_operand.vmem [shape: f32[16,2], index: 3, kind: output, shape index: {}]  }
   0x1 LB: > { %s290_s13 = sadd.s32 4294967295, %s332_s12   ;;  %p294_p0 = scmp.ge.s32.totalorder %s332_s12, 1  ;;  %s332_s12 = sphi %s356_s12, %s13_s12  }
   0x2   : > { %p136_p1 = scmp.lt.s32.totalorder %s332_s12, 3 }
   0x4   : > { %p137_p2 = pnand %p294_p0, %p136_p1 }
   0x5   : > { %v324_v0 = vld [vmem:[%s383_s1] sm:$0xff] (!%p137_p2)   ;;  %v334_v1 = vmov (!%p137_p2), 0.0   ;;  %v325_v2 = vld [vmem:[%s383_s1 + $0x8] sm:$0xff] (!%p137_p2)   ;;  %vm335_vm0 = vmmov (!%p137_p2), 0   ;;  %p158_p3 = scmp.lt.s32.totalorder (!%p137_p2), %s290_s13, 1  ;;  %vm191_vm1 = vcmask (!%p137_p2), 261120  }
   0x6   : > { %140 = sbr.rel (%p137_p2) target bundleno = 232 (0xe8), region = 32  ;;  %306 = vmatprep.subr.bf16.mxu0 (!%p137_p2), %v334_v1  ;;  %310 = vmatprep.mubr.msk.bf16.mxu0 (!%p137_p2), %vm335_vm0, %v334_v1  ;;  %v297_v4 = vld [vmem:[%s384_s2] ss:$0 sm:$0xff] (!%p137_p2)  ;;  %vm235_vm2 = vcmask (!%p137_p2), 15360  }
   0x7   : > { %307 = vmatpush3.bf16.msra.mxu0 (!%p137_p2), %v324_v0 }
   0x8   : > { %308 = vmatprep.subr.bf16.mxu0 (!%p137_p2), %v334_v1 }
   0xb   : > { %309 = vmatpush3.bf16.msra.mxu0 (!%p137_p2), %v325_v2 }
   0xd   : > { %s387_s13 = smov (!%p158_p3, %s290_s13), 1 }
   0xe   : > { %s295_s18 = sshll.u32 %s387_s13, 2  ;;  %s296_s22 = sshll.u32 %s387_s13, 3 }
   0xf   : > { %s161_s21 = scalar_lea.vmem %s382_s0, %s295_s18  ;;  %s165_s27 = scalar_lea.vmem %s385_s3, %s296_s22 }
  0x10   : > { %v167_v3 = vld [vmem:[%s161_s21] sm:$0xf] }
  0x11   : > { %311 = vmatmul.mubr.msk.bf16.vlgmr.msra.gmra.mrb[0].mxu0 %vm191_vm1, %v167_v3 }
  0xe4   : > { %v229_v5 = vpop.f32.mrb[0].mxu0 }
  0xe5   : > { %v230_v6 = vadd.f32 %v297_v4, %v229_v5  ;;  %v312_v7 = vpop.f32.mrb[1].mxu0 }
  0xe6   : > { %v232_v8 = vpop.f32.mrb[2].mxu0 }
  0xe7   : > { %236 = vst.msk [vmem:[%s165_s27] sm:$0xff] %vm235_vm2, %v230_v6  ;;  %v313_v9 = vpop.f32.mrb[3].mxu0 }
  0xe8 PF: > { %s13_s12 = sadd.s32 1, %s332_s12  }
  0xe9   : > { %p10_p4 = scmp.ge.s32.totalorder %s13_s12, 4  }
  0xeb   :  { %12 = sbr.rel (!%p10_p4) target bundleno = 1 (0x1), region = 62 }

// kernel: deformable_transformer_forward.38
= control target key start
LH: loop header
LB: loop body
LE: loop exit
PB: predicated region body
PF: predicated region fallthrough
CT: control target
= control target key end

     0   :  { %s633_s24 = smov 0   ;;  %s690_s0 = inlined_call_operand.vmem [shape: bf16[16,32], index: 0, kind: input, shape index: {}]   ;;  %s691_s1 = inlined_call_operand.vmem [shape: bf16[32,64], index: 1, kind: input, shape index: {}]   ;;  %s692_s2 = inlined_call_operand.vmem [shape: f32[1,64], index: 2, kind: input, shape index: {}]   ;;  %s693_s3 = inlined_call_operand.vmem [shape: bf16[64,32], index: 3, kind: input, shape index: {}]   ;;  %s694_s4 = inlined_call_operand.vmem [shape: f32[1,32], index: 4, kind: input, shape index: {}]   ;;  %s695_s5 = inlined_call_operand.vmem [shape: f32[1,32], index: 5, kind: input, shape index: {}]   ;;  %s696_s6 = inlined_call_operand.vmem [shape: f32[1,32], index: 6, kind: input, shape index: {}]   ;;  %s697_s7 = inlined_call_operand.vmem [shape: bf16[16,32], index: 7, kind: output, shape index: {}]  }
   0x1 LB: > { %s516_s25 = sadd.s32 4294967295, %s589_s24   ;;  %p520_p0 = scmp.ge.s32.totalorder %s589_s24, 1  ;;  %s589_s24 = sphi %s633_s24, %s17_s24  }
   0x2   : > { %p236_p1 = scmp.lt.s32.totalorder %s589_s24, 3 }
   0x4   : > { %p237_p2 = pnand %p520_p0, %p236_p1 }
   0x5   : > { %v575_v0 = vld [vmem:[%s691_s1] sm:$0xff] (!%p237_p2)   ;;  %v591_v1 = vmov (!%p237_p2), 0.0   ;;  %v576_v2 = vld [vmem:[%s691_s1 + $0x8] sm:$0xff] (!%p237_p2)   ;;  %vm592_vm0 = vmmov (!%p237_p2), 0   ;;  %p266_p3 = scmp.lt.s32.totalorder (!%p237_p2), %s516_s25, 1  ;;  %vm299_vm1 = vcmask (!%p237_p2), 261120  }
   0x6   : > { %240 = sbr.rel (%p237_p2) target bundleno = 767 (0x2ff), region = 48  ;;  %545 = vmatprep.subr.bf16.mxu0 (!%p237_p2), %v591_v1  ;;  %553 = vmatprep.subr.bf16.mxu1 (!%p237_p2), %v591_v1  ;;  %v577_v3 = vld [vmem:[%s693_s3] sm:$0xff] (!%p237_p2)   ;;  %v578_v4 = vld [vmem:[%s693_s3 + $0x8] sm:$0xff] (!%p237_p2)   ;;  %v579_v6 = vld [vmem:[%s693_s3 + $0x10] sm:$0xff] (!%p237_p2)   ;;  %vm384_vm2 = vcmask (!%p237_p2), 523264   ;;  %vm461_vm3 = vcmask (!%p237_p2), 257024  }
   0x7   : > { %546 = vmatpush3.bf16.msra.mxu0 (!%p237_p2), %v575_v0  ;;  %549 = vmatprep.mubr.msk.bf16.mxu0 (!%p237_p2), %vm592_vm0, %v591_v1  ;;  %v580_v7 = vld [vmem:[%s693_s3 + $0x18] sm:$0xff] (!%p237_p2)   ;;  %v523_v8 = vld [vmem:[%s692_s2] ss:$0 sm:$0xff] (!%p237_p2) }
   0x8   : > { %547 = vmatprep.subr.bf16.mxu0 (!%p237_p2), %v591_v1  ;;  %561 = vmatprep.mubr.msk.bf16.mxu1 (!%p237_p2), %vm592_vm0, %v591_v1  ;;  %v527_v16 = vld [vmem:[%s694_s4] ss:$0 sm:$0xff] (!%p237_p2) }
   0x9   : > { %554 = vmatpush3.bf16.msra.mxu1 (!%p237_p2), %v577_v3  ;;  %v533_v34 = vld [vmem:[%s695_s5] ss:$0 sm:$0xff] (!%p237_p2) }
   0xa   : > { %555 = vmatprep.subr.bf16.mxu1 (!%p237_p2), %v591_v1  ;;  %v534_v36 = vld [vmem:[%s696_s6] ss:$0 sm:$0xff] (!%p237_p2) }
   0xb   : > { %548 = vmatpush3.bf16.msra.mxu0 (!%p237_p2), %v576_v2 }
   0xd   : > { %s699_s25 = smov (!%p266_p3, %s516_s25), 1  ;;  %556 = vmatpush3.bf16.msra.mxu1 %v578_v4 }
   0xe   : > { %s521_s11 = sshll.u32 %s699_s25, 2  ;;  %557 = vmatprep.subr.bf16.mxu1 %v591_v1 }
   0xf   : > { %s269_s14 = scalar_lea.vmem %s690_s0, %s521_s11  ;;  %s273_s8 = scalar_lea.vmem %s697_s7, %s521_s11 }
  0x10   : > { %v275_v5 = vld [vmem:[%s269_s14] sm:$0xf] }
  0x11   : > { %550 = vmatmul.mubr.msk.bf16.vlgmr.msra.gmra.mrb[0].mxu0 %vm299_vm1, %v275_v5  ;;  %558 = vmatpush3.bf16.msra.mxu1 %v579_v6  ;;  %v428_v17 = vunpack.c.l.bf16 %v275_v5 }
  0x12   : > { %559 = vmatprep.subr.bf16.mxu1 %v591_v1 }
  0x15   : > { %560 = vmatpush3.bf16.msra.mxu1 %v580_v7 }
  0xe4   : > { %v337_v9 = vpop.f32.mrb[0].mxu0 }
  0xe5   : > { %v338_v10 = vadd.f32 %v523_v8, %v337_v9  ;;  %v551_v11 = vpop.f32.mrb[1].mxu0 }
  0xe6   : > { %v340_v12 = vpop.f32.mrb[2].mxu0 }
  0xe7   : > { %v343_v13 = vmax.f32 %v338_v10, 0.0  ;;  %v552_v14 = vpop.f32.mrb[3].mxu0 }
  0xe9   : > { %v344_v15 = vpack.c.bf16 %v343_v13, %v343_v13 }
  0xeb   : > { %562 = vmatmul.mubr.msk.bf16.vlgmr.msra.gmra.mrb[0].mxu1 %vm384_vm2, %v344_v15 }
 0x1be   : > { %v422_v18 = vpop.f32.mrb[0].mxu1 }
 0x1bf   : > { %v423_v19 = vadd.f32 %v527_v16, %v422_v18  ;;  %v563_v20 = vpop.f32.mrb[1].mxu1 }
 0x1c0   : > { %v425_v21 = vpop.f32.mrb[2].mxu1 }
 0x1c1   : > { %v564_v22 = vpop.f32.mrb[3].mxu1  ;;  %v429_v23 = vadd.f32 %v428_v17, %v423_v19 }
 0x1c3   : > { %v430_v24 = vsel %vm299_vm1, %v429_v23, 0.0 }
 0x1c4   : > { %431 = vadd.xlane.f32.xlu0 %v430_v24 }
 0x251   : > { %v432_v25 = vpop.xlane.xlu0 %431 }
 0x252   : > { %v434_v26 = vmul.f32 0.03125, %v432_v25 }
 0x254   : > { %v435_v27 = vsub.f32 %v429_v23, %v434_v26 }
 0x256   : > { %v436_v28 = vmul.f32 %v435_v27, %v435_v27 }
 0x258   : > { %v437_v29 = vsel %vm299_vm1, %v436_v28, 0.0 }
 0x259   : > { %438 = vadd.xlane.f32.xlu0 %v437_v29 }
 0x2e6   : > { %v439_v30 = vpop.xlane.xlu0 %438 }
 0x2e7   : > { %v440_v31 = vmul.f32 0.03125, %v439_v30 }
 0x2e9   : > { %v441_v32 = vadd.f32 1e-05, %v440_v31 }
 0x2eb   : > { %581 = vrsqrt.f32 %v441_v32 }
 0x2f5   : > { %v582_v33 = vpop.eup %581 }
 0x2f6   : > { %v443_v35 = vmul.f32 %v582_v33, %v435_v27 }
 0x2f8   : > { %v451_v37 = vmul.f32 %v533_v34, %v443_v35 }
 0x2fa   : > { %v459_v38 = vadd.f32 %v534_v36, %v451_v37 }
 0x2fc   : > { %v460_v39 = vpack.c.bf16 %v459_v38, %v459_v38 }
 0x2fe   : > { %462 = vst.msk [vmem:[%s273_s8] sm:$0xf] %vm461_vm3, %v460_v39 }
 0x2ff PF: > { %s17_s24 = sadd.s32 1, %s589_s24  }
 0x300   : > { %p14_p4 = scmp.ge.s32.totalorder %s17_s24, 4  }
 0x302   :  { %16 = sbr.rel (!%p14_p4) target bundleno = 1 (0x1), region = 78 }

</bundles_post_ra>
